<compile_context>
chip_gen: v5e
topology: v5e:2x2
jax: 0.10.0
libtpu: 0.0.40
codegen_flags: <defaults>
</compile_context>

<pallas_src>
import functools

import jax
import jax.numpy as jnp
from jax import lax
from jax.experimental import pallas as pl
from jax.experimental.pallas import tpu as pltpu


def _round_up(v, m):
    return (v + m - 1) // m * m


def _gcn_kernel(edge_ref, payload_ref, out_ref, ids_ref, *,
                out_dim, tile_n, packed):
    n = pl.program_id(0)                 # node-tile index ("parallel")
    e = pl.program_id(1)                 # edge-tile index ("arbitrary" reduction)
    od_pad = payload_ref.shape[1]

    # Once per node tile (start of the edge reduction): zero the resident output
    # accumulator and (re)fill the hoisted node-id column (no per-step 2-D iota).
    @pl.when(e == 0)
    def _():
        ids_ref[...] = lax.broadcasted_iota(jnp.int32, ids_ref.shape, 0)
        out_ref[...] = jnp.zeros_like(out_ref)

    src_row = edge_ref[0:1, :]           # [1, TE] int32
    dst_row = edge_ref[1:2, :]           # [1, TE] int32

    # Node-major one-hot src gather: A[v, e] = (v == src[e]).
    A = (ids_ref[...] == src_row).astype(jnp.float32)              # [N_pad, TE]
    # g = A^T @ payload via a transposed contraction (no XLU transpose).
    g = lax.dot_general(A, payload_ref[...], (((0,), (0,)), ((), ())),
                        preferred_element_type=jnp.float32)         # [TE, OD_pad]

    # Tile-local one-hot dst scatter: B[u, e] = (tile_base + u == dst[e]).
    n0 = pl.multiple_of(n * tile_n, tile_n)
    B = (ids_ref[pl.ds(n0, tile_n), :] == dst_row).astype(jnp.float32)  # [TN, TE]

    col_s_src = 2 * out_dim if packed else out_dim
    col_s_dst = col_s_src + 1

    s_src = g[:, col_s_src:col_s_src + 1]                            # [TE, 1] (bias folded)

    # s_dst gathered at dst.  Out-of-tile / padded edges get 0 here, but they also
    # scatter 0 below, so the result is unaffected.
    p_tile = payload_ref[pl.ds(n0, tile_n), :]                       # [TN, OD_pad]
    s_dst = lax.dot_general(B, p_tile[:, col_s_dst:col_s_dst + 1],
                            (((0,), (0,)), ((), ())),
                            preferred_element_type=jnp.float32)      # [TE, 1]

    pre = s_src + s_dst
    score = jnp.where(pre >= 0, pre, 0.01 * pre)                     # LeakyReLU(0.01)
    weighted = score * g                                             # [TE, OD_pad]

    if packed:
        # lin columns are duplicated in cols [0 : 2*out_dim]; lane-mask so the first
        # copy scatters `weighted` and the second scatters |weighted| — one 128-lane
        # scatter matmul accumulated into the resident output block.
        lane = lax.broadcasted_iota(jnp.int32, (1, od_pad), 1)
        fused = jnp.where(lane < out_dim, weighted, jnp.abs(weighted))
        out_ref[...] += jnp.dot(B, fused, preferred_element_type=jnp.float32)
    else:
        # General path: two accumulating dots instead of a [TE, 2*OD_pad] concat temp.
        out_ref[:, :od_pad] += jnp.dot(B, weighted,
                                       preferred_element_type=jnp.float32)
        out_ref[:, od_pad:] += jnp.dot(B, jnp.abs(weighted),
                                       preferred_element_type=jnp.float32)


def gcn_convolution(x, edge_index, w_lin, w_att, b_att, *, tile_e=512, tile_n=None):
    """x: [N, in_dim] f32, edge_index: [2, E] int, w_lin: [out_dim, in_dim]
    (nn.Linear weight), w_att: [1, 2*in_dim], b_att: [1]."""
    N, in_dim = x.shape
    out_dim = w_lin.shape[0]
    E = edge_index.shape[1]

    packed = (2 * out_dim + 2) <= 128

    if tile_n is None:
        tile_n = min(_round_up(N, 8), 256)          # MXU row size on v6e/v7x
    tile_n = _round_up(tile_n, 8)
    tile_e = max(128, _round_up(tile_e, 128))

    id_pad = _round_up(in_dim + 1, 128)             # +1 bias column
    od_pad = 128 if packed else _round_up(out_dim + 2, 128)
    out_lanes = od_pad if packed else 2 * od_pad
    n_pad = _round_up(N, tile_n)
    e_pad = _round_up(E, tile_e)

    # Node features with a constant-1 bias column at index `in_dim`.
    x_pad = (jnp.zeros((n_pad, id_pad), jnp.float32)
             .at[:N, :in_dim].set(x.astype(jnp.float32))
             .at[:N, in_dim].set(1.0))

    wa = w_att.astype(jnp.float32).reshape(-1)       # [2*in_dim]
    b = jnp.asarray(b_att, jnp.float32).reshape(())
    wlt = jnp.transpose(w_lin).astype(jnp.float32)   # [in_dim, out_dim]
    wcomb = jnp.zeros((id_pad, od_pad), jnp.float32)
    if packed:
        wcomb = (wcomb
                 .at[:in_dim, :out_dim].set(wlt)
                 .at[:in_dim, out_dim:2 * out_dim].set(wlt)      # duplicate for |.| slab
                 .at[:in_dim, 2 * out_dim].set(wa[:in_dim])      # s_src weights
                 .at[:in_dim, 2 * out_dim + 1].set(wa[in_dim:])  # s_dst weights
                 .at[in_dim, 2 * out_dim].set(b))                # bias via 1-column
    else:
        wcomb = (wcomb
                 .at[:in_dim, :out_dim].set(wlt)
                 .at[:in_dim, out_dim].set(wa[:in_dim])
                 .at[:in_dim, out_dim + 1].set(wa[in_dim:])
                 .at[in_dim, out_dim].set(b))

    # Precompute the fused per-node payload ONCE with a plain XLA matmul
    # (perf review #1): [ lin | (lin) | s_src(+b) | s_dst | 0... ].
    payload = x_pad @ wcomb                                        # [n_pad, od_pad]

    # src/dst as one lane-major [2, e_pad] block (halves the tiny index DMAs).
    # Padded edges use -1 so both one-hots are all-zero.
    edges = jnp.full((2, e_pad), -1, jnp.int32).at[:, :E].set(
        edge_index.astype(jnp.int32))

    grid = (n_pad // tile_n, e_pad // tile_e)
    kernel = functools.partial(_gcn_kernel, out_dim=out_dim, tile_n=tile_n,
                               packed=packed)

    # VMEM footprint estimate with 2x headroom, capped well below v7x's 64 MiB.
    # (On newer JAX, pipeline_mode=pl.Buffered(1) on the constant-index payload
    #  block would shave its double buffer as well.)
    est_bytes = 4 * (2 * n_pad * od_pad        # payload (double-buffered)
                     + n_pad * tile_e          # A one-hot
                     + 4 * tile_e * od_pad     # g / weighted / fused temps
                     + 2 * tile_n * out_lanes  # resident output block
                     + n_pad * 128             # id scratch (lane padded)
                     + 4 * tile_e)             # edge ids
    vmem_limit = int(min(48 * 1024 * 1024, max(16 * 1024 * 1024, 2 * est_bytes)))

    out = pl.pallas_call(
        kernel,
        out_shape=jax.ShapeDtypeStruct((n_pad, out_lanes), jnp.float32),
        grid_spec=pltpu.PrefetchScalarGridSpec(
            num_scalar_prefetch=0,
            grid=grid,
            in_specs=[
                pl.BlockSpec((2, tile_e), lambda n, e: (0, e)),      # src/dst ids
                pl.BlockSpec((n_pad, od_pad), lambda n, e: (0, 0)),  # payload (resident)
            ],
            out_specs=pl.BlockSpec((tile_n, out_lanes), lambda n, e: (n, 0)),
            scratch_shapes=[pltpu.VMEM((n_pad, 1), jnp.int32)],      # hoisted node ids
        ),
        compiler_params=pltpu.CompilerParams(
            dimension_semantics=("parallel", "arbitrary"),
            vmem_limit_bytes=vmem_limit,
        ),
    )(edges, payload)

    features = out[:N, :out_dim]
    if packed:
        att_score = out[:N, out_dim:2 * out_dim]
    else:
        att_score = out[:N, od_pad:od_pad + out_dim]
    return features, att_score


def _reference(x, edge_index, w_lin, w_att, b_att):
    """Pure-JAX reference mirroring the PyTorch forward."""
    src, dst = edge_index[0], edge_index[1]
    h_src = x[src]
    h_dst = x[dst]
    pre = jnp.concatenate([h_src, h_dst], axis=-1) @ w_att.T + b_att
    score = jnp.where(pre >= 0, pre, 0.01 * pre)
    weighted = score * (h_src @ w_lin.T)
    N, out_dim = x.shape[0], w_lin.shape[0]
    feats = jnp.zeros((N, out_dim), jnp.float32).at[dst].add(weighted)
    atts = jnp.zeros((N, out_dim), jnp.float32).at[dst].add(jnp.abs(weighted))
    return feats, atts


if __name__ == "__main__":
    key = jax.random.PRNGKey(0)
    N, in_dim, out_dim, E = 256, 8, 32, 1600

    k_x, k_e1, k_e2, k_wl, k_wa, k_ba = jax.random.split(key, 6)
    x = jax.random.normal(k_x, (N, in_dim), jnp.float32)
    src = jax.random.randint(k_e1, (E,), 0, N, jnp.int32)
    dst = jax.random.randint(k_e2, (E,), 0, N, jnp.int32)
    edge_index = jnp.stack([src, dst], axis=0)                     # [2, E]

    # Deterministic parameters (nn.Linear weight conventions).
    w_lin = 0.1 * jax.random.normal(k_wl, (out_dim, in_dim), jnp.float32)
    w_att = 0.1 * jax.random.normal(k_wa, (1, 2 * in_dim), jnp.float32)
    b_att = 0.1 * jax.random.normal(k_ba, (1,), jnp.float32)

    # tile_n=128 / tile_e=512 -> grid (2, 4): >=2 node tiles feed both v7x TCs
    # ("parallel") and the edge axis exercises the resident-accumulator reduction.
    feats, att_score = gcn_convolution(x, edge_index, w_lin, w_att, b_att,
                                       tile_e=512, tile_n=128)
    jax.block_until_ready((feats, att_score))

    ref_feats, ref_atts = _reference(x, edge_index, w_lin, w_att, b_att)
    assert jnp.allclose(feats, ref_feats, atol=1e-4, rtol=1e-4), \
        float(jnp.max(jnp.abs(feats - ref_feats)))
    assert jnp.allclose(att_score, ref_atts, atol=1e-4, rtol=1e-4), \
        float(jnp.max(jnp.abs(att_score - ref_atts)))

    print("KERNEL_OK")
</pallas_src>

<mosaic_0001>
module attributes {stable_mosaic.version = 11 : i64} {
  func.func @_gcn_kernel(%arg0: i32, %arg1: i32, %arg2: memref<2x512xi32, #tpu.memory_space<vmem>>, %arg3: memref<256x128xf32, #tpu.memory_space<vmem>>, %arg4: memref<128x128xf32, #tpu.memory_space<vmem>>, %arg5: memref<256x1xi32, #tpu.memory_space<vmem>>) attributes {dimension_semantics = [#tpu.dimension_semantics<parallel>, #tpu.dimension_semantics<arbitrary>], iteration_bounds = array<i64: 2, 4>, scalar_prefetch = 0 : i64, scratch_operands = 1 : i64, tpu.core_type = #tpu.core_type<tc>, window_params = [{transform_indices = @transform_0, window_bounds = array<i64: 2, 512>}, {pipeline_mode = #tpu.pipeline_mode<synchronous>, transform_indices = @transform_1, window_bounds = array<i64: 256, 128>}, {transform_indices = @transform_2, window_bounds = array<i64: 128, 128>}]} {
    %c0_i32 = arith.constant 0 : i32
    %0 = arith.cmpi eq, %arg1, %c0_i32 : i32
    %1 = arith.extui %0 : i1 to i32
    %c0_i32_0 = arith.constant 0 : i32
    %2 = arith.cmpi ne, %1, %c0_i32_0 : i32
    scf.if %2 {
      %46 = tpu.iota {dimensions = array<i32: 0>} : vector<256x1xi32>
      %c0_17 = arith.constant 0 : index
      %c0_18 = arith.constant 0 : index
      %47 = vector.load %arg5[%c0_17, %c0_18] : memref<256x1xi32, #tpu.memory_space<vmem>>, vector<256x1xi32>
      tpu.vector_store %arg5[%c0_17, %c0_18], %46 {strides = array<i32>} : memref<256x1xi32, #tpu.memory_space<vmem>>, vector<256x1xi32>,
      %cst_19 = arith.constant 0.000000e+00 : f32
      %48 = vector.broadcast %cst_19 : f32 to vector<128x128xf32>
      %c0_20 = arith.constant 0 : index
      %c0_21 = arith.constant 0 : index
      %49 = vector.load %arg4[%c0_20, %c0_21] : memref<128x128xf32, #tpu.memory_space<vmem>>, vector<128x128xf32>
      tpu.vector_store %arg4[%c0_20, %c0_21], %48 {strides = array<i32>} : memref<128x128xf32, #tpu.memory_space<vmem>>, vector<128x128xf32>,
    } else {
    }
    %c0 = arith.constant 0 : index
    %c0_1 = arith.constant 0 : index
    %3 = vector.load %arg2[%c0, %c0_1] : memref<2x512xi32, #tpu.memory_space<vmem>>, vector<1x512xi32>
    %c1 = arith.constant 1 : index
    %c0_2 = arith.constant 0 : index
    %4 = vector.load %arg2[%c1, %c0_2] : memref<2x512xi32, #tpu.memory_space<vmem>>, vector<1x512xi32>
    %c0_3 = arith.constant 0 : index
    %c0_4 = arith.constant 0 : index
    %5 = vector.load %arg5[%c0_3, %c0_4] : memref<256x1xi32, #tpu.memory_space<vmem>>, vector<256x1xi32>
    %6 = vector.broadcast %5 : vector<256x1xi32> to vector<256x512xi32>
    %7 = vector.broadcast %3 : vector<1x512xi32> to vector<256x512xi32>
    %8 = arith.cmpi eq, %6, %7 : vector<256x512xi32>
    %9 = arith.extui %8 : vector<256x512xi1> to vector<256x512xi32>
    %10 = arith.sitofp %9 : vector<256x512xi32> to vector<256x512xf32>
    %c0_5 = arith.constant 0 : index
    %c0_6 = arith.constant 0 : index
    %11 = vector.load %arg3[%c0_5, %c0_6] : memref<256x128xf32, #tpu.memory_space<vmem>>, vector<256x128xf32>
    %cst = arith.constant dense<0.000000e+00> : vector<512x128xf32>
    %12 = tpu.matmul %10, %11, %cst {dimension_numbers = #tpu.dot_dimension_numbers<[0], [0], [1], [1], [0, 1, 1, 1], [], []>} : vector<256x512xf32>, vector<256x128xf32>, vector<512x128xf32> -> vector<512x128xf32>
    %c128_i32 = arith.constant 128 : i32
    %13 = arith.muli %arg0, %c128_i32 : i32
    %14 = tpu.assume_multiple %13, 128 : i32
    %15 = arith.index_cast %14 : i32 to index
    %c0_7 = arith.constant 0 : index
    %16 = vector.load %arg5[%15, %c0_7] : memref<256x1xi32, #tpu.memory_space<vmem>>, vector<128x1xi32>
    %17 = vector.broadcast %16 : vector<128x1xi32> to vector<128x512xi32>
    %18 = vector.broadcast %4 : vector<1x512xi32> to vector<128x512xi32>
    %19 = arith.cmpi eq, %17, %18 : vector<128x512xi32>
    %20 = arith.extui %19 : vector<128x512xi1> to vector<128x512xi32>
    %21 = arith.sitofp %20 : vector<128x512xi32> to vector<128x512xf32>
    %22 = vector.extract_strided_slice %12 {offsets = [0, 64], sizes = [512, 1], strides = [1, 1]} : vector<512x128xf32> to vector<512x1xf32>
    %23 = arith.index_cast %14 : i32 to index
    %c0_8 = arith.constant 0 : index
    %24 = vector.load %arg3[%23, %c0_8] : memref<256x128xf32, #tpu.memory_space<vmem>>, vector<128x128xf32>
    %25 = vector.extract_strided_slice %24 {offsets = [0, 65], sizes = [128, 1], strides = [1, 1]} : vector<128x128xf32> to vector<128x1xf32>
    %cst_9 = arith.constant dense<0.000000e+00> : vector<512x1xf32>
    %26 = tpu.matmul %21, %25, %cst_9 {dimension_numbers = #tpu.dot_dimension_numbers<[0], [0], [1], [1], [0, 1, 1, 1], [], []>} : vector<128x512xf32>, vector<128x1xf32>, vector<512x1xf32> -> vector<512x1xf32>
    %27 = arith.addf %22, %26 : vector<512x1xf32>
    %cst_10 = arith.constant 0.000000e+00 : f32
    %28 = vector.broadcast %cst_10 : f32 to vector<512x1xf32>
    %29 = arith.cmpf oge, %27, %28 : vector<512x1xf32>
    %cst_11 = arith.constant 0.00999999977 : f32
    %30 = vector.broadcast %cst_11 : f32 to vector<512x1xf32>
    %31 = arith.mulf %30, %27 : vector<512x1xf32>
    %32 = arith.select %29, %27, %31 : vector<512x1xi1>, vector<512x1xf32>
    %33 = vector.broadcast %32 : vector<512x1xf32> to vector<512x128xf32>
    %34 = arith.mulf %33, %12 : vector<512x128xf32>
    %35 = tpu.iota {dimensions = array<i32: 1>} : vector<1x128xi32>
    %c32_i32 = arith.constant 32 : i32
    %36 = vector.broadcast %c32_i32 : i32 to vector<1x128xi32>
    %37 = arith.cmpi slt, %35, %36 : vector<1x128xi32>
    %38 = math.absf %34 : vector<512x128xf32>
    %39 = vector.shape_cast %37 : vector<1x128xi1> to vector<1x128xi1>
    %40 = vector.broadcast %39 : vector<1x128xi1> to vector<512x128xi1>
    %41 = arith.select %40, %34, %38 : vector<512x128xi1>, vector<512x128xf32>
    %c0_12 = arith.constant 0 : index
    %c0_13 = arith.constant 0 : index
    %42 = vector.load %arg4[%c0_12, %c0_13] : memref<128x128xf32, #tpu.memory_space<vmem>>, vector<128x128xf32>
    %cst_14 = arith.constant dense<0.000000e+00> : vector<128x128xf32>
    %43 = tpu.matmul %21, %41, %cst_14 {dimension_numbers = #tpu.dot_dimension_numbers<[1], [0], [0], [1], [0, 0, 1, 1], [], []>} : vector<128x512xf32>, vector<512x128xf32>, vector<128x128xf32> -> vector<128x128xf32>
    %44 = arith.addf %42, %43 : vector<128x128xf32>
    %c0_15 = arith.constant 0 : index
    %c0_16 = arith.constant 0 : index
    %45 = vector.load %arg4[%c0_15, %c0_16] : memref<128x128xf32, #tpu.memory_space<vmem>>, vector<128x128xf32>
    tpu.vector_store %arg4[%c0_15, %c0_16], %44 {strides = array<i32>} : memref<128x128xf32, #tpu.memory_space<vmem>>, vector<128x128xf32>,
    return
  }
  func.func @transform_0(%arg0: i32, %arg1: i32) -> (i32, i32) {
    %c0_i32 = arith.constant 0 : i32
    %c0_i32_0 = arith.constant 0 : i32
    return %c0_i32, %arg1 : i32, i32
  }
  func.func @transform_1(%arg0: i32, %arg1: i32) -> (i32, i32) {
    %c0_i32 = arith.constant 0 : i32
    %c0_i32_0 = arith.constant 0 : i32
    %c0_i32_1 = arith.constant 0 : i32
    return %c0_i32, %c0_i32_0 : i32, i32
  }
  func.func @transform_2(%arg0: i32, %arg1: i32) -> (i32, i32) {
    %c0_i32 = arith.constant 0 : i32
    %c0_i32_0 = arith.constant 0 : i32
    return %arg0, %c0_i32 : i32, i32
  }
}

</mosaic_0001>

<bundles_post_ra>
// kernel: tpu_custom_call.1
= control target key start
LH: loop header
LB: loop body
LE: loop exit
PB: predicated region body
PF: predicated region fallthrough
CT: control target
= control target key end

     0   :  { %s7548_s0 = inlined_call_operand.hbm [shape: s32[2,2048], index: 0, kind: input, shape index: {}]   ;;  %s7549_s1 = inlined_call_operand.hbm [shape: f32[256,128], index: 1, kind: input, shape index: {}]   ;;  %s7550_s2 = inlined_call_operand.hbm [shape: f32[256,128], index: 2, kind: output, shape index: {}]  }
   0x1   :  { %7680 = sst [smem:[#allocation61_spill]] %s7549_s1 }
   0x2   :  { %7 = vsyncpa [#allocation4], 0 }
   0x3   :  { %9 = vsyncpa [#allocation4 + $0x1], 0 }
   0x4   :  { %10 = vsyncpa [#allocation7], 0 }
   0x5   :  { %11 = vsyncpa [#allocation5], 0 }
   0x6   :  { %13 = vsyncpa [#allocation5 + $0x1], 0  ;;  %s4971_s9 = smov 0   ;;  %s4973_s10 = smov 0  }
   0x7   :  { %s4975_s11 = smov 0   ;;  %s4977_s12 = smov 0  }
   0x8   :  { %s4979_s13 = smov 0   ;;  %s4981_s14 = smov 0  }
   0x9   :  { %s4983_s15 = smov 0   ;;  %s4985_s16 = smov 0  }
   0xa   :  { %s4987_s17 = smov 0   ;;  %s4989_s18 = smov 0  }
   0xb   :  { %s4991_s19 = smov 0  }
   0xc LB: > { %7681 = sst [smem:[#allocation12_spill]] %s4928_s17  ;;  %s3635_s20 = sadd.s32 4294967295, %s4936_s19   ;;  %s4936_s19 = sphi %s4991_s19, %s19_s19   ;;  %s4932_s18 = sphi %s4989_s18, %s7909_s18   ;;  %s4928_s17 = sphi %s4987_s17, %s7908_s17   ;;  %s4924_s16 = sphi %s4985_s16, %s7907_s16   ;;  %s4920_s15 = sphi %s4983_s15, %s7906_s15   ;;  %s4916_s14 = sphi %s4981_s14, %s7915_s14   ;;  %s4912_s13 = sphi %s4979_s13, %s7914_s13   ;;  %s4908_s12 = sphi %s4977_s12, %s7913_s12   ;;  %s4904_s11 = sphi %s4975_s11, %s7912_s11   ;;  %s4900_s10 = sphi %s4973_s10, %s7911_s10   ;;  %s4896_s9 = sphi %s4971_s9, %s7910_s9  }
   0xd   : > { %7682 = sst [smem:[#allocation13_spill]] %s4932_s18  ;;  %s3636_s21 = sadd.s32 4294967294, %s4936_s19  }
   0xe   : > { %p5028_p0 = scmp.eq.s32.totalorder %s3635_s20, 0  ;;  %p95_p1 = scmp.ne.s32.totalorder %s4904_s11, %s4900_s10 }
   0xf   : > { %p96_p2 = scmp.eq.s32.totalorder %s3635_s20, 7  ;;  %p101_p3 = scmp.ne.s32.totalorder %s4900_s10, %s4896_s9 }
  0x10   : > { %p102_p4 = scmp.eq.s32.totalorder %s3636_s21, 7  ;;  %p3637_p5 = scmp.ge.s32.totalorder %s4936_s19, 1 }
  0x11   : > { %p5037_p6 = por %p96_p2, %p95_p1  ;;  %p109_p7 = scmp.lt.s32.totalorder %s4936_s19, 9 }
  0x12   : > { %p5042_p8 = por %p102_p4, %p101_p3  ;;  %s7687_s1 = sld [smem:[#allocation61_spill]] }
  0x13   : > { %p5046_p9 = pnand %p3637_p5, %p109_p7  ;;  %s4938_s29 = smov [#allocation6]  }
  0x14   : > { %s122_s30 = sshll.u32 %s4938_s29, 4  ;;  %s4939_s3 = smov 128   ;;  %s123_s30 = int_to_ptr.vmem [resolvable:$true] %s122_s30 }
  0x15   : > { %p4251_p10 = pneg %p5046_p9  ;;  %s4940_s4 = smov 8  }
  0x16   : > { %s28_s5 = sadd.s32 1, %s4928_s17  ;;  %s31_s6 = sadd.s32 1, %s4932_s18 }
  0x17   : > { %p4252_p11 = pnand %p4251_p10, %p5028_p0  ;;  %p29_p12 = scmp.ge.s32.totalorder %s28_s5, 4 }
  0x18   : > { %s120_s28 = sshll.u32 %s7687_s1, 4  ;;  %s38_s7 = sadd.s32 1, %s4916_s14  ;;  %s121_s28 = int_to_ptr.hbm [resolvable:$true] %s120_s28 }
  0x19   : > { %4254 = dma.hbm_to_vmem [thread:$0]  (!%p4252_p11), %s121_s28, 4096, %s123_s30, [#allocation7], %s4939_s3, %s4939_s3, %s4940_s4  }
  0x1a   : > { %p45_p13 = scmp.ne.s32.totalorder %s4916_s14, %s4912_s13  ;;  %s7917_s5 = smov (%p29_p12, %s28_s5), 0 }
  0x1b   : > { %7688 = sst [smem:[#allocation14_spill]] %s7917_s5  ;;  %s7919_s6 = smov (!%p29_p12, %s31_s6), %s4932_s18 }
  0x1c   : > { %s35_s8 = ssub.s32 %s4928_s17, %s7917_s5  ;;  %p46_p1 = scmp.eq.s32.totalorder %s4936_s19, 0 }
  0x1d   : > { %p33_p2 = scmp.ge.s32.totalorder %s7919_s6, 2  ;;  %p36_p3 = scmp.eq.s32.totalorder %s35_s8, 0 }
  0x1e   : > { %p51_p4 = scmp.ne.s32.totalorder %s4912_s13, %s4908_s12  ;;  %s85_s20 = sadd.s32 1, %s4904_s11 }
  0x1f   : > { %s7921_s6 = smov (%p33_p2, %s7919_s6), 0  ;;  %p5087_p7 = por %p46_p1, %p45_p13 }
  0x20   : > { %7689 = sst [smem:[#allocation15_spill]] %s7921_s6  ;;  %p5078_p5 = por %p5028_p0, %p51_p4 }
  0x21   : > { %s5074_s21 = scalar_select %p36_p3, %s4916_s14, %s38_s7  }
  0x22   : > { %s82_s27 = ssub.s32 %s4932_s18, %s7921_s6  ;;  %s136_s12 = sand.u32 1, %s4916_s14  }
  0x23   : > { %7690 = sst [smem:[#allocation16_spill]] %s5074_s21  ;;  %p83_p10 = scmp.eq.s32.totalorder %s82_s27, 0 }
  0x24   : > { %s3911_s29 = sshll.u32 %s4928_s17, 3  ;;  %p4264_p11 = scmp.lt.s32.totalorder %s4936_s19, 8 }
  0x25   : > { %s5094_s30 = scalar_select %p83_p10, %s4904_s11, %s85_s20  }
  0x26   : > { %s3640_s3 = sshll.u32 %s136_s12, 3  ;;  %s145_s8 = scalar_lea.hbm %s7548_s0, %s3911_s29 }
  0x27   : > { %s147_s1 = sshll.u32 %s145_s8, 4  ;;  %s140_s5 = scalar_lea.vmem [#allocation3], %s3640_s3  ;;  %s148_s1 = int_to_ptr.hbm [resolvable:$true] %s147_s1 }
  0x28   : > { %s149_s6 = sshll.u32 %s140_s5, 4  ;;  %p4256_p12 = pnand %p4264_p11, %p5087_p7  ;;  %s150_s6 = int_to_ptr.vmem [resolvable:$true] %s149_s6 }
  0x29   : > { %s137_s18 = scalar_lea.sflag [#allocation4], %s136_s12  ;;  %158 = sbr.rel (%p5046_p9) target bundleno = 1759 (0x6df), region = 28 }
  0x2a   : > { %4258 = dma.hbm_to_vmem [thread:$0]  (!%p4256_p12), %s148_s1, 128, %s150_s6, %s137_s18  }
  0x2e   : > { %s160_s20 = sand.u32 1, %s4912_s13  }
  0x2f   : > { %s3644_s27 = sshll.u32 %s160_s20, 3  ;;  %s161_s17 = scalar_lea.sflag [#allocation4], %s160_s20 }
  0x30   : > { %s5105_s21 = scalar_lea.vmem [#allocation3], %s3644_s27 }
  0x31   : > { %4883 = dma.done.wait (%p5078_p5), %s161_s17, 128  }
  0x32   : > { %4885 = vsyncadd (%p5078_p5), %s161_s17, 4294967168 }
  0x33   : > { %4887 = dma.done.wait (%p5028_p0), [#allocation7], 4096  }
  0x34   : > { %4889 = vsyncadd (%p5028_p0), [#allocation7], 4294963200  ;;  %s188_s1 = sand.u32 1, %s4900_s10   ;;  %p3647_p9 = scmp.ne.s32.totalorder %s4920_s15, 0 }
  0x35   : > { %s3646_s18 = sshll.u32 %s188_s1, 7 }
  0x36   : > { %s5118_s25 = scalar_lea.vmem [#allocation8], %s3646_s18  ;;  %196 = sbr.rel (%p3647_p9) target bundleno = 108 (0x6c), region = 40 }
  0x3b   : > { %v197_v0 = vlaneseq  ;;  %vm230_vm0 = vcmask 7168   ;;  %v4941_v6 = vmov 0.0  }
  0x3c   : > { %263 = vst [vmem:[%s5118_s25] sm:$0xff] %v4941_v6 }
  0x3d   : > { %v198_v1 = vshrl.u32 %v197_v0, 7  ;;  %264 = vst [vmem:[%s5118_s25 + $0x8] sm:$0xff] %v4941_v6 }
  0x3e   : > { %265 = vst [vmem:[%s5118_s25 + $0x10] sm:$0xff] %v4941_v6 }
  0x3f   : > { %231 = vst.msk [vmem:[#allocation2] sm:$0xff] %vm230_vm0, %v198_v1  ;;  %v199_v2 = vadd.s32 8, %v198_v1  ;;  %v200_v3 = vadd.s32 16, %v198_v1  ;;  %v201_v4 = vadd.s32 24, %v198_v1  ;;  %v202_v5 = vadd.s32 32, %v198_v1 }
  0x40   : > { %v203_v7 = vadd.s32 40, %v198_v1  ;;  %v204_v8 = vadd.s32 48, %v198_v1  ;;  %v205_v9 = vadd.s32 56, %v198_v1  ;;  %v206_v10 = vadd.s32 64, %v198_v1  ;;  %266 = vst [vmem:[%s5118_s25 + $0x18] sm:$0xff] %v4941_v6 }
  0x41   : > { %232 = vst.msk [vmem:[#allocation2 + $0x8] sm:$0xff] %vm230_vm0, %v199_v2  ;;  %v207_v11 = vadd.s32 72, %v198_v1  ;;  %v208_v12 = vadd.s32 80, %v198_v1  ;;  %v209_v13 = vadd.s32 88, %v198_v1  ;;  %v210_v14 = vadd.s32 96, %v198_v1 }
  0x42   : > { %233 = vst.msk [vmem:[#allocation2 + $0x10] sm:$0xff] %vm230_vm0, %v200_v3  ;;  %v211_v15 = vadd.s32 104, %v198_v1  ;;  %v212_v16 = vadd.s32 112, %v198_v1  ;;  %v213_v17 = vadd.s32 120, %v198_v1  ;;  %v214_v18 = vadd.s32 128, %v198_v1 }
  0x43   : > { %234 = vst.msk [vmem:[#allocation2 + $0x18] sm:$0xff] %vm230_vm0, %v201_v4  ;;  %v215_v19 = vadd.s32 136, %v198_v1  ;;  %v216_v20 = vadd.s32 144, %v198_v1  ;;  %v217_v21 = vadd.s32 152, %v198_v1  ;;  %v218_v22 = vadd.s32 160, %v198_v1 }
  0x44   : > { %235 = vst.msk [vmem:[#allocation2 + $0x20] sm:$0xff] %vm230_vm0, %v202_v5  ;;  %v219_v23 = vadd.s32 168, %v198_v1  ;;  %v220_v24 = vadd.s32 176, %v198_v1  ;;  %v221_v25 = vadd.s32 184, %v198_v1  ;;  %v222_v26 = vadd.s32 192, %v198_v1 }
  0x45   : > { %236 = vst.msk [vmem:[#allocation2 + $0x28] sm:$0xff] %vm230_vm0, %v203_v7  ;;  %v223_v27 = vadd.s32 200, %v198_v1  ;;  %v224_v28 = vadd.s32 208, %v198_v1  ;;  %v225_v29 = vadd.s32 216, %v198_v1  ;;  %v226_v30 = vadd.s32 224, %v198_v1 }
  0x46   : > { %237 = vst.msk [vmem:[#allocation2 + $0x30] sm:$0xff] %vm230_vm0, %v204_v8  ;;  %v227_v31 = vadd.s32 232, %v198_v1  ;;  %v228_v32 = vadd.s32 240, %v198_v1  ;;  %v229_v33 = vadd.s32 248, %v198_v1 }
  0x47   : > { %238 = vst.msk [vmem:[#allocation2 + $0x38] sm:$0xff] %vm230_vm0, %v205_v9 }
  0x48   : > { %239 = vst.msk [vmem:[#allocation2 + $0x40] sm:$0xff] %vm230_vm0, %v206_v10 }
  0x49   : > { %240 = vst.msk [vmem:[#allocation2 + $0x48] sm:$0xff] %vm230_vm0, %v207_v11 }
  0x4a   : > { %241 = vst.msk [vmem:[#allocation2 + $0x50] sm:$0xff] %vm230_vm0, %v208_v12 }
  0x4b   : > { %242 = vst.msk [vmem:[#allocation2 + $0x58] sm:$0xff] %vm230_vm0, %v209_v13 }
  0x4c   : > { %243 = vst.msk [vmem:[#allocation2 + $0x60] sm:$0xff] %vm230_vm0, %v210_v14 }
  0x4d   : > { %244 = vst.msk [vmem:[#allocation2 + $0x68] sm:$0xff] %vm230_vm0, %v211_v15 }
  0x4e   : > { %245 = vst.msk [vmem:[#allocation2 + $0x70] sm:$0xff] %vm230_vm0, %v212_v16 }
  0x4f   : > { %246 = vst.msk [vmem:[#allocation2 + $0x78] sm:$0xff] %vm230_vm0, %v213_v17 }
  0x50   : > { %247 = vst.msk [vmem:[#allocation2 + $0x80] sm:$0xff] %vm230_vm0, %v214_v18 }
  0x51   : > { %248 = vst.msk [vmem:[#allocation2 + $0x88] sm:$0xff] %vm230_vm0, %v215_v19 }
  0x52   : > { %249 = vst.msk [vmem:[#allocation2 + $0x90] sm:$0xff] %vm230_vm0, %v216_v20 }
  0x53   : > { %250 = vst.msk [vmem:[#allocation2 + $0x98] sm:$0xff] %vm230_vm0, %v217_v21 }
  0x54   : > { %251 = vst.msk [vmem:[#allocation2 + $0xa0] sm:$0xff] %vm230_vm0, %v218_v22 }
  0x55   : > { %252 = vst.msk [vmem:[#allocation2 + $0xa8] sm:$0xff] %vm230_vm0, %v219_v23 }
  0x56   : > { %253 = vst.msk [vmem:[#allocation2 + $0xb0] sm:$0xff] %vm230_vm0, %v220_v24 }
  0x57   : > { %254 = vst.msk [vmem:[#allocation2 + $0xb8] sm:$0xff] %vm230_vm0, %v221_v25 }
  0x58   : > { %255 = vst.msk [vmem:[#allocation2 + $0xc0] sm:$0xff] %vm230_vm0, %v222_v26 }
  0x59   : > { %256 = vst.msk [vmem:[#allocation2 + $0xc8] sm:$0xff] %vm230_vm0, %v223_v27 }
  0x5a   : > { %257 = vst.msk [vmem:[#allocation2 + $0xd0] sm:$0xff] %vm230_vm0, %v224_v28 }
  0x5b   : > { %258 = vst.msk [vmem:[#allocation2 + $0xd8] sm:$0xff] %vm230_vm0, %v225_v29 }
  0x5c   : > { %259 = vst.msk [vmem:[#allocation2 + $0xe0] sm:$0xff] %vm230_vm0, %v226_v30 }
  0x5d   : > { %260 = vst.msk [vmem:[#allocation2 + $0xe8] sm:$0xff] %vm230_vm0, %v227_v31 }
  0x5e   : > { %261 = vst.msk [vmem:[#allocation2 + $0xf0] sm:$0xff] %vm230_vm0, %v228_v32 }
  0x5f   : > { %262 = vst.msk [vmem:[#allocation2 + $0xf8] sm:$0xff] %vm230_vm0, %v229_v33 }
  0x60   : > { %267 = vst [vmem:[%s5118_s25 + $0x20] sm:$0xff] %v4941_v6 }
  0x61   : > { %268 = vst [vmem:[%s5118_s25 + $0x28] sm:$0xff] %v4941_v6 }
  0x62   : > { %269 = vst [vmem:[%s5118_s25 + $0x30] sm:$0xff] %v4941_v6 }
  0x63   : > { %270 = vst [vmem:[%s5118_s25 + $0x38] sm:$0xff] %v4941_v6 }
  0x64   : > { %271 = vst [vmem:[%s5118_s25 + $0x40] sm:$0xff] %v4941_v6 }
  0x65   : > { %272 = vst [vmem:[%s5118_s25 + $0x48] sm:$0xff] %v4941_v6 }
  0x66   : > { %273 = vst [vmem:[%s5118_s25 + $0x50] sm:$0xff] %v4941_v6 }
  0x67   : > { %274 = vst [vmem:[%s5118_s25 + $0x58] sm:$0xff] %v4941_v6 }
  0x68   : > { %275 = vst [vmem:[%s5118_s25 + $0x60] sm:$0xff] %v4941_v6 }
  0x69   : > { %276 = vst [vmem:[%s5118_s25 + $0x68] sm:$0xff] %v4941_v6 }
  0x6a   : > { %277 = vst [vmem:[%s5118_s25 + $0x70] sm:$0xff] %v4941_v6 }
  0x6b   : > { %278 = vst [vmem:[%s5118_s25 + $0x78] sm:$0xff] %v4941_v6 }
  0x6c PF: > { %v286_v34 = vld [vmem:[#allocation2 + $0x20] sm:$0xff]  ;;  %v284_v35 = vld [vmem:[#allocation2 + $0x10] sm:$0xff]  ;;  %v4942_v37 = vmov 0   ;;  %v287_v38 = vld [vmem:[#allocation2 + $0x28] sm:$0xff]  ;;  %s5186_s15 = sshll.u32 %s4924_s16, 7  ;;  %s4943_s22 = smov 63  }
  0x6d   : > { %v282_v36 = vld [vmem:[#allocation2] sm:$0xff]  ;;  %4369 = vset.pattern.permute.xlu2 %v4942_v37  ;;  %4368 = vset.pattern.permute.xlu1 %v4942_v37  ;;  %v285_v39 = vld [vmem:[#allocation2 + $0x18] sm:$0xff]  ;;  %v283_v40 = vld [vmem:[#allocation2 + $0x8] sm:$0xff]  ;;  %s5189_s17 = scalar_lea.vmem [#allocation2], %s5186_s15  ;;  %s5206_s16 = scalar_lea.vmem [#allocation6], %s5186_s15 }
  0x6e   : > { %4367 = vset.pattern.permute.xlu0 %v4942_v37  ;;  %327 = vperm.xlu2 %4369, %v286_v34   ;;  %v290_v41 = vld [vmem:[#allocation2 + $0x40] sm:$0xff]  ;;  %v289_v42 = vld [vmem:[#allocation2 + $0x38] sm:$0xff]  ;;  %v288_v43 = vld [vmem:[#allocation2 + $0x30] sm:$0xff]  ;;  %s4946_s5 = smov 64   ;;  %s3533_s26 = scalar_lea.hbm %s7550_s2, %s5186_s15 }
  0x6f   : > { %321 = vperm.xlu1 %4368, %v284_v35   ;;  %315 = vperm.xlu0 %4367, %v282_v36   ;;  %v293_v44 = vld [vmem:[#allocation2 + $0x58] sm:$0xff]  ;;  %v292_v45 = vld [vmem:[#allocation2 + $0x50] sm:$0xff]  ;;  %v291_v46 = vld [vmem:[#allocation2 + $0x48] sm:$0xff]  ;;  %s7492_s28 = sshll.u32 %s3533_s26, 4  ;;  %s3534_s12 = sshll.u32 %s5118_s25, 4  ;;  %s3537_s28 = int_to_ptr.hbm [resolvable:$true] %s7492_s28  ;;  %s3535_s12 = int_to_ptr.vmem [resolvable:$true] %s3534_s12 }
  0x70   : > { %v296_v47 = vld [vmem:[#allocation2 + $0x70] sm:$0xff]  ;;  %v295_v48 = vld [vmem:[#allocation2 + $0x68] sm:$0xff]  ;;  %v294_v49 = vld [vmem:[#allocation2 + $0x60] sm:$0xff]  ;;  %s3522_s29 = scalar_lea.sflag [#allocation5], %s188_s1  ;;  %s4824_s3 = sshra.s32 %s3537_s28, 4  ;;  %s4825_s3 = int_to_ptr.hbm [resolvable:$true] %s4824_s3 }
  0x71   : > { %v299_v50 = vld [vmem:[#allocation2 + $0x88] sm:$0xff]  ;;  %v298_v51 = vld [vmem:[#allocation2 + $0x80] sm:$0xff]  ;;  %v297_v52 = vld [vmem:[#allocation2 + $0x78] sm:$0xff]  ;;  %s4826_s4 = scalar_lea.hbm %s4825_s3, 128  ;;  %s4830_s20 = scalar_lea.hbm %s7550_s2, 256 }
  0x72   : > { %v302_v53 = vld [vmem:[#allocation2 + $0xa0] sm:$0xff]  ;;  %v301_v54 = vld [vmem:[#allocation2 + $0x98] sm:$0xff]  ;;  %v300_v55 = vld [vmem:[#allocation2 + $0x90] sm:$0xff]  ;;  %p4827_p0 = scmp.ne.s32.totalorder %s4825_s3, %s4826_s4  ;;  %p4831_p2 = scmp.lt.s32.totalorder %s4825_s3, %s7550_s2 }
  0x73   : > { %v305_v56 = vld [vmem:[#allocation2 + $0xb8] sm:$0xff]  ;;  %v304_v57 = vld [vmem:[#allocation2 + $0xb0] sm:$0xff]  ;;  %v303_v58 = vld [vmem:[#allocation2 + $0xa8] sm:$0xff]  ;;  %p4832_p3 = scmp.lt.s32.totalorder %s4830_s20, %s4826_s4 }
  0x74   : > { %v308_v59 = vld [vmem:[#allocation2 + $0xd0] sm:$0xff]  ;;  %v307_v60 = vld [vmem:[#allocation2 + $0xc8] sm:$0xff]  ;;  %v306_v61 = vld [vmem:[#allocation2 + $0xc0] sm:$0xff]  ;;  %p4828_p13 = pnand %p4827_p0, %p5037_p6 }
  0x75   : > { %v1506_v62 = vld [vmem:[%s5189_s17] sm:$0xff]  ;;  %v309_v0 = vld [vmem:[#allocation2 + $0xd8] sm:$0xff]  ;;  %v1508_v2 = vld [vmem:[%s5189_s17 + $0x10] sm:$0xff]  ;;  %p4833_p4 = por %p4832_p3, %p4831_p2 }
  0x76   : > { %330 = vperm.xlu2 %4369, %v287_v38   ;;  %v310_v63 = vld [vmem:[#allocation2 + $0xe0] sm:$0xff]  ;;  %v1509_v1 = vld [vmem:[%s5189_s17 + $0x18] sm:$0xff]  ;;  %v1507_v3 = vld [vmem:[%s5189_s17 + $0x8] sm:$0xff]  ;;  %p4829_p1 = pneg %p4828_p13 }
  0x77   : > { %324 = vperm.xlu1 %4368, %v285_v39   ;;  %318 = vperm.xlu0 %4367, %v283_v40   ;;  %v1512_v4 = vld [vmem:[%s5189_s17 + $0x30] sm:$0xff]  ;;  %v1511_v5 = vld [vmem:[%s5189_s17 + $0x28] sm:$0xff]  ;;  %v1510_v6 = vld [vmem:[%s5189_s17 + $0x20] sm:$0xff] }
  0x78   : > { %v1515_v8 = vld [vmem:[%s5189_s17 + $0x48] sm:$0xff]  ;;  %v1514_v9 = vld [vmem:[%s5189_s17 + $0x40] sm:$0xff]  ;;  %v1513_v10 = vld [vmem:[%s5189_s17 + $0x38] sm:$0xff]  ;;  %p4834_p5 = pnand %p4833_p4, %p4829_p1 }
  0x79   : > { %v1781_v12 = vld [vmem:[%s5206_s16 + $0x70] sm:$0xff]  ;;  %v1782_v13 = vld [vmem:[%s5206_s16 + $0x78] sm:$0xff]  ;;  %v1779_v18 = vld [vmem:[%s5206_s16 + $0x60] sm:$0xff] }
  0x7a   : > { %v1517_v14 = vld [vmem:[%s5189_s17 + $0x58] sm:$0xff]  ;;  %v4370_v15 = vpack.i.bf16 %v1781_v12, %v1782_v13  ;;  %v1516_v16 = vld [vmem:[%s5189_s17 + $0x50] sm:$0xff]  ;;  %v1780_v19 = vld [vmem:[%s5206_s16 + $0x68] sm:$0xff] }
  0x7b   : > { %v1519_v20 = vld [vmem:[%s5189_s17 + $0x68] sm:$0xff]  ;;  %v4375_v21 = vpack.i.bf16 %v1779_v18, %v1780_v19  ;;  %v1518_v22 = vld [vmem:[%s5189_s17 + $0x60] sm:$0xff]  ;;  %v1777_v26 = vld [vmem:[%s5206_s16 + $0x50] sm:$0xff] }
  0x7c   : > { %v1775_v23 = vld [vmem:[%s5206_s16 + $0x40] sm:$0xff]  ;;  %v1776_v24 = vld [vmem:[%s5206_s16 + $0x48] sm:$0xff]  ;;  %v1778_v27 = vld [vmem:[%s5206_s16 + $0x58] sm:$0xff] }
  0x7d   : > { %v4385_v30 = vpack.i.bf16 %v1775_v23, %v1776_v24  ;;  %v4380_v31 = vpack.i.bf16 %v1777_v26, %v1778_v27  ;;  %v1520_v32 = vld [vmem:[%s5189_s17 + $0x70] sm:$0xff]  ;;  %v1771_v33 = vld [vmem:[%s5206_s16 + $0x20] sm:$0xff]  ;;  %v1772_v34 = vld [vmem:[%s5206_s16 + $0x28] sm:$0xff] }
  0x7e   : > { %339 = vperm.xlu2 %4369, %v290_v41   ;;  %v1773_v36 = vld [vmem:[%s5206_s16 + $0x30] sm:$0xff]  ;;  %v1774_v37 = vld [vmem:[%s5206_s16 + $0x38] sm:$0xff]  ;;  %v4395_v40 = vpack.i.bf16 %v1771_v33, %v1772_v34 }
  0x7f   : > { %336 = vperm.xlu1 %4368, %v289_v42   ;;  %333 = vperm.xlu0 %4367, %v288_v43   ;;  %v4390_v41 = vpack.i.bf16 %v1773_v36, %v1774_v37  ;;  %v1521_v42 = vld [vmem:[%s5189_s17 + $0x78] sm:$0xff]  ;;  %v1767_v43 = vld [vmem:[%s5206_s16] sm:$0xff] }
  0x86   : > { %348 = vperm.xlu2 %4369, %v293_v44  }
  0x87   : > { %345 = vperm.xlu1 %4368, %v292_v45   ;;  %342 = vperm.xlu0 %4367, %v291_v46   ;;  %v1768_v45 = vld [vmem:[%s5206_s16 + $0x8] sm:$0xff]  ;;  %v1769_v46 = vld [vmem:[%s5206_s16 + $0x10] sm:$0xff] }
  0x8e   : > { %357 = vperm.xlu2 %4369, %v296_v47   ;;  %v1770_v47 = vld [vmem:[%s5206_s16 + $0x18] sm:$0xff] }
  0x8f   : > { %354 = vperm.xlu1 %4368, %v295_v48   ;;  %351 = vperm.xlu0 %4367, %v294_v49  }
  0x96   : > { %366 = vperm.xlu2 %4369, %v299_v50   ;;  %v311_v50 = vld [vmem:[#allocation2 + $0xe8] sm:$0xff] }
  0x97   : > { %363 = vperm.xlu1 %4368, %v298_v51   ;;  %360 = vperm.xlu0 %4367, %v297_v52   ;;  %v4405_v51 = vpack.i.bf16 %v1767_v43, %v1768_v45  ;;  %v4400_v52 = vpack.i.bf16 %v1769_v46, %v1770_v47 }
  0x9e   : > { %375 = vperm.xlu2 %4369, %v302_v53  }
  0x9f   : > { %372 = vperm.xlu1 %4368, %v301_v54   ;;  %369 = vperm.xlu0 %4367, %v300_v55  }
  0xa6   : > { %384 = vperm.xlu2 %4369, %v305_v56   ;;  %v313_v56 = vld [vmem:[#allocation2 + $0xf8] sm:$0xff] }
  0xa7   : > { %381 = vperm.xlu1 %4368, %v304_v57   ;;  %378 = vperm.xlu0 %4367, %v303_v58   ;;  %v312_v57 = vld [vmem:[#allocation2 + $0xf0] sm:$0xff] }
  0xae   : > { %393 = vperm.xlu2 %4369, %v308_v59  }
  0xaf   : > { %390 = vperm.xlu1 %4368, %v307_v60   ;;  %387 = vperm.xlu0 %4367, %v306_v61   ;;  %v5271_v61 = vld [vmem:[%s5105_s21] ss:$2 sm:$0xf] }
  0xb6   : > { %1523 = vperm.xlu2 %4369, %v1506_v62  }
  0xb7   : > { %399 = vperm.xlu1 %4368, %v310_v63   ;;  %396 = vperm.xlu0 %4367, %v309_v0   ;;  %v5276_v63 = vperm.slane %v5271_v61, 1 }
  0xbe   : > { %1532 = vperm.xlu2 %4369, %v1509_v1  }
  0xbf   : > { %1529 = vperm.xlu1 %4368, %v1508_v2   ;;  %1526 = vperm.xlu0 %4367, %v1507_v3   ;;  %v7610_v2 = vmov 1.0  }
  0xc6   : > { %1541 = vperm.xlu2 %4369, %v1512_v4  }
  0xc7   : > { %1538 = vperm.xlu1 %4368, %v1511_v5   ;;  %1535 = vperm.xlu0 %4367, %v1510_v6   ;;  %v5303_v6 = vld [vmem:[%s5105_s21 + $0x1] ss:$2 sm:$0xf] }
  0xc8   : > { %v5198_v7 = vpop.permute.xlu2 %327  ;;  %v5346_v19 = vperm.slane %v5303_v6, 0 }
  0xc9   : > { %vm431_vm14 = vcmp.eq.s32.totalorder %v5198_v7, %v5276_v63 }
  0xca   : > { %7704 = vst [vmem:[#allocation28_spill] sm:$0xff] %v5346_v19 }
  0xce   : > { %1550 = vperm.xlu2 %4369, %v1515_v8   ;;  %v5310_v8 = vperm.slane %v5303_v6, 2 }
  0xcf   : > { %1547 = vperm.xlu1 %4368, %v1514_v9   ;;  %1544 = vperm.xlu0 %4367, %v1513_v10   ;;  %v5320_v10 = vperm.slane %v5271_v61, 0 }
  0xd0   : > { %v5203_v11 = vpop.permute.xlu2 %330  ;;  %7702 = vst [vmem:[#allocation26_spill] sm:$0xff] %v5310_v8 }
  0xd1   : > { %7693 = vst [vmem:[#allocation17_spill] sm:$0xff] %v5203_v11  ;;  %vm435_vm13 = vcmp.eq.s32.totalorder %v5203_v11, %v5276_v63 }
  0xd6   : > { %1556 = vperm.xlu2 %4369, %v1517_v14   ;;  %v7612_v14 = vmov 0.0  }
  0xd7   : > { %4371 = vrot.lane.b32.xlu1 %v4370_v15, %s4943_s22  ;;  %1553 = vperm.xlu0 %4367, %v1516_v16  }
  0xd8   : > { %v5213_v17 = vpop.permute.xlu2 %339 }
  0xd9   : > { %vm447_vm8 = vcmp.eq.s32.totalorder %v5213_v17, %v5276_v63 }
  0xde   : > { %1562 = vperm.xlu2 %4369, %v1519_v20  }
  0xdf   : > { %4376 = vrot.lane.b32.xlu1 %v4375_v21, %s4943_s22  ;;  %1559 = vperm.xlu0 %4367, %v1518_v22  }
  0xe0   : > { %v5222_v25 = vpop.permute.xlu2 %348 }
  0xe1   : > { %7694 = vst [vmem:[#allocation18_spill] sm:$0xff] %v5222_v25  ;;  %v5226_v28 = vpop.permute.xlu1 %321  ;;  %v5228_v29 = vpop.permute.xlu0 %315  ;;  %vm459_vm5 = vcmp.eq.s32.totalorder %v5222_v25, %v5276_v63 }
  0xe2   : > { %vm423_vm0 = vcmp.eq.s32.totalorder %v5226_v28, %v5276_v63 }
  0xe6   : > { %4386 = vrot.lane.b32.xlu2 %v4385_v30, %s4943_s22  ;;  %v5384_v30 = vperm.slane %v5271_v61, 3 }
  0xe7   : > { %1565 = vperm.xlu1 %4368, %v1520_v32   ;;  %4381 = vrot.lane.b32.xlu0 %v4380_v31, %s4943_s22 }
  0xe8   : > { %v5235_v35 = vpop.permute.xlu2 %357 }
  0xe9   : > { %7695 = vst [vmem:[#allocation19_spill] sm:$0xff] %v5235_v35  ;;  %v5239_v38 = vpop.permute.xlu1 %324  ;;  %v5241_v39 = vpop.permute.xlu0 %318  ;;  %vm471_vm2 = vcmp.eq.s32.totalorder %v5235_v35, %v5276_v63 }
  0xea   : > { %vm427_vm15 = vcmp.eq.s32.totalorder %v5239_v38, %v5276_v63 }
  0xee   : > { %4396 = vrot.lane.b32.xlu2 %v4395_v40, %s4943_s22 }
  0xef   : > { %4391 = vrot.lane.b32.xlu1 %v4390_v41, %s4943_s22  ;;  %1568 = vperm.xlu0 %4367, %v1521_v42  }
  0xf0   : > { %v5247_v44 = vpop.permute.xlu2 %366 }
  0xf1   : > { %v5252_v48 = vpop.permute.xlu1 %336  ;;  %v5254_v49 = vpop.permute.xlu0 %333 }
  0xf2   : > { %7696 = vst [vmem:[#allocation20_spill] sm:$0xff] %v5252_v48  ;;  %vm443_vm10 = vcmp.eq.s32.totalorder %v5252_v48, %v5276_v63  ;;  %vm439_vm12 = vcmp.eq.s32.totalorder %v5254_v49, %v5276_v63 }
  0xf3   : > { %7697 = vst [vmem:[#allocation21_spill] sm:$0xff] %v5254_v49 }
  0xf6   : > { %402 = vperm.xlu2 %4369, %v311_v50  }
  0xf7   : > { %4406 = vrot.lane.b32.xlu1 %v4405_v51, %s4943_s22  ;;  %4401 = vrot.lane.b32.xlu0 %v4400_v52, %s4943_s22 }
  0xf8   : > { %v5258_v53 = vpop.permute.xlu2 %375 }
  0xf9   : > { %v5260_v54 = vpop.permute.xlu1 %345  ;;  %v5262_v55 = vpop.permute.xlu0 %342 }
  0xfa   : > { %vm455_vm6 = vcmp.eq.s32.totalorder %v5260_v54, %v5276_v63  ;;  %vm451_vm7 = vcmp.eq.s32.totalorder %v5262_v55, %v5276_v63 }
  0xfe   : > { %408 = vperm.xlu2 %4369, %v313_v56  }
  0xff   : > { %405 = vperm.xlu0 %4367, %v312_v57  }
 0x100   : > { %v5264_v58 = vpop.permute.xlu2 %384 }
 0x101   : > { %v5266_v59 = vpop.permute.xlu1 %354  ;;  %v5268_v60 = vpop.permute.xlu0 %351 }
 0x102   : > { %7698 = vst [vmem:[#allocation22_spill] sm:$0xff] %v5266_v59  ;;  %vm467_vm3 = vcmp.eq.s32.totalorder %v5266_v59, %v5276_v63  ;;  %vm463_vm4 = vcmp.eq.s32.totalorder %v5268_v60, %v5276_v63 }
 0x103   : > { %7699 = vst [vmem:[#allocation23_spill] sm:$0xff] %v5268_v60 }
 0x108   : > { %v5273_v62 = vpop.permute.xlu2 %393 }
 0x109   : > { %v5278_v0 = vpop.permute.xlu1 %363  ;;  %v5280_v1 = vpop.permute.xlu0 %360 }
 0x10a   : > { %7700 = vst [vmem:[#allocation24_spill] sm:$0xff] %v5280_v1  ;;  %vm475_vm1 = vcmp.eq.s32.totalorder %v5280_v1, %v5276_v63  ;;  %vm478_vm11 = vcmp.eq.s32.totalorder %v5278_v0, %v5320_v10 }
 0x10b   : > { %4147 = vmatpush.lsf.msk.msk.msrb.mxu0 %vm475_vm1, %v7610_v2  ;;  %v3713_v16 = vsel %vm478_vm11, 1.0, %v7612_v14  ;;  %vm465_vm11 = vcmp.eq.s32.totalorder %v5268_v60, %v5384_v30 }
 0x10d   : > { %4148 = vmatpush.lsf.msk.msk.msrb.mxu0 %vm471_vm2, %v7610_v2  ;;  %vm419_vm2 = vcmp.eq.s32.totalorder %v5241_v39, %v5276_v63 }
 0x10f   : > { %4149 = vmatpush.lsf.msk.msk.msrb.mxu0 %vm467_vm3, %v7610_v2  ;;  %vm414_vm3 = vcmp.eq.s32.totalorder %v5228_v29, %v5320_v10 }
 0x110   : > { %v5291_v3 = vpop.permute.xlu2 %1523  ;;  %v3649_v31 = vsel %vm414_vm3, 1.0, %v7612_v14  ;;  %vm453_vm3 = vcmp.eq.s32.totalorder %v5262_v55, %v5384_v30 }
 0x111   : > { %7701 = vst [vmem:[#allocation25_spill] sm:$0xff] %v5291_v3  ;;  %v5295_v4 = vpop.permute.xlu1 %372  ;;  %v5297_v5 = vpop.permute.xlu0 %369  ;;  %4150 = vmatpush.lsf.msk.msk.msrb.mxu0 %vm463_vm4, %v7610_v2  ;;  %vm7565_vm9 = vcmp.eq.s32.totalorder %v5291_v3, %v5310_v8  ;;  %vm1574_vm1 = vcmp.eq.s32.totalorder %v5291_v3, %v5346_v19  ;;  %vm415_vm4 = vcmp.eq.s32.totalorder %v5228_v29, %v5276_v63 }
 0x112   : > { %v3780_v15 = vsel %vm7565_vm9, 1.0, %v7612_v14  ;;  %v3778_v23 = vsel %vm1574_vm1, 1.0, %v7612_v14  ;;  %vm446_vm9 = vcmp.eq.s32.totalorder %v5213_v17, %v5320_v10 }
 0x113   : > { %4151 = vmatpush.lsf.msk.msk.msrb.mxu0 %vm459_vm5, %v7610_v2  ;;  %v4522_v18 = vpack.i.bf16 %v3780_v15, %v3713_v16  ;;  %v4410_v32 = vpack.i.bf16 %v3649_v31, %v3778_v23  ;;  %vm477_vm5 = vcmp.eq.s32.totalorder %v5280_v1, %v5384_v30 }
 0x115   : > { %4152 = vmatpush.lsf.msk.msk.msrb.mxu0 %vm455_vm6, %v7610_v2  ;;  %vm473_vm6 = vcmp.eq.s32.totalorder %v5235_v35, %v5384_v30 }
 0x117   : > { %4153 = vmatpush.lsf.msk.msk.msrb.mxu0 %vm451_vm7, %v7610_v2  ;;  %vm469_vm7 = vcmp.eq.s32.totalorder %v5266_v59, %v5384_v30 }
 0x118   : > { %v5315_v9 = vpop.permute.xlu2 %1532 }
 0x119   : > { %7703 = vst [vmem:[#allocation27_spill] sm:$0xff] %v5315_v9  ;;  %v5322_v12 = vpop.permute.xlu1 %381  ;;  %v5324_v13 = vpop.permute.xlu0 %378  ;;  %4154 = vmatpush.lsf.msk.msk.msrb.mxu0 %vm447_vm8, %v7610_v2  ;;  %vm418_vm8 = vcmp.eq.s32.totalorder %v5241_v39, %v5320_v10 }
 0x11a   : > { %v3653_v41 = vsel %vm418_vm8, 1.0, %v7612_v14  ;;  %vm441_vm8 = vcmp.eq.s32.totalorder %v5254_v49, %v5384_v30 }
 0x11b   : > { %4155 = vmatpush.lsf.msk.msk.msrb.mxu0 %vm443_vm10, %v7610_v2  ;;  %vm482_vm10 = vcmp.eq.s32.totalorder %v5247_v44, %v5320_v10 }
 0x11c   : > { %v3717_v37 = vsel %vm482_vm10, 1.0, %v7612_v14  ;;  %vm7562_vm10 = vcmp.eq.s32.totalorder %v5315_v9, %v5310_v8 }
 0x11d   : > { %4156 = vmatpush.lsf.msk.msk.msrb.mxu0 %vm439_vm12, %v7610_v2  ;;  %v3792_v31 = vsel %vm7562_vm10, 1.0, %v7612_v14 }
 0x11f   : > { %4157 = vmatpush.lsf.msk.msk.msrb.mxu0 %vm435_vm13, %v7610_v2 }
 0x120   : > { %v5348_v20 = vpop.permute.xlu2 %1541 }
 0x121   : > { %7705 = vst [vmem:[#allocation29_spill] sm:$0xff] %v5348_v20  ;;  %v5352_v21 = vpop.permute.xlu1 %390  ;;  %v5354_v22 = vpop.permute.xlu0 %387  ;;  %4158 = vmatpush.lsf.msk.msk.msrb.mxu0 %vm431_vm14, %v7610_v2  ;;  %4523 = vxpose.xlu0.b32.start [1/16] %v4522_v18, 128  ;;  %vm461_vm14 = vcmp.eq.s32.totalorder %v5222_v25, %v5384_v30 }
 0x123   : > { %4159 = vmatpush.lsf.msk.msk.msrb.mxu0 %vm427_vm15, %v7610_v2  ;;  %vm457_vm15 = vcmp.eq.s32.totalorder %v5260_v54, %v5384_v30 }
 0x125   : > { %4160 = vmatpush.lsf.msk.msk.msrb.mxu0 %vm423_vm0, %v7610_v2 }
 0x127   : > { %4161 = vmatpush.lsf.msk.msk.msrb.mxu0 %vm419_vm2, %v7610_v2 }
 0x128   : > { %v5374_v24 = vpop.permute.xlu2 %1550 }
 0x129   : > { %7706 = vst [vmem:[#allocation30_spill] sm:$0xff] %v5374_v24  ;;  %v5378_v26 = vpop.permute.xlu1 %399  ;;  %v5380_v27 = vpop.permute.xlu0 %396  ;;  %4162 = vmatpush.lsf.msk.msk.msrb.mxu0 %vm415_vm4, %v7610_v2  ;;  %vm486_vm4 = vcmp.eq.s32.totalorder %v5297_v5, %v5320_v10 }
 0x12a   : > { %7707 = vst [vmem:[#allocation31_spill] sm:$0xff] %v5378_v26  ;;  %3941 = vllmr.16.mxu0  ;;  %v3721_v56 = vsel %vm486_vm4, 1.0, %v7612_v14  ;;  %vm433_vm4 = vcmp.eq.s32.totalorder %v5198_v7, %v5384_v30 }
 0x12b   : > { %7708 = vst [vmem:[#allocation32_spill] sm:$0xff] %v5380_v27 }
 0x12c   : > { %4163 = vmatpush.lsf.msk.msk.msrb.mxu0 %vm477_vm5, %v7610_v2  ;;  %4411 = vxpose.xlu1.b32.start [1/16] %v4410_v32, 128  ;;  %vm422_vm5 = vcmp.eq.s32.totalorder %v5226_v28, %v5320_v10 }
 0x12d   : > { %v3657_v61 = vsel %vm422_vm5, 1.0, %v7612_v14  ;;  %vm429_vm5 = vcmp.eq.s32.totalorder %v5239_v38, %v5384_v30 }
 0x12e   : > { %4164 = vmatpush.lsf.msk.msk.msrb.mxu0 %vm473_vm6, %v7610_v2  ;;  %vm449_vm6 = vcmp.eq.s32.totalorder %v5213_v17, %v5384_v30 }
 0x130   : > { %4165 = vmatpush.lsf.msk.msk.msrb.mxu0 %vm469_vm7, %v7610_v2  ;;  %v5400_v33 = vpop.permute.xlu2 %1556  ;;  %vm445_vm7 = vcmp.eq.s32.totalorder %v5252_v48, %v5384_v30 }
 0x131   : > { %7709 = vst [vmem:[#allocation33_spill] sm:$0xff] %v5400_v33  ;;  %v5402_v34 = vpop.permute.xlu1 %1529  ;;  %v5404_v36 = vpop.permute.xlu0 %1526 }
 0x132   : > { %7710 = vst [vmem:[#allocation34_spill] sm:$0xff] %v5402_v34  ;;  %vm1578_vm12 = vcmp.eq.s32.totalorder %v5404_v36, %v5346_v19  ;;  %vm7564_vm13 = vcmp.eq.s32.totalorder %v5404_v36, %v5310_v8  ;;  %4166 = vmatpush.lsf.msk.msk.msrb.mxu0 %vm465_vm11, %v7610_v2  ;;  %vm7563_vm0 = vcmp.eq.s32.totalorder %v5402_v34, %v5310_v8 }
 0x133   : > { %7711 = vst [vmem:[#allocation35_spill] sm:$0xff] %v5404_v36  ;;  %v3784_v40 = vsel %vm7564_vm13, 1.0, %v7612_v14  ;;  %v3782_v42 = vsel %vm1578_vm12, 1.0, %v7612_v14  ;;  %vm1582_vm2 = vcmp.eq.s32.totalorder %v5402_v34, %v5346_v19  ;;  %v3788_v51 = vsel %vm7563_vm0, 1.0, %v7612_v14 }
 0x134   : > { %4167 = vmatpush.lsf.msk.msk.msrb.mxu0 %vm461_vm14, %v7610_v2  ;;  %v4524_v43 = vpack.i.bf16 %v3784_v40, %v3717_v37  ;;  %v4412_v45 = vpack.i.bf16 %v3653_v41, %v3782_v42  ;;  %v3786_v52 = vsel %vm1582_vm2, 1.0, %v7612_v14  ;;  %v4526_v57 = vpack.i.bf16 %v3788_v51, %v3721_v56 }
 0x135   : > { %v4414_v15 = vpack.i.bf16 %v3657_v61, %v3786_v52  ;;  %vm1586_vm11 = vcmp.eq.s32.totalorder %v5315_v9, %v5346_v19  ;;  %vm437_vm14 = vcmp.eq.s32.totalorder %v5203_v11, %v5384_v30  ;;  %vm510_vm0 = vcmp.eq.s32.totalorder %v5354_v22, %v5320_v10 }
 0x136   : > { %4168 = vmatpush.lsf.msk.msk.msrb.mxu0 %vm457_vm15, %v7610_v2  ;;  %4525 = vxpose.xlu0.b32.cont [2/16] %v4524_v43, 128  ;;  %vm490_vm15 = vcmp.eq.s32.totalorder %v5295_v4, %v5320_v10  ;;  %v3790_v32 = vsel %vm1586_vm11, 1.0, %v7612_v14 }
 0x137   : > { %4413 = vxpose.xlu1.b32.cont [2/16] %v4412_v45, 128  ;;  %v3725_v37 = vsel %vm490_vm15, 1.0, %v7612_v14  ;;  %vm494_vm15 = vcmp.eq.s32.totalorder %v5258_v53, %v5320_v10 }
 0x138   : > { %4169 = vmatpush.lsf.msk.msk.msrb.mxu0 %vm453_vm3, %v7610_v2  ;;  %v5438_v46 = vpop.permute.xlu2 %1562  ;;  %vm426_vm3 = vcmp.eq.s32.totalorder %v5239_v38, %v5320_v10  ;;  %v4528_v40 = vpack.i.bf16 %v3792_v31, %v3725_v37 }
 0x139   : > { %7712 = vst [vmem:[#allocation36_spill] sm:$0xff] %v5438_v46  ;;  %v5442_v47 = vpop.permute.xlu1 %1538  ;;  %v5444_v50 = vpop.permute.xlu0 %1535  ;;  %v3661_v41 = vsel %vm426_vm3, 1.0, %v7612_v14  ;;  %vm430_vm3 = vcmp.eq.s32.totalorder %v5198_v7, %v5320_v10 }
 0x13a   : > { %7713 = vst [vmem:[#allocation37_spill] sm:$0xff] %v5442_v47  ;;  %4170 = vmatpush.lsf.msk.msk.msrb.mxu0 %vm449_vm6, %v7610_v2  ;;  %vm425_vm6 = vcmp.eq.s32.totalorder %v5226_v28, %v5384_v30  ;;  %v4416_v42 = vpack.i.bf16 %v3661_v41, %v3790_v32  ;;  %v3665_v31 = vsel %vm430_vm3, 1.0, %v7612_v14  ;;  %vm7558_vm3 = vcmp.eq.s32.totalorder %v5348_v20, %v5310_v8 }
 0x13b   : > { %7714 = vst [vmem:[#allocation38_spill] sm:$0xff] %v5444_v50 }
 0x13c   : > { %4171 = vmatpush.lsf.msk.msk.msrb.mxu0 %vm445_vm7, %v7610_v2  ;;  %vm7559_vm7 = vcmp.eq.s32.totalorder %v5444_v50, %v5310_v8 }
 0x13d   : > { %v3796_v52 = vsel %vm7559_vm7, 1.0, %v7612_v14 }
 0x13e   : > { %4172 = vmatpush.lsf.msk.msk.msrb.mxu0 %vm441_vm8, %v7610_v2  ;;  %4527 = vxpose.xlu0.b32.cont [3/16] %v4526_v57, 128  ;;  %vm1590_vm8 = vcmp.eq.s32.totalorder %v5444_v50, %v5346_v19 }
 0x13f   : > { %4415 = vxpose.xlu1.b32.cont [3/16] %v4414_v15, 128  ;;  %v3794_v61 = vsel %vm1590_vm8, 1.0, %v7612_v14  ;;  %v3729_v15 = vsel %vm494_vm15, 1.0, %v7612_v14  ;;  %vm434_vm15 = vcmp.eq.s32.totalorder %v5203_v11, %v5320_v10 }
 0x140   : > { %4173 = vmatpush.lsf.msk.msk.msrb.mxu0 %vm437_vm14, %v7610_v2  ;;  %v5474_v16 = vpop.permute.xlu2 %4386  ;;  %vm421_vm14 = vcmp.eq.s32.totalorder %v5241_v39, %v5384_v30  ;;  %v4530_v32 = vpack.i.bf16 %v3796_v52, %v3729_v15  ;;  %v4418_v37 = vpack.i.bf16 %v3665_v31, %v3794_v61  ;;  %v3669_v31 = vsel %vm434_vm15, 1.0, %v7612_v14 }
 0x141   : > { %v5478_v18 = vpop.permute.xlu1 %1547  ;;  %v5480_v23 = vpop.permute.xlu0 %1544 }
 0x142   : > { %7715 = vst [vmem:[#allocation39_spill] sm:$0xff] %v5478_v18  ;;  %4174 = vmatpush.lsf.msk.msk.msrb.mxu0 %vm433_vm4, %v7610_v2  ;;  %vm417_vm4 = vcmp.eq.s32.totalorder %v5228_v29, %v5384_v30  ;;  %vm7567_vm10 = vcmp.eq.s32.totalorder %v5478_v18, %v5310_v8 }
 0x143   : > { %7716 = vst [vmem:[#allocation40_spill] sm:$0xff] %v5480_v23 }
 0x144   : > { %4175 = vmatpush.lsf.msk.msk.msrb.mxu0 %vm429_vm5, %v7610_v2  ;;  %vm7555_vm5 = vcmp.eq.s32.totalorder %v5442_v47, %v5310_v8 }
 0x146   : > { %4176 = vmatpush.lsf.msk.msk.msrb.mxu0 %vm425_vm6, %v7610_v2  ;;  %4529 = vxpose.xlu0.b32.cont [4/16] %v4528_v40, 128  ;;  %vm1594_vm6 = vcmp.eq.s32.totalorder %v5442_v47, %v5346_v19 }
 0x147   : > { %4417 = vxpose.xlu1.b32.cont [4/16] %v4416_v42, 128 }
 0x148   : > { %4177 = vmatpush.lsf.msk.msk.msrb.mxu0 %vm421_vm14, %v7610_v2  ;;  %v5510_v43 = vpop.permute.xlu2 %4396  ;;  %vm498_vm14 = vcmp.eq.s32.totalorder %v5324_v13, %v5320_v10 }
 0x149   : > { %v4372_v45 = vpop.permute.xlu1 %4371  ;;  %v5514_v51 = vpop.permute.xlu0 %1553  ;;  %v3733_v61 = vsel %vm498_vm14, 1.0, %v7612_v14  ;;  %vm438_vm14 = vcmp.eq.s32.totalorder %v5254_v49, %v5320_v10  ;;  %v4388_v49 = vunpack.i.l.bf16 %v5474_v16 }
 0x14a   : > { %7717 = vst [vmem:[#allocation41_spill] sm:$0xff] %v5514_v51  ;;  %4178 = vmatpush.lsf.msk.msk.msrb.mxu0 %vm417_vm4, %v7610_v2  ;;  %v4373_v56 = vunpack.i.l.bf16 %v4372_v45  ;;  %v4374_v57 = vunpack.i.h.bf16 %v4372_v45  ;;  %v3800_v45 = vsel %vm7555_vm5, 1.0, %v7612_v14  ;;  %vm1598_vm4 = vcmp.eq.s32.totalorder %v5348_v20, %v5346_v19 }
 0x14b   : > { %v4532_v15 = vpack.i.bf16 %v3800_v45, %v3733_v61  ;;  %vm502_vm5 = vcmp.eq.s32.totalorder %v5322_v12, %v5320_v10  ;;  %v3802_v61 = vsel %vm1598_vm4, 1.0, %v7612_v14 }
 0x14c   : > { %1975 = vmatpush.msra.mxu2 %v4373_v56 }
 0x14e   : > { %1976 = vmatpush.msra.mxu2 %v4374_v57  ;;  %4531 = vxpose.xlu0.b32.cont [5/16] %v4530_v32, 128  ;;  %v3798_v57 = vsel %vm1594_vm6, 1.0, %v7612_v14 }
 0x14f   : > { %4419 = vxpose.xlu1.b32.cont [5/16] %v4418_v37, 128  ;;  %v4420_v32 = vpack.i.bf16 %v3669_v31, %v3798_v57 }
 0x150   : > { %v5535_v40 = vpop.permute.xlu2 %402 }
 0x151   : > { %7718 = vst [vmem:[#allocation42_spill] sm:$0xff] %v5535_v40  ;;  %v4377_v41 = vpop.permute.xlu1 %4376  ;;  %v5539_v42 = vpop.permute.xlu0 %1559 }
 0x152   : > { %7719 = vst [vmem:[#allocation43_spill] sm:$0xff] %v5539_v42  ;;  %v4378_v52 = vunpack.i.l.bf16 %v4377_v41  ;;  %v4379_v56 = vunpack.i.h.bf16 %v4377_v41 }
 0x154   : > { %1977 = vmatpush.msra.mxu2 %v4378_v52  ;;  %v3804_v52 = vsel %vm7558_vm3, 1.0, %v7612_v14  ;;  %vm7560_vm3 = vcmp.eq.s32.totalorder %v5480_v23, %v5310_v8 }
 0x156   : > { %1978 = vmatpush.msra.mxu2 %v4379_v56  ;;  %4533 = vxpose.xlu0.b32.cont [6/16] %v4532_v15, 128  ;;  %v3737_v15 = vsel %vm502_vm5, 1.0, %v7612_v14  ;;  %vm506_vm5 = vcmp.eq.s32.totalorder %v5264_v58, %v5320_v10 }
 0x157   : > { %4421 = vxpose.xlu1.b32.cont [6/16] %v4420_v32, 128  ;;  %v4534_v31 = vpack.i.bf16 %v3804_v52, %v3737_v15  ;;  %v3673_v32 = vsel %vm438_vm14, 1.0, %v7612_v14  ;;  %v5585_v52 = vperm.slane %v5303_v6, 1  ;;  %vm442_vm14 = vcmp.eq.s32.totalorder %v5252_v48, %v5320_v10 }
 0x158   : > { %v5557_v37 = vpop.permute.xlu2 %408  ;;  %v4422_v11 = vpack.i.bf16 %v3673_v32, %v3802_v61  ;;  %v3741_v15 = vsel %vm506_vm5, 1.0, %v7612_v14  ;;  %v3677_v32 = vsel %vm442_vm14, 1.0, %v7612_v14  ;;  %vm1606_vm14 = vcmp.eq.s32.totalorder %v5478_v18, %v5346_v19 }
 0x159   : > { %7720 = vst [vmem:[#allocation44_spill] sm:$0xff] %v5557_v37  ;;  %v5561_v41 = vpop.permute.xlu1 %1565  ;;  %v4382_v45 = vpop.permute.xlu0 %4381  ;;  %vm539_vm15 = vcmp.eq.s32.totalorder %v5557_v37, %v5276_v63  ;;  %vm7569_vm5 = vcmp.eq.s32.totalorder %v5438_v46, %v5585_v52  ;;  %vm7570_vm13 = vcmp.eq.s32.totalorder %v5539_v42, %v5585_v52 }
 0x15a   : > { %7721 = vst [vmem:[#allocation45_spill] sm:$0xff] %v5561_v41  ;;  %4179 = vmatpush.lsf.msk.msk.msrb.mxu1 %vm539_vm15, %v7610_v2  ;;  %v4383_v56 = vunpack.i.l.bf16 %v4382_v45  ;;  %v4384_v57 = vunpack.i.h.bf16 %v4382_v45  ;;  %v4389_v45 = vunpack.i.h.bf16 %v5474_v16  ;;  %vm1602_vm15 = vcmp.eq.s32.totalorder %v5480_v23, %v5346_v19 }
 0x15b   : > { %7722 = vst [vmem:[#allocation46_spill] sm:$0xff] %v5585_v52  ;;  %v3808_v16 = vsel %vm7560_vm3, 1.0, %v7612_v14  ;;  %vm7568_vm3 = vcmp.eq.s32.totalorder %v5561_v41, %v5585_v52 }
 0x15c   : > { %1979 = vmatpush.msra.mxu2 %v4383_v56 }
 0x15e   : > { %1980 = vmatpush.msra.mxu2 %v4384_v57  ;;  %4535 = vxpose.xlu0.b32.cont [7/16] %v4534_v31, 128  ;;  %v4536_v31 = vpack.i.bf16 %v3808_v16, %v3741_v15  ;;  %v3745_v15 = vsel %vm510_vm0, 1.0, %v7612_v14  ;;  %vm7573_vm0 = vcmp.eq.s32.totalorder %v5374_v24, %v5585_v52 }
 0x15f   : > { %4423 = vxpose.xlu1.b32.cont [7/16] %v4422_v11, 128 }
 0x160   : > { %1981 = vmatpush.msra.mxu2 %v4388_v49  ;;  %v3806_v49 = vsel %vm1602_vm15, 1.0, %v7612_v14 }
 0x161   : > { %v4392_v56 = vpop.permute.xlu1 %4391  ;;  %v5589_v61 = vpop.permute.xlu0 %1568  ;;  %v4424_v48 = vpack.i.bf16 %v3677_v32, %v3806_v49  ;;  %v3810_v49 = vsel %vm1606_vm14, 1.0, %v7612_v14  ;;  %v3681_v32 = vsel %vm446_vm9, 1.0, %v7612_v14  ;;  %vm514_vm9 = vcmp.eq.s32.totalorder %v5352_v21, %v5320_v10 }
 0x162   : > { %7723 = vst [vmem:[#allocation47_spill] sm:$0xff] %v5589_v61  ;;  %1982 = vmatpush.msra.mxu2 %v4389_v45  ;;  %vm7566_vm7 = vcmp.eq.s32.totalorder %v5589_v61, %v5585_v52  ;;  %v4393_v11 = vunpack.i.l.bf16 %v4392_v56  ;;  %v4394_v57 = vunpack.i.h.bf16 %v4392_v56  ;;  %v4398_v45 = vunpack.i.l.bf16 %v5510_v43 }
 0x163   : > { %v4399_v56 = vunpack.i.h.bf16 %v5510_v43 }
 0x164   : > { %4211 = vmatpush.lsf.msk.msk.msrb.mxu2 %vm7566_vm7, %v7610_v2  ;;  %vm7571_vm7 = vcmp.eq.s32.totalorder %v5400_v33, %v5585_v52 }
 0x166   : > { %1983 = vmatpush.msra.mxu2 %v4393_v11  ;;  %4537 = vxpose.xlu0.b32.cont [8/16] %v4536_v31, 128 }
 0x167   : > { %4425 = vxpose.xlu1.b32.cont [8/16] %v4424_v48, 128  ;;  %v3812_v48 = vsel %vm7567_vm10, 1.0, %v7612_v14  ;;  %vm7572_vm10 = vcmp.eq.s32.totalorder %v5514_v51, %v5585_v52 }
 0x168   : > { %4212 = vmatpush.lsf.msk.msk.msrb.mxu2 %vm7568_vm3, %v7610_v2  ;;  %v4538_v31 = vpack.i.bf16 %v3812_v48, %v3745_v15  ;;  %vm7574_vm3 = vcmp.eq.s32.totalorder %v5374_v24, %v5310_v8 }
 0x169   : > { %v4402_v43 = vpop.permute.xlu0 %4401 }
 0x16a   : > { %1984 = vmatpush.msra.mxu2 %v4394_v57  ;;  %v4403_v16 = vunpack.i.l.bf16 %v4402_v43  ;;  %v4404_v11 = vunpack.i.h.bf16 %v4402_v43  ;;  %v4407_v57 = vpop.permute.xlu1 %4406 }
 0x16b   : > { %v4409_v43 = vunpack.i.h.bf16 %v4407_v57 }
 0x16c   : > { %4213 = vmatpush.lsf.msk.msk.msrb.mxu2 %vm7569_vm5, %v7610_v2  ;;  %vm7578_vm5 = vcmp.eq.s32.totalorder %v5374_v24, %v5346_v19 }
 0x16e   : > { %1985 = vmatpush.msra.mxu2 %v4398_v45  ;;  %v4426_v45 = vpack.i.bf16 %v3681_v32, %v3810_v49  ;;  %4539 = vxpose.xlu0.b32.cont [9/16] %v4538_v31, 128  ;;  %v3749_v49 = vsel %vm514_vm9, 1.0, %v7612_v14  ;;  %vm527_vm9 = vcmp.eq.s32.totalorder %v5378_v26, %v5276_v63 }
 0x170   : > { %4214 = vmatpush.lsf.msk.msk.msrb.mxu2 %vm7570_vm13, %v7610_v2  ;;  %4427 = vxpose.xlu1.b32.cont [9/16] %v4426_v45, 128  ;;  %vm7575_vm13 = vcmp.eq.s32.totalorder %v5478_v18, %v5585_v52 }
 0x171   : > { %v5673_v48 = vpop.permute.xlu0 %405 }
 0x172   : > { %1986 = vmatpush.msra.mxu2 %v4399_v56  ;;  %v4408_v56 = vunpack.i.l.bf16 %v4407_v57  ;;  %7724 = vst [vmem:[#allocation48_spill] sm:$0xff] %v5673_v48 }
 0x174   : > { %4215 = vmatpush.lsf.msk.msk.msrb.mxu2 %vm7571_vm7, %v7610_v2  ;;  %vm450_vm7 = vcmp.eq.s32.totalorder %v5262_v55, %v5320_v10 }
 0x175   : > { %v3685_v15 = vsel %vm450_vm7, 1.0, %v7612_v14  ;;  %vm7579_vm7 = vcmp.eq.s32.totalorder %v5442_v47, %v5585_v52 }
 0x176   : > { %1987 = vmatpush.msra.mxu2 %v4403_v16  ;;  %v3816_v16 = vsel %vm7574_vm3, 1.0, %v7612_v14  ;;  %vm531_vm3 = vcmp.eq.s32.totalorder %v5535_v40, %v5276_v63 }
 0x177   : > { %v4540_v57 = vpack.i.bf16 %v3816_v16, %v3749_v49 }
 0x178   : > { %4216 = vmatpush.lsf.msk.msk.msrb.mxu2 %vm7572_vm10, %v7610_v2  ;;  %vm535_vm10 = vcmp.eq.s32.totalorder %v5673_v48, %v5276_v63 }
 0x179   : > { %4180 = vmatpush.lsf.msk.msk.msrb.mxu1 %vm535_vm10, %v7610_v2  ;;  %vm7580_vm10 = vcmp.eq.s32.totalorder %v5514_v51, %v5310_v8  ;;  %4541 = vxpose.xlu0.b32.cont [10/16] %v4540_v57, 128  ;;  %v5794_v57 = vperm.slane %v5303_v6, 3 }
 0x17a   : > { %1988 = vmatpush.msra.mxu2 %v4404_v11  ;;  %v3814_v11 = vsel %vm7578_vm5, 1.0, %v7612_v14  ;;  %vm454_vm5 = vcmp.eq.s32.totalorder %v5260_v54, %v5320_v10  ;;  %v3820_v32 = vsel %vm7580_vm10, 1.0, %v7612_v14  ;;  %vm515_vm10 = vcmp.eq.s32.totalorder %v5352_v21, %v5276_v63 }
 0x17b   : > { %4181 = vmatpush.lsf.msk.msk.msrb.mxu1 %vm531_vm3, %v7610_v2  ;;  %v4428_v31 = vpack.i.bf16 %v3685_v15, %v3814_v11  ;;  %vm518_vm3 = vcmp.eq.s32.totalorder %v5273_v62, %v5320_v10  ;;  %v3689_v16 = vsel %vm454_vm5, 1.0, %v7612_v14  ;;  %vm7589_vm5 = vcmp.eq.s32.totalorder %v5400_v33, %v5346_v19  ;;  %7725 = vst [vmem:[#allocation49_spill] sm:$0xff] %v5794_v57 }
 0x17c   : > { %4217 = vmatpush.lsf.msk.msk.msrb.mxu2 %vm7573_vm0, %v7610_v2  ;;  %vm7576_vm0 = vcmp.eq.s32.totalorder %v5480_v23, %v5585_v52  ;;  %v3822_v15 = vsel %vm7589_vm5, 1.0, %v7612_v14  ;;  %vm462_vm5 = vcmp.eq.s32.totalorder %v5268_v60, %v5320_v10 }
 0x17d   : > { %4429 = vxpose.xlu1.b32.cont [10/16] %v4428_v31, 128  ;;  %4182 = vmatpush.lsf.msk.msk.msrb.mxu1 %vm527_vm9, %v7610_v2  ;;  %vm7581_vm9 = vcmp.eq.s32.totalorder %v5444_v50, %v5585_v52 }
 0x17e   : > { %1989 = vmatpush.msra.mxu2 %v4408_v56  ;;  %v3753_v56 = vsel %vm518_vm3, 1.0, %v7612_v14  ;;  %vm7586_vm3 = vcmp.eq.s32.totalorder %v5400_v33, %v5310_v8 }
 0x17f   : > { %v3824_v49 = vsel %vm7586_vm3, 1.0, %v7612_v14  ;;  %vm499_vm3 = vcmp.eq.s32.totalorder %v5324_v13, %v5276_v63 }
 0x180   : > { %4218 = vmatpush.lsf.msk.msk.msrb.mxu2 %vm7575_vm13, %v7610_v2  ;;  %vm7577_vm13 = vcmp.eq.s32.totalorder %v5348_v20, %v5585_v52 }
 0x182   : > { %1990 = vmatpush.msra.mxu2 %v4409_v43  ;;  %v4542_v43 = vpack.i.bf16 %v3820_v32, %v3753_v56 }
 0x184   : > { %4219 = vmatpush.lsf.msk.msk.msrb.mxu2 %vm7576_vm0, %v7610_v2  ;;  %vm7584_vm0 = vcmp.eq.s32.totalorder %v5514_v51, %v5346_v19  ;;  %4543 = vxpose.xlu0.b32.cont [11/16] %v4542_v43, 128 }
 0x185   : > { %v3818_v45 = vsel %vm7584_vm0, 1.0, %v7612_v14  ;;  %vm458_vm0 = vcmp.eq.s32.totalorder %v5222_v25, %v5320_v10  ;;  %v4749_v25 = vld [vmem:[%s5105_s21] ss:$2 sm:$0xf] }
 0x186   : > { %4220 = vmatpush.lsf.msk.msk.msrb.mxu2 %vm7577_vm13, %v7610_v2  ;;  %vm523_vm13 = vcmp.eq.s32.totalorder %v5380_v27, %v5276_v63  ;;  %v4430_v11 = vpack.i.bf16 %v3689_v16, %v3818_v45  ;;  %v3693_v6 = vsel %vm458_vm0, 1.0, %v7612_v14  ;;  %vm495_vm0 = vcmp.eq.s32.totalorder %v5258_v53, %v5276_v63 }
 0x187   : > { %4183 = vmatpush.lsf.msk.msk.msrb.mxu1 %vm523_vm13, %v7610_v2  ;;  %vm7582_vm13 = vcmp.eq.s32.totalorder %v5315_v9, %v5585_v52  ;;  %v4432_v45 = vpack.i.bf16 %v3693_v6, %v3822_v15  ;;  %v812_v6 = vld [vmem:[#allocation6 + $0x70] sm:$0xff] }
 0x188   : > { %4221 = vmatpush.lsf.msk.msk.msrb.mxu2 %vm7579_vm7, %v7610_v2  ;;  %vm519_vm7 = vcmp.eq.s32.totalorder %v5273_v62, %v5276_v63  ;;  %4431 = vxpose.xlu1.b32.cont [11/16] %v4430_v11, 128 }
 0x189   : > { %4184 = vmatpush.lsf.msk.msk.msrb.mxu1 %vm519_vm7, %v7610_v2  ;;  %vm7583_vm7 = vcmp.eq.s32.totalorder %v5402_v34, %v5585_v52 }
 0x18a   : > { %4222 = vmatpush.lsf.msk.msk.msrb.mxu2 %vm7581_vm9, %v7610_v2  ;;  %vm511_vm9 = vcmp.eq.s32.totalorder %v5354_v22, %v5276_v63 }
 0x18b   : > { %4185 = vmatpush.lsf.msk.msk.msrb.mxu1 %vm515_vm10, %v7610_v2  ;;  %vm7585_vm10 = vcmp.eq.s32.totalorder %v5404_v36, %v5585_v52 }
 0x18c   : > { %4223 = vmatpush.lsf.msk.msk.msrb.mxu2 %vm7582_vm13, %v7610_v2  ;;  %vm522_vm13 = vcmp.eq.s32.totalorder %v5380_v27, %v5320_v10 }
 0x18d   : > { %4186 = vmatpush.lsf.msk.msk.msrb.mxu1 %vm511_vm9, %v7610_v2  ;;  %vm7587_vm9 = vcmp.eq.s32.totalorder %v5291_v3, %v5585_v52  ;;  %v3757_v31 = vsel %vm522_vm13, 1.0, %v7612_v14  ;;  %vm7594_vm13 = vcmp.eq.s32.totalorder %v5539_v42, %v5310_v8 }
 0x18e   : > { %4224 = vmatpush.lsf.msk.msk.msrb.mxu2 %vm7583_vm7, %v7610_v2  ;;  %vm507_vm7 = vcmp.eq.s32.totalorder %v5264_v58, %v5276_v63  ;;  %v4544_v32 = vpack.i.bf16 %v3824_v49, %v3757_v31  ;;  %v3828_v56 = vsel %vm7594_vm13, 1.0, %v7612_v14  ;;  %v3697_v49 = vsel %vm462_vm5, 1.0, %v7612_v14 }
 0x18f   : > { %4187 = vmatpush.lsf.msk.msk.msrb.mxu1 %vm507_vm7, %v7610_v2  ;;  %vm7588_vm7 = vcmp.eq.s32.totalorder %v5589_v61, %v5794_v57  ;;  %vm479_vm5 = vcmp.eq.s32.totalorder %v5278_v0, %v5276_v63  ;;  %vm7600_vm13 = vcmp.eq.s32.totalorder %v5438_v46, %v5310_v8 }
 0x190   : > { %4225 = vmatpush.lsf.msk.msk.msrb.mxu2 %vm7585_vm10, %v7610_v2  ;;  %vm503_vm10 = vcmp.eq.s32.totalorder %v5322_v12, %v5276_v63  ;;  %4545 = vxpose.xlu0.b32.cont [12/16] %v4544_v32, 128  ;;  %v829_v32 = vld [vmem:[#allocation6 + $0xf8] sm:$0xff] }
 0x191   : > { %4188 = vmatpush.lsf.msk.msk.msrb.mxu1 %vm503_vm10, %v7610_v2  ;;  %vm7590_vm10 = vcmp.eq.s32.totalorder %v5561_v41, %v5794_v57  ;;  %4433 = vxpose.xlu1.b32.cont [12/16] %v4432_v45, 128  ;;  %v828_v45 = vld [vmem:[#allocation6 + $0xf0] sm:$0xff] }
 0x192   : > { %4226 = vmatpush.lsf.msk.msk.msrb.mxu2 %vm7587_vm9, %v7610_v2  ;;  %vm7596_vm9 = vcmp.eq.s32.totalorder %v5539_v42, %v5346_v19 }
 0x193   : > { %4097 = vllmr.16.mxu2  ;;  %4189 = vmatpush.lsf.msk.msk.msrb.mxu1 %vm499_vm3, %v7610_v2  ;;  %vm526_vm3 = vcmp.eq.s32.totalorder %v5378_v26, %v5320_v10  ;;  %v3826_v43 = vsel %vm7596_vm9, 1.0, %v7612_v14  ;;  %vm7598_vm9 = vcmp.eq.s32.totalorder %v5478_v18, %v5794_v57 }
 0x194   : > { %v3761_v16 = vsel %vm526_vm3, 1.0, %v7612_v14  ;;  %v4434_v15 = vpack.i.bf16 %v3697_v49, %v3826_v43  ;;  %vm530_vm3 = vcmp.eq.s32.totalorder %v5535_v40, %v5320_v10 }
 0x195   : > { %4227 = vmatpush.lsf.msk.msk.msrb.mxu2 %vm7588_vm7, %v7610_v2  ;;  %4190 = vmatpush.lsf.msk.msk.msrb.mxu1 %vm495_vm0, %v7610_v2  ;;  %vm7591_vm7 = vcmp.eq.s32.totalorder %v5438_v46, %v5794_v57  ;;  %vm7592_vm0 = vcmp.eq.s32.totalorder %v5539_v42, %v5794_v57  ;;  %v4546_v11 = vpack.i.bf16 %v3828_v56, %v3761_v16  ;;  %v3765_v31 = vsel %vm530_vm3, 1.0, %v7612_v14  ;;  %v811_v16 = vld [vmem:[#allocation6 + $0x68] sm:$0xff] }
 0x196   : > { %v3832_v56 = vsel %vm7600_vm13, 1.0, %v7612_v14  ;;  %vm537_vm3 = vcmp.eq.s32.totalorder %v5673_v48, %v5384_v30  ;;  %vm7606_vm13 = vcmp.eq.s32.totalorder %v5561_v41, %v5310_v8 }
 0x197   : > { %4228 = vmatpush.lsf.msk.msk.msrb.mxu2 %vm7590_vm10, %v7610_v2  ;;  %vm491_vm10 = vcmp.eq.s32.totalorder %v5295_v4, %v5276_v63 }
 0x198   : > { %4191 = vmatpush.lsf.msk.msk.msrb.mxu1 %vm491_vm10, %v7610_v2  ;;  %vm7593_vm10 = vcmp.eq.s32.totalorder %v5400_v33, %v5794_v57  ;;  %4547 = vxpose.xlu0.b32.cont [13/16] %v4546_v11, 128  ;;  %v4548_v11 = vpack.i.bf16 %v3832_v56, %v3765_v31  ;;  %v825_v56 = vld [vmem:[#allocation6 + $0xd8] sm:$0xff] }
 0x199   : > { %4229 = vmatpush.lsf.msk.msk.msrb.mxu2 %vm7591_vm7, %v7610_v2  ;;  %vm487_vm7 = vcmp.eq.s32.totalorder %v5297_v5, %v5276_v63  ;;  %4435 = vxpose.xlu1.b32.cont [13/16] %v4434_v15, 128  ;;  %v827_v15 = vld [vmem:[#allocation6 + $0xe8] sm:$0xff] }
 0x19a   : > { %4192 = vmatpush.lsf.msk.msk.msrb.mxu1 %vm487_vm7, %v7610_v2  ;;  %vm7595_vm7 = vcmp.eq.s32.totalorder %v5514_v51, %v5794_v57 }
 0x19b   : > { %4230 = vmatpush.lsf.msk.msk.msrb.mxu2 %vm7592_vm0, %v7610_v2  ;;  %vm483_vm0 = vcmp.eq.s32.totalorder %v5247_v44, %v5276_v63  ;;  %v813_v63 = vld [vmem:[#allocation6 + $0x78] sm:$0xff] }
 0x19c   : > { %4193 = vmatpush.lsf.msk.msk.msrb.mxu1 %vm483_vm0, %v7610_v2  ;;  %vm7597_vm0 = vcmp.eq.s32.totalorder %v5374_v24, %v5794_v57  ;;  %1086 = vmatpush.msra.mxu0 %v813_v63  ;;  %v810_v63 = vld [vmem:[#allocation6 + $0x60] sm:$0xff] }
 0x19d   : > { %4231 = vmatpush.lsf.msk.msk.msrb.mxu2 %vm7593_vm10, %v7610_v2  ;;  %vm7602_vm10 = vcmp.eq.s32.totalorder %v5438_v46, %v5346_v19 }
 0x19e   : > { %4194 = vmatpush.lsf.msk.msk.msrb.mxu1 %vm479_vm5, %v7610_v2  ;;  %vm541_vm5 = vcmp.eq.s32.totalorder %v5557_v37, %v5384_v30  ;;  %v3830_v43 = vsel %vm7602_vm10, 1.0, %v7612_v14  ;;  %1087 = vmatpush.msra.mxu0 %v812_v6  ;;  %vm525_vm10 = vcmp.eq.s32.totalorder %v5380_v27, %v5384_v30 }
 0x19f   : > { %4232 = vmatpush.lsf.msk.msk.msrb.mxu2 %vm7595_vm7, %v7610_v2  ;;  %4019 = vllmr.16.mxu1  ;;  %vm466_vm7 = vcmp.eq.s32.totalorder %v5266_v59, %v5320_v10 }
 0x1a0   : > { %1295 = vmatpush.msra.mxu1 %v829_v32  ;;  %v3701_v49 = vsel %vm466_vm7, 1.0, %v7612_v14  ;;  %4549 = vxpose.xlu0.b32.cont [14/16] %v4548_v11, 128  ;;  %vm529_vm7 = vcmp.eq.s32.totalorder %v5378_v26, %v5384_v30  ;;  %v826_v32 = vld [vmem:[#allocation6 + $0xe0] sm:$0xff]  ;;  %v808_v11 = vld [vmem:[#allocation6 + $0x50] sm:$0xff] }
 0x1a1   : > { %4233 = vmatpush.lsf.msk.msk.msrb.mxu2 %vm7597_vm0, %v7610_v2  ;;  %vm7601_vm0 = vcmp.eq.s32.totalorder %v5348_v20, %v5794_v57  ;;  %v4436_v31 = vpack.i.bf16 %v3701_v49, %v3830_v43  ;;  %1088 = vmatpush.msra.mxu0 %v811_v16  ;;  %v3836_v43 = vsel %vm7606_vm13, 1.0, %v7612_v14  ;;  %vm1634_vm13 = vcmp.eq.s32.totalorder %v5589_v61, %v5346_v19 }
 0x1a2   : > { %4195 = vmatpush.lsf.msk.msk.msrb.mxu1 %vm541_vm5, %v7610_v2  ;;  %vm7599_vm5 = vcmp.eq.s32.totalorder %v5480_v23, %v5794_v57 }
 0x1a3   : > { %4234 = vmatpush.lsf.msk.msk.msrb.mxu2 %vm7598_vm9, %v7610_v2  ;;  %vm534_vm9 = vcmp.eq.s32.totalorder %v5673_v48, %v5320_v10  ;;  %4437 = vxpose.xlu1.b32.cont [14/16] %v4436_v31, 128  ;;  %v824_v31 = vld [vmem:[#allocation6 + $0xd0] sm:$0xff] }
 0x1a4   : > { %1296 = vmatpush.msra.mxu1 %v828_v45  ;;  %v3769_v6 = vsel %vm534_vm9, 1.0, %v7612_v14  ;;  %v809_v45 = vld [vmem:[#allocation6 + $0x58] sm:$0xff]  ;;  %1089 = vmatpush.msra.mxu0 %v810_v63  ;;  %vm521_vm9 = vcmp.eq.s32.totalorder %v5273_v62, %v5384_v30 }
 0x1a5   : > { %4235 = vmatpush.lsf.msk.msk.msrb.mxu2 %vm7599_vm5, %v7610_v2  ;;  %vm7608_vm5 = vcmp.eq.s32.totalorder %v5561_v41, %v5346_v19  ;;  %v4550_v49 = vpack.i.bf16 %v3836_v43, %v3769_v6  ;;  %v823_v6 = vld [vmem:[#allocation6 + $0xc8] sm:$0xff]  ;;  %v822_v43 = vld [vmem:[#allocation6 + $0xc0] sm:$0xff] }
 0x1a6   : > { %4196 = vmatpush.lsf.msk.msk.msrb.mxu1 %vm537_vm3, %v7610_v2  ;;  %vm533_vm3 = vcmp.eq.s32.totalorder %v5535_v40, %v5384_v30  ;;  %v3834_v16 = vsel %vm7608_vm5, 1.0, %v7612_v14  ;;  %1090 = vmatpush.msra.mxu0 %v809_v45  ;;  %vm509_vm5 = vcmp.eq.s32.totalorder %v5264_v58, %v5384_v30 }
 0x1a7   : > { %4236 = vmatpush.lsf.msk.msk.msrb.mxu2 %vm7601_vm0, %v7610_v2  ;;  %vm470_vm0 = vcmp.eq.s32.totalorder %v5235_v35, %v5320_v10 }
 0x1a8   : > { %4197 = vmatpush.lsf.msk.msk.msrb.mxu1 %vm533_vm3, %v7610_v2  ;;  %vm7603_vm3 = vcmp.eq.s32.totalorder %v5442_v47, %v5794_v57  ;;  %4551 = vxpose.xlu0.b32.cont [15/16] %v4550_v49, 128  ;;  %v805_v49 = vld [vmem:[#allocation6 + $0x38] sm:$0xff] }
 0x1a9   : > { %4237 = vmatpush.lsf.msk.msk.msrb.mxu2 %vm7603_vm3, %v7610_v2  ;;  %vm517_vm3 = vcmp.eq.s32.totalorder %v5352_v21, %v5384_v30  ;;  %1091 = vmatpush.msra.mxu0 %v808_v11  ;;  %v3838_v11 = vsel %vm1634_vm13, 1.0, %v7612_v14 }
 0x1aa   : > { %1297 = vmatpush.msra.mxu1 %v827_v15  ;;  %v3705_v15 = vsel %vm470_vm0, 1.0, %v7612_v14  ;;  %vm513_vm0 = vcmp.eq.s32.totalorder %v5354_v22, %v5384_v30 }
 0x1ab   : > { %v4438_v63 = vpack.i.bf16 %v3705_v15, %v3834_v16 }
 0x1ac   : > { %4198 = vmatpush.lsf.msk.msk.msrb.mxu1 %vm529_vm7, %v7610_v2  ;;  %vm7604_vm7 = vcmp.eq.s32.totalorder %v5444_v50, %v5794_v57 }
 0x1ad   : > { %4238 = vmatpush.lsf.msk.msk.msrb.mxu2 %vm7604_vm7, %v7610_v2  ;;  %vm7671_vm7 = vcmp.eq.s32.totalorder %v5589_v61, %v5310_v8  ;;  %4439 = vxpose.xlu1.b32.cont [15/16] %v4438_v63, 128  ;;  %v821_v63 = vld [vmem:[#allocation6 + $0xb8] sm:$0xff] }
 0x1ae   : > { %1298 = vmatpush.msra.mxu1 %v826_v32  ;;  %v807_v32 = vld [vmem:[#allocation6 + $0x48] sm:$0xff]  ;;  %v3840_v45 = vsel %vm7671_vm7, 1.0, %v7612_v14 }
 0x1af   : > { %1092 = vmatpush.msra.mxu0 %v807_v32  ;;  %v804_v32 = vld [vmem:[#allocation6 + $0x30] sm:$0xff] }
 0x1b0   : > { %4199 = vmatpush.lsf.msk.msk.msrb.mxu1 %vm525_vm10, %v7610_v2  ;;  %vm7605_vm10 = vcmp.eq.s32.totalorder %v5315_v9, %v5794_v57 }
 0x1b1   : > { %4239 = vmatpush.lsf.msk.msk.msrb.mxu2 %vm7605_vm10, %v7610_v2  ;;  %vm538_vm10 = vcmp.eq.s32.totalorder %v5557_v37, %v5320_v10 }
 0x1b2   : > { %1299 = vmatpush.msra.mxu1 %v825_v56  ;;  %v806_v56 = vld [vmem:[#allocation6 + $0x40] sm:$0xff]  ;;  %v3773_v16 = vsel %vm538_vm10, 1.0, %v7612_v14  ;;  %vm497_vm10 = vcmp.eq.s32.totalorder %v5258_v53, %v5384_v30 }
 0x1b3   : > { %v4552_v15 = vpack.i.bf16 %v3840_v45, %v3773_v16  ;;  %1093 = vmatpush.msra.mxu0 %v806_v56  ;;  %v803_v45 = vld [vmem:[#allocation6 + $0x28] sm:$0xff]  ;;  %v818_v16 = vld [vmem:[#allocation6 + $0xa0] sm:$0xff] }
 0x1b4   : > { %4200 = vmatpush.lsf.msk.msk.msrb.mxu1 %vm521_vm9, %v7610_v2  ;;  %vm7607_vm9 = vcmp.eq.s32.totalorder %v5402_v34, %v5794_v57  ;;  %v819_v56 = vld [vmem:[#allocation6 + $0xa8] sm:$0xff] }
 0x1b5   : > { %4240 = vmatpush.lsf.msk.msk.msrb.mxu2 %vm7607_vm9, %v7610_v2  ;;  %vm474_vm9 = vcmp.eq.s32.totalorder %v5280_v1, %v5320_v10  ;;  %4553 = vxpose.xlu0.b32.end [16/16] %v4552_v15, 128  ;;  %v800_v15 = vld [vmem:[#allocation6 + $0x10] sm:$0xff] }
 0x1b6   : > { %4201 = vmatpush.lsf.msk.msk.msrb.mxu1 %vm517_vm3, %v7610_v2  ;;  %vm7609_vm3 = vcmp.eq.s32.totalorder %v5404_v36, %v5794_v57  ;;  %1094 = vmatpush.msra.mxu0 %v805_v49  ;;  %v817_v49 = vld [vmem:[#allocation6 + $0x98] sm:$0xff] }
 0x1b7   : > { %4241 = vmatpush.lsf.msk.msk.msrb.mxu2 %vm7609_vm3, %v7610_v2  ;;  %vm505_vm3 = vcmp.eq.s32.totalorder %v5322_v12, %v5384_v30 }
 0x1b8   : > { %1300 = vmatpush.msra.mxu1 %v824_v31  ;;  %v3709_v31 = vsel %vm474_vm9, 1.0, %v7612_v14  ;;  %1095 = vmatpush.msra.mxu0 %v804_v32  ;;  %vm493_vm9 = vcmp.eq.s32.totalorder %v5295_v4, %v5384_v30  ;;  %v798_v32 = vld [vmem:[#allocation6] sm:$0xff] }
 0x1b9   : > { %v4440_v10 = vpack.i.bf16 %v3709_v31, %v3838_v11  ;;  %v801_v11 = vld [vmem:[#allocation6 + $0x18] sm:$0xff]  ;;  %v816_v31 = vld [vmem:[#allocation6 + $0x90] sm:$0xff] }
 0x1ba   : > { %4202 = vmatpush.lsf.msk.msk.msrb.mxu1 %vm513_vm0, %v7610_v2  ;;  %vm7666_vm0 = vcmp.eq.s32.totalorder %v5291_v3, %v5794_v57  ;;  %1096 = vmatpush.msra.mxu0 %v803_v45 }
 0x1bb   : > { %4242 = vmatpush.lsf.msk.msk.msrb.mxu2 %vm7666_vm0, %v7610_v2  ;;  %4441 = vxpose.xlu1.b32.end [16/16] %v4440_v10, 128  ;;  %v815_v10 = vld [vmem:[#allocation6 + $0x88] sm:$0xff] }
 0x1bc   : > { %1301 = vmatpush.msra.mxu1 %v823_v6  ;;  %v820_v6 = vld [vmem:[#allocation6 + $0xb0] sm:$0xff] }
 0x1be   : > { %4203 = vmatpush.lsf.msk.msk.msrb.mxu1 %vm509_vm5, %v7610_v2  ;;  %vm501_vm5 = vcmp.eq.s32.totalorder %v5324_v13, %v5384_v30 }
 0x1c0   : > { %1302 = vmatpush.msra.mxu1 %v822_v43  ;;  %v802_v43 = vld [vmem:[#allocation6 + $0x20] sm:$0xff] }
 0x1c1   : > { %1097 = vmatpush.msra.mxu0 %v802_v43 }
 0x1c2   : > { %4204 = vmatpush.lsf.msk.msk.msrb.mxu1 %vm505_vm3, %v7610_v2  ;;  %vm489_vm3 = vcmp.eq.s32.totalorder %v5297_v5, %v5384_v30 }
 0x1c3   : > { %1098 = vmatpush.msra.mxu0 %v801_v11 }
 0x1c4   : > { %4205 = vmatpush.lsf.msk.msk.msrb.mxu1 %vm501_vm5, %v7610_v2  ;;  %vm485_vm5 = vcmp.eq.s32.totalorder %v5247_v44, %v5384_v30 }
 0x1c5   : > { %1099 = vmatpush.msra.mxu0 %v800_v15 }
 0x1c6   : > { %1303 = vmatpush.msra.mxu1 %v821_v63  ;;  %v799_v63 = vld [vmem:[#allocation6 + $0x8] sm:$0xff] }
 0x1c7   : > { %1100 = vmatpush.msra.mxu0 %v799_v63 }
 0x1c8   : > { %4206 = vmatpush.lsf.msk.msk.msrb.mxu1 %vm497_vm10, %v7610_v2  ;;  %vm481_vm10 = vcmp.eq.s32.totalorder %v5278_v0, %v5384_v30 }
 0x1c9   : > { %1101 = vmatpush.msra.mxu0 %v798_v32 }
 0x1ca   : > { %1304 = vmatpush.msra.mxu1 %v820_v6  ;;  %v814_v6 = vld [vmem:[#allocation6 + $0x80] sm:$0xff] }
 0x1cc   : > { %4207 = vmatpush.lsf.msk.msk.msrb.mxu1 %vm493_vm9, %v7610_v2 }
 0x1ce   : > { %1305 = vmatpush.msra.mxu1 %v819_v56 }
 0x1d0   : > { %4208 = vmatpush.lsf.msk.msk.msrb.mxu1 %vm489_vm3, %v7610_v2 }
 0x1d2   : > { %1306 = vmatpush.msra.mxu1 %v818_v16 }
 0x1d4   : > { %4209 = vmatpush.lsf.msk.msk.msrb.mxu1 %vm485_vm5, %v7610_v2 }
 0x1d6   : > { %1307 = vmatpush.msra.mxu1 %v817_v49 }
 0x1d8   : > { %4210 = vmatpush.lsf.msk.msk.msrb.mxu1 %vm481_vm10, %v7610_v2 }
 0x1da   : > { %1308 = vmatpush.msra.mxu1 %v816_v31 }
 0x1dc   : > { %1309 = vmatpush.msra.mxu1 %v815_v10 }
 0x1de   : > { %1310 = vmatpush.msra.mxu1 %v814_v6 }
 0x1e1   : > { %v6049_v45 = vpop.trf.xlu0 }
 0x1e2   : > { %v4555_v56 = vunpack.i.l.bf16 %v6049_v45 }
 0x1e4   : > { %1311 = vmatmul.f32.vlgmr.msra.gmra.mxu1 %v4555_v56 }
 0x1e7   : > { %v4442_v43 = vpop.trf.xlu1 }
 0x1e8   : > { %v4446_v16 = vunpack.i.h.bf16 %v4442_v43  ;;  %v4443_v30 = vunpack.i.l.bf16 %v4442_v43 }
 0x1e9   : > { %v6052_v11 = vpop.trf.xlu0 }
 0x1ea   : > { %1102 = vmatmul.f32.vlgmr.msra.gmra.mxu0 %v4446_v16  ;;  %1991 = vmatmul.f32.vlgmr.msra.gmra.mxu2 %v4443_v30  ;;  %v4560_v49 = vunpack.i.l.bf16 %v6052_v11  ;;  %v4563_v59 = vunpack.i.h.bf16 %v6052_v11 }
 0x1ec   : > { %1314 = vmatmul.f32.gmra.mxu1 %v4560_v49 }
 0x1ef   : > { %v4447_v15 = vpop.trf.xlu1 }
 0x1f0   : > { %v4451_v31 = vunpack.i.h.bf16 %v4447_v15  ;;  %v4448_v63 = vunpack.i.l.bf16 %v4447_v15 }
 0x1f1   : > { %v6055_v10 = vpop.trf.xlu0 }
 0x1f2   : > { %1105 = vmatmul.f32.gmra.mxu0 %v4451_v31  ;;  %1994 = vmatmul.f32.gmra.mxu2 %v4448_v63  ;;  %v4565_v32 = vunpack.i.l.bf16 %v6055_v10 }
 0x1f4   : > { %1317 = vmatmul.f32.gmra.mxu1 %v4565_v32 }
 0x1f7   : > { %v4452_v6 = vpop.trf.xlu1 }
 0x1f8   : > { %v4456_v2 = vunpack.i.h.bf16 %v4452_v6  ;;  %v4453_v56 = vunpack.i.l.bf16 %v4452_v6 }
 0x1f9   : > { %v6058_v43 = vpop.trf.xlu0 }
 0x1fa   : > { %1108 = vmatmul.f32.gmra.mxu0 %v4456_v2  ;;  %1997 = vmatmul.f32.gmra.mxu2 %v4453_v56  ;;  %v4570_v16 = vunpack.i.l.bf16 %v6058_v43 }
 0x1fc   : > { %1320 = vmatmul.f32.gmra.mxu1 %v4570_v16 }
 0x1ff   : > { %v4457_v30 = vpop.trf.xlu1 }
 0x200   : > { %v4461_v14 = vunpack.i.h.bf16 %v4457_v30  ;;  %v4458_v49 = vunpack.i.l.bf16 %v4457_v30 }
 0x201   : > { %v6061_v15 = vpop.trf.xlu0 }
 0x202   : > { %1111 = vmatmul.f32.gmra.mxu0 %v4461_v14  ;;  %2000 = vmatmul.f32.gmra.mxu2 %v4458_v49  ;;  %v4575_v31 = vunpack.i.l.bf16 %v6061_v15 }
 0x204   : > { %1323 = vmatmul.f32.gmra.mxu1 %v4575_v31 }
 0x207   : > { %v4462_v63 = vpop.trf.xlu1 }
 0x208   : > { %v4466_v57 = vunpack.i.h.bf16 %v4462_v63  ;;  %v4463_v32 = vunpack.i.l.bf16 %v4462_v63 }
 0x209   : > { %v6064_v2 = vpop.trf.xlu0 }
 0x20a   : > { %1114 = vmatmul.f32.gmra.mxu0 %v4466_v57  ;;  %2003 = vmatmul.f32.gmra.mxu2 %v4463_v32  ;;  %v4580_v6 = vunpack.i.l.bf16 %v6064_v2 }
 0x20c   : > { %1326 = vmatmul.f32.gmra.mxu1 %v4580_v6 }
 0x20f   : > { %v4467_v56 = vpop.trf.xlu1 }
 0x210   : > { %v4471_v8 = vunpack.i.h.bf16 %v4467_v56  ;;  %v4468_v16 = vunpack.i.l.bf16 %v4467_v56 }
 0x211   : > { %v6067_v14 = vpop.trf.xlu0 }
 0x212   : > { %1117 = vmatmul.f32.gmra.mxu0 %v4471_v8  ;;  %2006 = vmatmul.f32.gmra.mxu2 %v4468_v16  ;;  %v4585_v30 = vunpack.i.l.bf16 %v6067_v14 }
 0x214   : > { %1329 = vmatmul.f32.gmra.mxu1 %v4585_v30 }
 0x217   : > { %v4472_v49 = vpop.trf.xlu1 }
 0x218   : > { %v4476_v52 = vunpack.i.h.bf16 %v4472_v49  ;;  %v4473_v31 = vunpack.i.l.bf16 %v4472_v49 }
 0x219   : > { %v6070_v57 = vpop.trf.xlu0 }
 0x21a   : > { %1120 = vmatmul.f32.gmra.mxu0 %v4476_v52  ;;  %2009 = vmatmul.f32.gmra.mxu2 %v4473_v31  ;;  %v4590_v63 = vunpack.i.l.bf16 %v6070_v57 }
 0x21c   : > { %1332 = vmatmul.f32.gmra.mxu1 %v4590_v63 }
 0x21f   : > { %v4477_v32 = vpop.trf.xlu1 }
 0x220   : > { %v4481_v61 = vunpack.i.h.bf16 %v4477_v32  ;;  %v4478_v6 = vunpack.i.l.bf16 %v4477_v32 }
 0x221   : > { %v6073_v8 = vpop.trf.xlu0 }
 0x222   : > { %1123 = vmatmul.f32.gmra.mxu0 %v4481_v61  ;;  %2012 = vmatmul.f32.gmra.mxu2 %v4478_v6  ;;  %v4595_v56 = vunpack.i.l.bf16 %v6073_v8 }
 0x224   : > { %1335 = vmatmul.f32.gmra.mxu1 %v4595_v56 }
 0x227   : > { %v4482_v16 = vpop.trf.xlu1 }
 0x228   : > { %v4486_v41 = vunpack.i.h.bf16 %v4482_v16  ;;  %v4483_v30 = vunpack.i.l.bf16 %v4482_v16 }
 0x229   : > { %v6076_v52 = vpop.trf.xlu0 }
 0x22a   : > { %1126 = vmatmul.f32.gmra.mxu0 %v4486_v41  ;;  %2015 = vmatmul.f32.gmra.mxu2 %v4483_v30  ;;  %v4600_v49 = vunpack.i.l.bf16 %v6076_v52 }
 0x22c   : > { %1338 = vmatmul.f32.gmra.mxu1 %v4600_v49 }
 0x22f   : > { %v4487_v31 = vpop.trf.xlu1 }
 0x230   : > { %v4491_v46 = vunpack.i.h.bf16 %v4487_v31  ;;  %v4488_v63 = vunpack.i.l.bf16 %v4487_v31 }
 0x231   : > { %v6079_v61 = vpop.trf.xlu0 }
 0x232   : > { %1129 = vmatmul.f32.gmra.mxu0 %v4491_v46  ;;  %2018 = vmatmul.f32.gmra.mxu2 %v4488_v63  ;;  %v4605_v32 = vunpack.i.l.bf16 %v6079_v61 }
 0x234   : > { %1341 = vmatmul.f32.gmra.mxu1 %v4605_v32 }
 0x237   : > { %v4492_v6 = vpop.trf.xlu1 }
 0x238   : > { %v4496_v42 = vunpack.i.h.bf16 %v4492_v6  ;;  %v4493_v56 = vunpack.i.l.bf16 %v4492_v6 }
 0x239   : > { %v6082_v41 = vpop.trf.xlu0 }
 0x23a   : > { %1132 = vmatmul.f32.gmra.mxu0 %v4496_v42  ;;  %2021 = vmatmul.f32.gmra.mxu2 %v4493_v56  ;;  %v4610_v16 = vunpack.i.l.bf16 %v6082_v41 }
 0x23c   : > { %1344 = vmatmul.f32.gmra.mxu1 %v4610_v16 }
 0x23f   : > { %v4497_v30 = vpop.trf.xlu1 }
 0x240   : > { %v4501_v33 = vunpack.i.h.bf16 %v4497_v30  ;;  %v4498_v49 = vunpack.i.l.bf16 %v4497_v30 }
 0x241   : > { %v6085_v46 = vpop.trf.xlu0 }
 0x242   : > { %1135 = vmatmul.f32.gmra.mxu0 %v4501_v33  ;;  %2024 = vmatmul.f32.gmra.mxu2 %v4498_v49  ;;  %v4615_v31 = vunpack.i.l.bf16 %v6085_v46 }
 0x244   : > { %1347 = vmatmul.f32.gmra.mxu1 %v4615_v31 }
 0x247   : > { %v4502_v63 = vpop.trf.xlu1 }
 0x248   : > { %v4506_v51 = vunpack.i.h.bf16 %v4502_v63  ;;  %v4503_v32 = vunpack.i.l.bf16 %v4502_v63 }
 0x249   : > { %v6088_v42 = vpop.trf.xlu0 }
 0x24a   : > { %1138 = vmatmul.f32.gmra.mxu0 %v4506_v51  ;;  %2027 = vmatmul.f32.gmra.mxu2 %v4503_v32  ;;  %v4620_v6 = vunpack.i.l.bf16 %v6088_v42 }
 0x24c   : > { %1350 = vmatmul.f32.gmra.mxu1 %v4620_v6 }
 0x24f   : > { %v4507_v56 = vpop.trf.xlu1 }
 0x250   : > { %v4511_v24 = vunpack.i.h.bf16 %v4507_v56  ;;  %v4508_v16 = vunpack.i.l.bf16 %v4507_v56 }
 0x251   : > { %v6091_v33 = vpop.trf.xlu0 }
 0x252   : > { %1141 = vmatmul.f32.gmra.mxu0 %v4511_v24  ;;  %2030 = vmatmul.f32.gmra.mxu2 %v4508_v16  ;;  %v4625_v30 = vunpack.i.l.bf16 %v6091_v33 }
 0x254   : > { %1353 = vmatmul.f32.gmra.mxu1 %v4625_v30 }
 0x257   : > { %v4512_v49 = vpop.trf.xlu1 }
 0x258   : > { %v4516_v18 = vunpack.i.h.bf16 %v4512_v49  ;;  %v4513_v31 = vunpack.i.l.bf16 %v4512_v49 }
 0x259   : > { %v6094_v51 = vpop.trf.xlu0 }
 0x25a   : > { %1144 = vmatmul.f32.gmra.mxu0 %v4516_v18  ;;  %2033 = vmatmul.f32.gmra.mxu2 %v4513_v31  ;;  %7726 = vst [vmem:[#allocation50_spill] sm:$0xff] %v6094_v51  ;;  %v4630_v63 = vunpack.i.l.bf16 %v6094_v51 }
 0x25c   : > { %1356 = vmatmul.f32.gmra.mxu1 %v4630_v63 }
 0x25f   : > { %v4517_v32 = vpop.trf.xlu1 }
 0x260   : > { %v4521_v23 = vunpack.i.h.bf16 %v4517_v32  ;;  %v4518_v6 = vunpack.i.l.bf16 %v4517_v32 }
 0x261   : > { %v6103_v49 = vpop.f32.mrf.mxu1 }
 0x262   : > { %1147 = vmatmul.f32.gmra.mxu0 %v4521_v23  ;;  %2036 = vmatmul.f32.gmra.mxu2 %v4518_v6  ;;  %7727 = vst [vmem:[#allocation51_spill] sm:$0xff] %v6103_v49  ;;  %v4583_v49 = vunpack.i.h.bf16 %v6064_v2 }
 0x264   : > { %4020 = vmatmul.lmr.bf16.gmra.16.mxu1 }
 0x267   : > { %v6105_v31 = vpop.f32.mrf.mxu0 }
 0x268   : > { %7728 = vst [vmem:[#allocation52_spill] sm:$0xff] %v6105_v31 }
 0x269   : > { %v6108_v32 = vpop.f32.mrf.mxu1 }
 0x26a   : > { %4098 = vmatmul.lmr.bf16.gmra.16.mxu2  ;;  %3942 = vmatmul.lmr.bf16.gmra.16.mxu0 }
 0x26c   : > { %4021 = vmatmul.lmr.bf16.gmra.16.mxu1 }
 0x26d   : > { %v1992_v24 = vpop.f32.mrf.mxu2 }
 0x26e   : > { %2248 = vrot.lane.b32.xlu2 %v1992_v24, %s4946_s5 }
 0x26f   : > { %v6110_v24 = vpop.f32.mrf.mxu0 }
 0x272   : > { %4099 = vmatmul.lmr.bf16.gmra.16.mxu2  ;;  %3943 = vmatmul.lmr.bf16.gmra.16.mxu0 }
 0x274   : > { %4022 = vmatmul.lmr.bf16.gmra.16.mxu1 }
 0x275   : > { %v1995_v18 = vpop.f32.mrf.mxu2 }
 0x276   : > { %2250 = vrot.lane.b32.xlu2 %v1995_v18, %s4946_s5 }
 0x27a   : > { %4100 = vmatmul.lmr.bf16.gmra.16.mxu2  ;;  %3944 = vmatmul.lmr.bf16.gmra.16.mxu0 }
 0x27c   : > { %4023 = vmatmul.lmr.bf16.gmra.16.mxu1 }
 0x27d   : > { %v1998_v56 = vpop.f32.mrf.mxu2 }
 0x27e   : > { %2252 = vrot.lane.b32.xlu2 %v1998_v56, %s4946_s5  ;;  %v6113_v56 = vpop.f32.mrf.mxu1 }
 0x282   : > { %4101 = vmatmul.lmr.bf16.gmra.16.mxu2  ;;  %3945 = vmatmul.lmr.bf16.gmra.16.mxu0 }
 0x284   : > { %4024 = vmatmul.lmr.bf16.gmra.16.mxu1 }
 0x285   : > { %v2001_v23 = vpop.f32.mrf.mxu2 }
 0x286   : > { %2254 = vrot.lane.b32.xlu2 %v2001_v23, %s4946_s5  ;;  %v6116_v23 = vpop.f32.mrf.mxu0 }
 0x28a   : > { %4102 = vmatmul.lmr.bf16.gmra.16.mxu2  ;;  %3946 = vmatmul.lmr.bf16.gmra.16.mxu0 }
 0x28c   : > { %4025 = vmatmul.lmr.bf16.gmra.16.mxu1 }
 0x28d   : > { %v2004_v16 = vpop.f32.mrf.mxu2 }
 0x28e   : > { %2256 = vrot.lane.b32.xlu2 %v2004_v16, %s4946_s5 }
 0x292   : > { %4103 = vmatmul.lmr.bf16.gmra.16.mxu2  ;;  %3947 = vmatmul.lmr.bf16.gmra.16.mxu0 }
 0x294   : > { %4026 = vmatmul.lmr.bf16.gmra.16.mxu1 }
 0x295   : > { %v2007_v30 = vpop.f32.mrf.mxu2 }
 0x296   : > { %2258 = vrot.lane.b32.xlu2 %v2007_v30, %s4946_s5  ;;  %v6119_v30 = vpop.f32.mrf.mxu1 }
 0x29a   : > { %4104 = vmatmul.lmr.bf16.gmra.16.mxu2  ;;  %3948 = vmatmul.lmr.bf16.gmra.16.mxu0 }
 0x29c   : > { %4027 = vmatmul.lmr.bf16.gmra.16.mxu1 }
 0x29d   : > { %v2010_v63 = vpop.f32.mrf.mxu2 }
 0x29e   : > { %2260 = vrot.lane.b32.xlu2 %v2010_v63, %s4946_s5  ;;  %v6121_v63 = vpop.f32.mrf.mxu0 }
 0x2a2   : > { %4105 = vmatmul.lmr.bf16.gmra.16.mxu2  ;;  %3949 = vmatmul.lmr.bf16.gmra.16.mxu0 }
 0x2a4   : > { %4028 = vmatmul.lmr.bf16.gmra.16.mxu1 }
 0x2a5   : > { %v2013_v6 = vpop.f32.mrf.mxu2 }
 0x2a6   : > { %2262 = vrot.lane.b32.xlu2 %v2013_v6, %s4946_s5  ;;  %v6126_v20 = vpop.f32.mrf.mxu0 }
 0x2aa   : > { %4106 = vmatmul.lmr.bf16.gmra.16.mxu2  ;;  %3950 = vmatmul.lmr.bf16.gmra.16.mxu0 }
 0x2ac   : > { %4029 = vmatmul.lmr.bf16.gmra.16.mxu1 }
 0x2ad   : > { %v2016_v18 = vpop.f32.mrf.mxu2 }
 0x2ae   : > { %2264 = vrot.lane.b32.xlu2 %v2016_v18, %s4946_s5  ;;  %v6124_v18 = vpop.f32.mrf.mxu1  ;;  %v6133_v34 = vpop.f32.mrf.mxu0 }
 0x2b2   : > { %4107 = vmatmul.lmr.bf16.gmra.16.mxu2  ;;  %3951 = vmatmul.lmr.bf16.gmra.16.mxu0 }
 0x2b4   : > { %4030 = vmatmul.lmr.bf16.gmra.16.mxu1 }
 0x2b5   : > { %v2019_v16 = vpop.f32.mrf.mxu2 }
 0x2b6   : > { %2266 = vrot.lane.b32.xlu2 %v2019_v16, %s4946_s5  ;;  %v6131_v50 = vpop.f32.mrf.mxu1 }
 0x2ba   : > { %4108 = vmatmul.lmr.bf16.gmra.16.mxu2  ;;  %3952 = vmatmul.lmr.bf16.gmra.16.mxu0 }
 0x2bc   : > { %4031 = vmatmul.lmr.bf16.gmra.16.mxu1 }
 0x2bd   : > { %v2022_v6 = vpop.f32.mrf.mxu2 }
 0x2be   : > { %2268 = vrot.lane.b32.xlu2 %v2022_v6, %s4946_s5  ;;  %v6138_v19 = vpop.f32.mrf.mxu1 }
 0x2bf   : > { %7730 = vst [vmem:[#allocation54_spill] sm:$0xff] %v6138_v19 }
 0x2c2   : > { %4109 = vmatmul.lmr.bf16.gmra.16.mxu2  ;;  %3953 = vmatmul.lmr.bf16.gmra.16.mxu0 }
 0x2c4   : > { %4032 = vmatmul.lmr.bf16.gmra.16.mxu1 }
 0x2c5   : > { %v2025_v47 = vpop.f32.mrf.mxu2 }
 0x2c6   : > { %2270 = vrot.lane.b32.xlu2 %v2025_v47, %s4946_s5  ;;  %v6141_v47 = vpop.f32.mrf.mxu0 }
 0x2c7   : > { %7731 = vst [vmem:[#allocation55_spill] sm:$0xff] %v6141_v47  ;;  %v4558_v47 = vunpack.i.h.bf16 %v6049_v45 }
 0x2c8   : > { %v6129_v16 = vpop.permute.xlu2 %2248 }
 0x2c9   : > { %7729 = vst [vmem:[#allocation53_spill] sm:$0xff] %v6129_v16  ;;  %v6178_v16 = vperm.slane %v4749_v25, 2 }
 0x2ca   : > { %4110 = vmatmul.lmr.bf16.gmra.16.mxu2  ;;  %3954 = vmatmul.lmr.bf16.gmra.16.mxu0 }
 0x2cb   : > { %vm480_vm9 = vcmp.eq.s32.totalorder %v5278_v0, %v6178_v16  ;;  %vm416_vm3 = vcmp.eq.s32.totalorder %v5228_v29, %v6178_v16  ;;  %vm484_vm5 = vcmp.eq.s32.totalorder %v5247_v44, %v6178_v16  ;;  %vm420_vm10 = vcmp.eq.s32.totalorder %v5241_v39, %v6178_v16 }
 0x2cc   : > { %4033 = vmatmul.lmr.bf16.gmra.16.mxu1  ;;  %vm432_vm0 = vcmp.eq.s32.totalorder %v5198_v7, %v6178_v16 }
 0x2cd   : > { %v2028_v9 = vpop.f32.mrf.mxu2 }
 0x2ce   : > { %2272 = vrot.lane.b32.xlu2 %v2028_v9, %s4946_s5  ;;  %v6146_v9 = vpop.f32.mrf.mxu1  ;;  %v6150_v35 = vpop.f32.mrf.mxu0 }
 0x2d0   : > { %v6136_v6 = vpop.permute.xlu2 %2250 }
 0x2d2   : > { %4111 = vmatmul.lmr.bf16.gmra.16.mxu2  ;;  %3955 = vmatmul.lmr.bf16.gmra.16.mxu0 }
 0x2d4   : > { %4034 = vmatmul.lmr.bf16.gmra.16.mxu1 }
 0x2d5   : > { %v2031_v36 = vpop.f32.mrf.mxu2 }
 0x2d6   : > { %2274 = vrot.lane.b32.xlu2 %v2031_v36, %s4946_s5  ;;  %v6161_v40 = vpop.f32.mrf.mxu1  ;;  %v6167_v45 = vpop.f32.mrf.mxu0 }
 0x2d8   : > { %v6143_v3 = vpop.permute.xlu2 %2252 }
 0x2da   : > { %4112 = vmatmul.lmr.bf16.gmra.16.mxu2  ;;  %3956 = vmatmul.lmr.bf16.gmra.16.mxu0 }
 0x2dc   : > { %4035 = vmatmul.lmr.bf16.gmra.16.mxu1 }
 0x2dd   : > { %v2034_v1 = vpop.f32.mrf.mxu2 }
 0x2de   : > { %2276 = vrot.lane.b32.xlu2 %v2034_v1, %s4946_s5  ;;  %v1339_v11 = vpop.f32.mrf.mxu1 }
 0x2e0   : > { %v6148_v37 = vpop.permute.xlu2 %2254 }
 0x2e2   : > { %4113 = vmatmul.lmr.bf16.gmra.16.mxu2  ;;  %3957 = vmatmul.lmr.bf16.gmra.16.mxu0 }
 0x2e3   : > { %4052 = vllmr.16.mxu1 }
 0x2e5   : > { %v2037_v36 = vpop.f32.mrf.mxu2 }
 0x2e6   : > { %2278 = vrot.lane.b32.xlu2 %v2037_v36, %s4946_s5  ;;  %v7664_v36 = vmov 64   ;;  %v1342_v27 = vpop.f32.mrf.mxu1 }
 0x2e7   : > { %4746 = vset.pattern.permute.xlu0 %v7664_v36  ;;  %4747 = vset.pattern.permute.xlu1 %v7664_v36 }
 0x2e8   : > { %v6153_v19 = vpop.permute.xlu2 %2256 }
 0x2e9   : > { %4130 = vllmr.16.mxu2  ;;  %3974 = vllmr.16.mxu0 }
 0x2ea   : > { %2087 = vmatmul.f32.gmra.mxu2 %v4558_v47 }
 0x2ed   : > { %v6156_v1 = vpop.f32.mrf.mxu2 }
 0x2ee   : > { %7732 = vst [vmem:[#allocation56_spill] sm:$0xff] %v6156_v1  ;;  %v4568_v1 = vunpack.i.h.bf16 %v6055_v10  ;;  %v7737_v10 = vmov 0.0   ;;  %v1345_v44 = vpop.f32.mrf.mxu1 }
 0x2f0   : > { %v6158_v48 = vpop.permute.xlu2 %2258 }
 0x2f2   : > { %2090 = vmatmul.f32.gmra.mxu2 %v4563_v59  ;;  %v1130_v59 = vpop.f32.mrf.mxu0 }
 0x2f3   : > { %v6197_v29 = vadd.f32 %v1339_v11, %v1130_v59 }
 0x2f5   : > { %v6163_v60 = vpop.f32.mrf.mxu2 }
 0x2f6   : > { %7733 = vst [vmem:[#allocation57_spill] sm:$0xff] %v6163_v60  ;;  %v4573_v60 = vunpack.i.h.bf16 %v6058_v43  ;;  %v3651_v43 = vsel %vm416_vm3, 1.0, %v7737_v10  ;;  %vm488_vm3 = vcmp.eq.s32.totalorder %v5297_v5, %v6178_v16 }
 0x2f8   : > { %v6169_v47 = vpop.permute.xlu2 %2260 }
 0x2f9   : > { %7734 = vst [vmem:[#allocation58_spill] sm:$0xff] %v6169_v47 }
 0x2fa   : > { %2093 = vmatmul.f32.gmra.mxu2 %v4568_v1  ;;  %v3715_v1 = vsel %vm480_vm9, 1.0, %v7737_v10  ;;  %v1133_v25 = vpop.f32.mrf.mxu0 }
 0x2fb   : > { %v6209_v2 = vadd.f32 %v1342_v27, %v1133_v25 }
 0x2fd   : > { %v6172_v26 = vpop.f32.mrf.mxu2 }
 0x2fe   : > { %7735 = vst [vmem:[#allocation59_spill] sm:$0xff] %v6172_v26  ;;  %v4578_v26 = vunpack.i.h.bf16 %v6061_v15 }
 0x300   : > { %v6174_v51 = vpop.permute.xlu2 %2262 }
 0x302   : > { %2096 = vmatmul.f32.gmra.mxu2 %v4573_v60  ;;  %v4634_v60 = vpack.i.bf16 %v3715_v1, %v3651_v43  ;;  %v1136_v39 = vpop.f32.mrf.mxu0 }
 0x305   : > { %v6182_v36 = vpop.f32.mrf.mxu2 }
 0x306   : > { %7736 = vst [vmem:[#allocation60_spill] sm:$0xff] %v6182_v36  ;;  %v3719_v36 = vsel %vm484_vm5, 1.0, %v7737_v10  ;;  %vm424_vm5 = vcmp.eq.s32.totalorder %v5226_v28, %v6178_v16  ;;  %v1348_v28 = vpop.f32.mrf.mxu1 }
 0x307   : > { %v3659_v5 = vsel %vm424_vm5, 1.0, %v7737_v10 }
 0x308   : > { %v6187_v47 = vpop.permute.xlu2 %2264 }
 0x30a   : > { %2099 = vmatmul.f32.gmra.mxu2 %v4578_v26  ;;  %v3655_v26 = vsel %vm420_vm10, 1.0, %v7737_v10 }
 0x30b   : > { %v4636_v1 = vpack.i.bf16 %v3719_v36, %v3655_v26 }
 0x30c   : > { %4635 = vxpose.xlu2.b32.start [1/16] %v4634_v60, 128  ;;  %v4588_v60 = vunpack.i.h.bf16 %v6067_v14  ;;  %v6219_v14 = vadd.f32 %v1345_v44, %v1136_v39 }
 0x30d   : > { %v6193_v0 = vpop.f32.mrf.mxu2 }
 0x310   : > { %v2267_v15 = vpop.permute.xlu2 %2266 }
 0x311   : > { %v2449_v31 = vadd.f32 %v2267_v15, %v6197_v29 }
 0x312   : > { %2102 = vmatmul.f32.gmra.mxu2 %v4583_v49  ;;  %v3723_v49 = vsel %vm488_vm3, 1.0, %v7737_v10  ;;  %vm428_vm3 = vcmp.eq.s32.totalorder %v5239_v38, %v6178_v16 }
 0x313   : > { %v2577_v43 = vmul.f32 0.01, %v2449_v31  ;;  %vm2513_vm9 = vcmp.ge.f32.partialorder %v2449_v31, 0.0  ;;  %v4638_v26 = vpack.i.bf16 %v3723_v49, %v3659_v5  ;;  %v4593_v49 = vunpack.i.h.bf16 %v6070_v57  ;;  %v1351_v57 = vpop.f32.mrf.mxu1 }
 0x314   : > { %4637 = vxpose.xlu2.b32.cont [2/16] %v4636_v1, 128 }
 0x315   : > { %v6205_v11 = vpop.f32.mrf.mxu2  ;;  %v2641_v59 = vsel %vm2513_vm9, %v2449_v31, %v2577_v43  ;;  %vm492_vm9 = vcmp.eq.s32.totalorder %v5295_v4, %v6178_v16  ;;  %v1139_v31 = vpop.f32.mrf.mxu0  ;;  %v3663_v4 = vsel %vm428_vm3, 1.0, %v7737_v10  ;;  %vm500_vm3 = vcmp.eq.s32.totalorder %v5324_v13, %v6178_v16 }
 0x316   : > { %2743 = vperm.xlu0 %4746, %v2641_v59   ;;  %v3727_v43 = vsel %vm492_vm9, 1.0, %v7737_v10  ;;  %v6231_v44 = vadd.f32 %v1348_v28, %v1139_v31  ;;  %v7738_v28 = vld [vmem:[#allocation17_spill] sm:$0xff]  ;;  %v3735_v31 = vsel %vm500_vm3, 1.0, %v7737_v10 }
 0x318   : > { %v2269_v36 = vpop.permute.xlu2 %2268 }
 0x319   : > { %v2450_v15 = vadd.f32 %v2269_v36, %v6209_v2 }
 0x31a   : > { %2105 = vmatmul.f32.gmra.mxu2 %v4588_v60  ;;  %v4640_v60 = vpack.i.bf16 %v3727_v43, %v3663_v4  ;;  %v4603_v4 = vunpack.i.h.bf16 %v6076_v52 }
 0x31b   : > { %v2578_v1 = vmul.f32 0.01, %v2450_v15  ;;  %vm2514_vm10 = vcmp.ge.f32.partialorder %v2450_v15, 0.0 }
 0x31c   : > { %4639 = vxpose.xlu2.b32.cont [3/16] %v4638_v26, 128 }
 0x31d   : > { %v2642_v27 = vsel %vm2514_vm10, %v2450_v15, %v2578_v1  ;;  %v6221_v25 = vpop.f32.mrf.mxu2  ;;  %vm496_vm10 = vcmp.eq.s32.totalorder %v5258_v53, %v6178_v16  ;;  %v1142_v5 = vpop.f32.mrf.mxu0  ;;  %v4598_v1 = vunpack.i.h.bf16 %v6073_v8 }
 0x31e   : > { %2748 = vperm.xlu1 %4747, %v2642_v27   ;;  %v3731_v39 = vsel %vm496_vm10, 1.0, %v7737_v10  ;;  %v3667_v27 = vsel %vm432_vm0, 1.0, %v7737_v10  ;;  %v6243_v8 = vadd.f32 %v1351_v57, %v1142_v5  ;;  %vm504_vm10 = vcmp.eq.s32.totalorder %v5322_v12, %v6178_v16  ;;  %v7739_v5 = vld [vmem:[#allocation21_spill] sm:$0xff] }
 0x31f   : > { %v6263_v12 = vadd.f32 %v6161_v40, %v6167_v45 }
 0x320   : > { %v2271_v59 = vpop.permute.xlu2 %2270 }
 0x321   : > { %v2451_v36 = vadd.f32 %v2271_v59, %v6219_v14  ;;  %v4642_v59 = vpack.i.bf16 %v3731_v39, %v3667_v27  ;;  %v1354_v39 = vpop.f32.mrf.mxu1  ;;  %v3739_v27 = vsel %vm504_vm10, 1.0, %v7737_v10 }
 0x322   : > { %2108 = vmatmul.f32.gmra.mxu2 %v4593_v49 }
 0x323   : > { %v2579_v15 = vmul.f32 0.01, %v2451_v36  ;;  %vm2515_vm5 = vcmp.ge.f32.partialorder %v2451_v36, 0.0 }
 0x324   : > { %4641 = vxpose.xlu2.b32.cont [4/16] %v4640_v60, 128 }
 0x325   : > { %v2643_v38 = vsel %vm2515_vm5, %v2451_v36, %v2579_v15  ;;  %v6236_v43 = vpop.f32.mrf.mxu2  ;;  %vm436_vm5 = vcmp.eq.s32.totalorder %v7738_v28, %v6178_v16 }
 0x326   : > { %2753 = vperm.xlu0 %4746, %v2643_v38   ;;  %v3671_v15 = vsel %vm436_vm5, 1.0, %v7737_v10  ;;  %v1145_v38 = vpop.f32.mrf.mxu0  ;;  %vm508_vm5 = vcmp.eq.s32.totalorder %v5264_v58, %v6178_v16  ;;  %v4613_v58 = vunpack.i.h.bf16 %v6082_v41 }
 0x327   : > { %v4644_v13 = vpack.i.bf16 %v3735_v31, %v3671_v15  ;;  %v6255_v52 = vadd.f32 %v1354_v39, %v1145_v38  ;;  %v7740_v38 = vld [vmem:[#allocation20_spill] sm:$0xff]  ;;  %v3743_v45 = vsel %vm508_vm5, 1.0, %v7737_v10  ;;  %vm448_vm5 = vcmp.eq.s32.totalorder %v5213_v17, %v6178_v16 }
 0x328   : > { %v2273_v26 = vpop.permute.xlu2 %2272  ;;  %v6306_v17 = vadd.f32 %v6124_v18, %v6126_v20 }
 0x329   : > { %v2452_v53 = vadd.f32 %v2273_v26, %v6231_v44 }
 0x32a   : > { %2111 = vmatmul.f32.gmra.mxu2 %v4598_v1 }
 0x32b   : > { %v2580_v49 = vmul.f32 0.01, %v2452_v53  ;;  %vm2516_vm9 = vcmp.ge.f32.partialorder %v2452_v53, 0.0 }
 0x32c   : > { %4643 = vxpose.xlu2.b32.cont [5/16] %v4642_v59, 128  ;;  %v4608_v59 = vunpack.i.h.bf16 %v6079_v61  ;;  %v2448_v61 = vadd.f32 %v6187_v47, %v6263_v12 }
 0x32d   : > { %v2644_v7 = vsel %vm2516_vm9, %v2452_v53, %v2580_v49  ;;  %v6249_v26 = vpop.f32.mrf.mxu2  ;;  %vm440_vm9 = vcmp.eq.s32.totalorder %v7739_v5, %v6178_v16  ;;  %v6281_v5 = vadd.f32 %v6131_v50, %v6133_v34  ;;  %v3683_v50 = vsel %vm448_vm5, 1.0, %v7737_v10 }
 0x32e   : > { %2758 = vperm.xlu1 %4747, %v2644_v7   ;;  %v3675_v7 = vsel %vm440_vm9, 1.0, %v7737_v10  ;;  %vm2512_vm10 = vcmp.ge.f32.partialorder %v2448_v61, 0.0 }
 0x32f   : > { %v4646_v28 = vpack.i.bf16 %v3739_v27, %v3675_v7  ;;  %v6285_v27 = vadd.f32 %v6146_v9, %v6150_v35  ;;  %v2445_v41 = vadd.f32 %v6158_v48, %v6281_v5 }
 0x330   : > { %v2275_v36 = vpop.permute.xlu2 %2274 }
 0x331   : > { %v2453_v60 = vadd.f32 %v2275_v36, %v6243_v8  ;;  %v1148_v36 = vpop.f32.mrf.mxu0  ;;  %v2573_v9 = vmul.f32 0.01, %v2445_v41 }
 0x332   : > { %2114 = vmatmul.f32.gmra.mxu2 %v4603_v4  ;;  %v1357_v4 = vpop.f32.mrf.mxu1 }
 0x333   : > { %v2581_v1 = vmul.f32 0.01, %v2453_v60  ;;  %vm2517_vm0 = vcmp.ge.f32.partialorder %v2453_v60, 0.0  ;;  %v6273_v40 = vadd.f32 %v1357_v4, %v1148_v36 }
 0x334   : > { %4645 = vxpose.xlu2.b32.cont [6/16] %v4644_v13, 128 }
 0x335   : > { %v2645_v57 = vsel %vm2517_vm0, %v2453_v60, %v2581_v1  ;;  %v6269_v60 = vpop.f32.mrf.mxu2  ;;  %vm444_vm0 = vcmp.eq.s32.totalorder %v7740_v38, %v6178_v16  ;;  %v6331_v38 = vadd.f32 %v6113_v56, %v6116_v23 }
 0x336   : > { %2763 = vperm.xlu1 %4747, %v2645_v57   ;;  %v3679_v1 = vsel %vm444_vm0, 1.0, %v7737_v10  ;;  %v2576_v57 = vmul.f32 0.01, %v2448_v61  ;;  %vm2509_vm0 = vcmp.ge.f32.partialorder %v2445_v41, 0.0 }
 0x337   : > { %v4648_v47 = vpack.i.bf16 %v3743_v45, %v3679_v1  ;;  %v2637_v36 = vsel %vm2509_vm0, %v2445_v41, %v2573_v9  ;;  %v2442_v45 = vadd.f32 %v6143_v3, %v6331_v38  ;;  %v7741_v1 = vld [vmem:[#allocation52_spill] sm:$0xff] }
 0x338   : > { %v2277_v53 = vpop.permute.xlu2 %2276 }
 0x339   : > { %v2454_v49 = vadd.f32 %v2277_v53, %v6255_v52 }
 0x33a   : > { %2117 = vmatmul.f32.gmra.mxu2 %v4608_v59  ;;  %v2447_v59 = vadd.f32 %v6174_v51, %v6285_v27  ;;  %v6302_v51 = vadd.f32 %v6119_v30, %v6121_v63  ;;  %v6316_v30 = vpop.f32.mrf.mxu0  ;;  %v6319_v63 = vpop.f32.mrf.mxu1 }
 0x33b   : > { %v2582_v31 = vmul.f32 0.01, %v2454_v49  ;;  %vm2518_vm3 = vcmp.ge.f32.partialorder %v2454_v49, 0.0 }
 0x33c   : > { %4647 = vxpose.xlu2.b32.cont [7/16] %v4646_v28, 128  ;;  %v2575_v48 = vmul.f32 0.01, %v2447_v59 }
 0x33d   : > { %v2646_v15 = vsel %vm2518_vm3, %v2454_v49, %v2582_v31  ;;  %vm512_vm3 = vcmp.eq.s32.totalorder %v5354_v22, %v6178_v16  ;;  %v2640_v49 = vsel %vm2512_vm10, %v2448_v61, %v2576_v57  ;;  %v6295_v35 = vpop.f32.mrf.mxu2  ;;  %v4618_v22 = vunpack.i.h.bf16 %v6085_v46 }
 0x33e   : > { %2768 = vperm.xlu1 %4747, %v2646_v15   ;;  %v3747_v34 = vsel %vm512_vm3, 1.0, %v7737_v10  ;;  %vm2511_vm10 = vcmp.ge.f32.partialorder %v2447_v59, 0.0  ;;  %v2443_v46 = vadd.f32 %v6148_v37, %v6302_v51  ;;  %v2444_v31 = vadd.f32 %v6153_v19, %v6306_v17 }
 0x33f   : > { %v4650_v28 = vpack.i.bf16 %v3747_v34, %v3683_v50  ;;  %v2639_v4 = vsel %vm2511_vm10, %v2447_v59, %v2575_v48  ;;  %vm452_vm3 = vcmp.eq.s32.totalorder %v5262_v55, %v6178_v16  ;;  %v6327_v55 = vadd.f32 %v6108_v32, %v6110_v24 }
 0x340   : > { %v2279_v39 = vpop.permute.xlu2 %2278  ;;  %v3687_v37 = vsel %vm452_vm3, 1.0, %v7737_v10  ;;  %v2571_v19 = vmul.f32 0.01, %v2443_v46  ;;  %v2572_v61 = vmul.f32 0.01, %v2444_v31  ;;  %vm2507_vm5 = vcmp.ge.f32.partialorder %v2443_v46, 0.0 }
 0x341   : > { %v2455_v13 = vadd.f32 %v2279_v39, %v6273_v40  ;;  %vm2508_vm0 = vcmp.ge.f32.partialorder %v2444_v31, 0.0  ;;  %vm520_vm10 = vcmp.eq.s32.totalorder %v5273_v62, %v6178_v16  ;;  %v4628_v24 = vunpack.i.h.bf16 %v6091_v33  ;;  %v7745_v33 = vld [vmem:[#allocation53_spill] sm:$0xff] }
 0x342   : > { %2120 = vmatmul.f32.gmra.mxu2 %v4613_v58  ;;  %v2635_v39 = vsel %vm2507_vm5, %v2443_v46, %v2571_v19  ;;  %v2636_v58 = vsel %vm2508_vm0, %v2444_v31, %v2572_v61  ;;  %v3755_v32 = vsel %vm520_vm10, 1.0, %v7737_v10  ;;  %v6343_v56 = vpop.f32.mrf.mxu0  ;;  %vm2506_vm5 = vcmp.ge.f32.partialorder %v2442_v45, 0.0 }
 0x343   : > { %v2583_v53 = vmul.f32 0.01, %v2455_v13  ;;  %vm2519_vm9 = vcmp.ge.f32.partialorder %v2455_v13, 0.0 }
 0x344   : > { %4649 = vxpose.xlu2.b32.cont [8/16] %v4648_v47, 128 }
 0x345   : > { %v2647_v7 = vsel %vm2519_vm9, %v2455_v13, %v2583_v53  ;;  %vm516_vm9 = vcmp.eq.s32.totalorder %v5352_v21, %v6178_v16  ;;  %v4623_v21 = vunpack.i.h.bf16 %v6088_v42  ;;  %v6322_v18 = vpop.f32.mrf.mxu2  ;;  %v2441_v42 = vadd.f32 %v6136_v6, %v6327_v55  ;;  %v6346_v13 = vpop.f32.mrf.mxu1  ;;  %v7744_v53 = vld [vmem:[#allocation32_spill] sm:$0xff] }
 0x346   : > { %2738 = vperm.xlu1 %4747, %v2640_v49   ;;  %2773 = vperm.xlu0 %4746, %v2647_v7   ;;  %v3751_v20 = vsel %vm516_vm9, 1.0, %v7737_v10  ;;  %vm456_vm9 = vcmp.eq.s32.totalorder %v5260_v54, %v6178_v16  ;;  %v2570_v6 = vmul.f32 0.01, %v2442_v45  ;;  %v7742_v54 = vld [vmem:[#allocation51_spill] sm:$0xff]  ;;  %vm524_vm0 = vcmp.eq.s32.totalorder %v7744_v53, %v6178_v16  ;;  %v7746_v7 = vld [vmem:[#allocation18_spill] sm:$0xff]  ;;  %v7754_v53 = vld [vmem:[#allocation44_spill] sm:$0xff] }
 0x347   : > { %v4652_v15 = vpack.i.bf16 %v3751_v20, %v3687_v37  ;;  %v3691_v62 = vsel %vm456_vm9, 1.0, %v7737_v10  ;;  %v2569_v23 = vmul.f32 0.01, %v2441_v42  ;;  %vm2505_vm3 = vcmp.ge.f32.partialorder %v2441_v42, 0.0 }
 0x348   : > { %v4654_v3 = vpack.i.bf16 %v3755_v32, %v3691_v62  ;;  %v6350_v57 = vadd.f32 %v7742_v54, %v7741_v1  ;;  %v2634_v49 = vsel %vm2506_vm5, %v2442_v45, %v2570_v6  ;;  %vm460_vm10 = vcmp.eq.s32.totalorder %v7746_v7, %v6178_v16  ;;  %v7752_v62 = vld [vmem:[#allocation48_spill] sm:$0xff]  ;;  %v7753_v6 = vld [vmem:[#allocation19_spill] sm:$0xff] }
 0x349   : > { %v2633_v59 = vsel %vm2505_vm3, %v2441_v42, %v2569_v23  ;;  %v3759_v34 = vsel %vm524_vm0, 1.0, %v7737_v10  ;;  %v3695_v9 = vsel %vm460_vm10, 1.0, %v7737_v10 }
 0x34a   : > { %2123 = vmatmul.f32.gmra.mxu2 %v4618_v22  ;;  %7743 = vst [vmem:[#allocation17_spill] sm:$0xff] %v6350_v57  ;;  %v2440_v41 = vadd.f32 %v7745_v33, %v6350_v57  ;;  %v7747_v22 = vld [vmem:[#allocation50_spill] sm:$0xff]  ;;  %v6361_v46 = vpop.f32.mrf.mxu0  ;;  %v7755_v33 = vld [vmem:[#allocation24_spill] sm:$0xff] }
 0x34b   : > { %v4633_v50 = vunpack.i.h.bf16 %v7747_v22  ;;  %v7758_v22 = vld [vmem:[#allocation60_spill] sm:$0xff] }
 0x34c   : > { %4651 = vxpose.xlu2.b32.cont [9/16] %v4650_v28, 128  ;;  %v2568_v48 = vmul.f32 0.01, %v2440_v41  ;;  %v4656_v28 = vpack.i.bf16 %v3759_v34, %v3695_v9  ;;  %vm2504_vm9 = vcmp.ge.f32.partialorder %v2440_v41, 0.0 }
 0x34d   : > { %v2076_v47 = vpop.f32.mrf.mxu2  ;;  %v6363_v31 = vpop.f32.mrf.mxu1 }
 0x34e   : > { %2723 = vperm.xlu1 %4747, %v2637_v36   ;;  %2733 = vperm.xlu0 %4746, %v2639_v4   ;;  %v7748_v36 = vld [vmem:[#allocation31_spill] sm:$0xff]  ;;  %v2632_v20 = vsel %vm2504_vm9, %v2440_v41, %v2568_v48  ;;  %vm536_vm9 = vcmp.eq.s32.totalorder %v7752_v62, %v6178_v16 }
 0x34f   : > { %vm528_vm3 = vcmp.eq.s32.totalorder %v7748_v36, %v6178_v16  ;;  %v7759_v48 = vld [vmem:[#allocation59_spill] sm:$0xff] }
 0x350   : > { %v3763_v37 = vsel %vm528_vm3, 1.0, %v7737_v10  ;;  %vm472_vm3 = vcmp.eq.s32.totalorder %v7753_v6, %v6178_v16 }
 0x351   : > { %v3707_v54 = vsel %vm472_vm3, 1.0, %v7737_v10 }
 0x352   : > { %2126 = vmatmul.f32.gmra.mxu2 %v4623_v21  ;;  %v7749_v21 = vld [vmem:[#allocation23_spill] sm:$0xff]  ;;  %v6374_v42 = vpop.f32.mrf.mxu0 }
 0x353   : > { %vm464_vm5 = vcmp.eq.s32.totalorder %v7749_v21, %v6178_v16 }
 0x354   : > { %4653 = vxpose.xlu2.b32.cont [10/16] %v4652_v15, 128  ;;  %v3699_v19 = vsel %vm464_vm5, 1.0, %v7737_v10  ;;  %v7750_v15 = vld [vmem:[#allocation42_spill] sm:$0xff]  ;;  %vm540_vm5 = vcmp.eq.s32.totalorder %v7754_v53, %v6178_v16  ;;  %v3080_v53 = vlaneseq }
 0x355   : > { %v2079_v4 = vpop.f32.mrf.mxu2  ;;  %v4658_v61 = vpack.i.bf16 %v3763_v37, %v3699_v19  ;;  %vm532_vm0 = vcmp.eq.s32.totalorder %v7750_v15, %v6178_v16  ;;  %v6376_v45 = vpop.f32.mrf.mxu1 }
 0x356   : > { %2713 = vperm.xlu1 %4747, %v2635_v39   ;;  %2718 = vperm.xlu0 %4746, %v2636_v58   ;;  %v7751_v39 = vld [vmem:[#allocation22_spill] sm:$0xff]  ;;  %v3767_v58 = vsel %vm532_vm0, 1.0, %v7737_v10  ;;  %vm476_vm0 = vcmp.eq.s32.totalorder %v7755_v33, %v6178_v16 }
 0x357   : > { %vm468_vm10 = vcmp.eq.s32.totalorder %v7751_v39, %v6178_v16 }
 0x358   : > { %v3703_v32 = vsel %vm468_vm10, 1.0, %v7737_v10 }
 0x35a   : > { %2129 = vmatmul.f32.gmra.mxu2 %v4628_v24  ;;  %v4660_v24 = vpack.i.bf16 %v3767_v58, %v3703_v32 }
 0x35c   : > { %4655 = vxpose.xlu2.b32.cont [11/16] %v4654_v3, 128  ;;  %v3771_v3 = vsel %vm536_vm9, 1.0, %v7737_v10 }
 0x35d   : > { %v2082_v23 = vpop.f32.mrf.mxu2  ;;  %v6396_v1 = vpop.f32.mrf.mxu1 }
 0x35e   : > { %2703 = vperm.xlu1 %4747, %v2633_v59   ;;  %2708 = vperm.xlu0 %4746, %v2634_v49   ;;  %v3711_v59 = vsel %vm476_vm0, 1.0, %v7737_v10 }
 0x362   : > { %2132 = vmatmul.f32.gmra.mxu2 %v4633_v50 }
 0x364   : > { %4657 = vxpose.xlu2.b32.cont [12/16] %v4656_v28, 128 }
 0x365   : > { %v6411_v49 = vpop.f32.mrf.mxu1 }
 0x366   : > { %2698 = vperm.xlu0 %4746, %v2632_v20   ;;  %2306 = vrot.lane.b32.xlu1 %v2079_v4, %s4946_s5  ;;  %v7761_v20 = vld [vmem:[#allocation56_spill] sm:$0xff] }
 0x36a   : > { %4131 = vmatmul.lmr.bf16.gmra.16.mxu2 }
 0x36c   : > { %4659 = vxpose.xlu2.b32.cont [13/16] %v4658_v61, 128 }
 0x36e   : > { %2304 = vrot.lane.b32.xlu0 %v2076_v47, %s4946_s5  ;;  %2302 = vrot.lane.b32.xlu1 %v6322_v18, %s4946_s5  ;;  %v6393_v18 = vpop.f32.mrf.mxu0  ;;  %v4662_v47 = vpack.i.bf16 %v3771_v3, %v3707_v54 }
 0x372   : > { %4132 = vmatmul.lmr.bf16.gmra.16.mxu2 }
 0x374   : > { %4661 = vxpose.xlu2.b32.cont [14/16] %v4660_v24, 128 }
 0x376   : > { %2300 = vrot.lane.b32.xlu0 %v6295_v35, %s4946_s5  ;;  %2298 = vrot.lane.b32.xlu1 %v6269_v60, %s4946_s5  ;;  %v2085_v60 = vpop.f32.mrf.mxu2  ;;  %v3775_v35 = vsel %vm540_vm5, 1.0, %v7737_v10  ;;  %v6408_v41 = vpop.f32.mrf.mxu0 }
 0x377   : > { %v4664_v7 = vpack.i.bf16 %v3775_v35, %v3711_v59 }
 0x37a   : > { %4133 = vmatmul.lmr.bf16.gmra.16.mxu2 }
 0x37c   : > { %4663 = vxpose.xlu2.b32.cont [15/16] %v4662_v47, 128 }
 0x37e   : > { %2296 = vrot.lane.b32.xlu0 %v6249_v26, %s4946_s5  ;;  %2294 = vrot.lane.b32.xlu1 %v6236_v43, %s4946_s5  ;;  %v6416_v16 = vpop.f32.mrf.mxu2  ;;  %v6418_v43 = vpop.f32.mrf.mxu0 }
 0x37f   : > { %7756 = vst [vmem:[#allocation21_spill] sm:$0xff] %v6416_v16  ;;  %v6420_v26 = vpop.f32.mrf.mxu1 }
 0x382   : > { %4134 = vmatmul.lmr.bf16.gmra.16.mxu2 }
 0x384   : > { %4665 = vxpose.xlu2.b32.end [16/16] %v4664_v7, 128 }
 0x386   : > { %2292 = vrot.lane.b32.xlu0 %v6221_v25, %s4946_s5  ;;  %2310 = vrot.lane.b32.xlu1 %v2085_v60, %s4946_s5  ;;  %v6425_v10 = vpop.f32.mrf.mxu2  ;;  %v6427_v34 = vpop.f32.mrf.mxu0 }
 0x387   : > { %7757 = vst [vmem:[#allocation20_spill] sm:$0xff] %v6425_v10  ;;  %v6429_v25 = vpop.f32.mrf.mxu1 }
 0x388   : > { %v2744_v61 = vpop.permute.xlu0 %2743 }
 0x38a   : > { %4135 = vmatmul.lmr.bf16.gmra.16.mxu2 }
 0x38e   : > { %2308 = vrot.lane.b32.xlu0 %v2082_v23, %s4946_s5  ;;  %2290 = vrot.lane.b32.xlu1 %v6205_v11, %s4946_s5  ;;  %v6435_v9 = vpop.f32.mrf.mxu2  ;;  %v7760_v11 = vld [vmem:[#allocation57_spill] sm:$0xff]  ;;  %v6441_v28 = vpop.f32.mrf.mxu0 }
 0x38f   : > { %v6443_v36 = vpop.f32.mrf.mxu1 }
 0x390   : > { %v2749_v50 = vpop.permute.xlu1 %2748 }
 0x392   : > { %4136 = vmatmul.lmr.bf16.gmra.16.mxu2 }
 0x396   : > { %2288 = vrot.lane.b32.xlu0 %v6193_v0, %s4946_s5  ;;  %2286 = vrot.lane.b32.xlu1 %v7758_v22, %s4946_s5  ;;  %v6447_v19 = vpop.f32.mrf.mxu2  ;;  %v6449_v39 = vpop.f32.mrf.mxu0 }
 0x397   : > { %v6451_v58 = vpop.f32.mrf.mxu1 }
 0x398   : > { %v2754_v23 = vpop.permute.xlu0 %2753 }
 0x39a   : > { %4137 = vmatmul.lmr.bf16.gmra.16.mxu2 }
 0x39e   : > { %2284 = vrot.lane.b32.xlu0 %v7759_v48, %s4946_s5  ;;  %2282 = vrot.lane.b32.xlu1 %v7760_v11, %s4946_s5  ;;  %v6453_v3 = vpop.f32.mrf.mxu2  ;;  %v6455_v54 = vpop.f32.mrf.mxu0  ;;  %v6460_v48 = vand.u32 127, %v3080_v53 }
 0x39f   : > { %v6457_v47 = vpop.f32.mrf.mxu1 }
 0x3a0   : > { %v2759_v4 = vpop.permute.xlu1 %2758  ;;  %vm3082_vm10 = vcmp.lt.s32.totalorder %v6460_v48, 32 }
 0x3a2   : > { %4138 = vmatmul.lmr.bf16.gmra.16.mxu2 }
 0x3a5   : > { %v4666_v0 = vpop.trf.xlu2 }
 0x3a6   : > { %2280 = vrot.lane.b32.xlu0 %v7761_v20, %s4946_s5  ;;  %v4667_v21 = vunpack.i.l.bf16 %v4666_v0  ;;  %v4670_v37 = vunpack.i.h.bf16 %v4666_v0  ;;  %v3028_v20 = vmul.f32 %v2759_v4, %v6231_v44  ;;  %v3026_v4 = vmul.f32 %v2749_v50, %v6209_v2 }
 0x3a8   : > { %v2764_v15 = vpop.permute.xlu1 %2763  ;;  %1198 = vmatmul.f32.gmra.mxu0 %v4667_v21  ;;  %1407 = vmatmul.f32.gmra.mxu1 %v4670_v37  ;;  %v3095_v53 = vand.u32 2147483647, %v3028_v20 }
 0x3a9   : > { %v3029_v11 = vmul.f32 %v2764_v15, %v6243_v8  ;;  %v6473_v15 = vpop.f32.mrf.mxu1 }
 0x3aa   : > { %4139 = vmatmul.lmr.bf16.gmra.16.mxu2  ;;  %v3161_v50 = vsel %vm3082_vm10, %v3028_v20, %v3095_v53 }
 0x3ad   : > { %v4671_v32 = vpop.trf.xlu2 }
 0x3ae   : > { %v4672_v24 = vunpack.i.l.bf16 %v4671_v32  ;;  %v4675_v62 = vunpack.i.h.bf16 %v4671_v32  ;;  %v6465_v32 = vpop.f32.mrf.mxu2 }
 0x3b0   : > { %v2769_v6 = vpop.permute.xlu1 %2768  ;;  %1201 = vmatmul.f32.gmra.mxu0 %v4672_v24  ;;  %1410 = vmatmul.f32.gmra.mxu1 %v4675_v62  ;;  %v3027_v24 = vmul.f32 %v2754_v23, %v6219_v14  ;;  %v3096_v62 = vand.u32 2147483647, %v3029_v11  ;;  %v3025_v23 = vmul.f32 %v2744_v61, %v6197_v29 }
 0x3b1   : > { %v3030_v59 = vmul.f32 %v2769_v6, %v6255_v52  ;;  %v6468_v52 = vpop.f32.mrf.mxu0 }
 0x3b2   : > { %4140 = vmatmul.lmr.bf16.gmra.16.mxu2 }
 0x3b3   : > { %v3097_v21 = vand.u32 2147483647, %v3030_v59 }
 0x3b5   : > { %v4676_v33 = vpop.trf.xlu2 }
 0x3b6   : > { %v4677_v60 = vunpack.i.l.bf16 %v4676_v33  ;;  %v4680_v35 = vunpack.i.h.bf16 %v4676_v33  ;;  %v3163_v33 = vsel %vm3082_vm10, %v3030_v59, %v3097_v21  ;;  %v3092_v59 = vand.u32 2147483647, %v3025_v23  ;;  %v6489_v61 = vpop.f32.mrf.mxu2 }
 0x3b8   : > { %v2739_v7 = vpop.permute.xlu1 %2738  ;;  %v2774_v22 = vpop.permute.xlu0 %2773  ;;  %1204 = vmatmul.f32.gmra.mxu0 %v4677_v60  ;;  %1413 = vmatmul.f32.gmra.mxu1 %v4680_v35  ;;  %v3094_v35 = vand.u32 2147483647, %v3027_v24 }
 0x3b9   : > { %v3031_v0 = vmul.f32 %v2774_v22, %v6273_v40  ;;  %v3162_v22 = vsel %vm3082_vm10, %v3029_v11, %v3096_v62  ;;  %v3024_v2 = vmul.f32 %v2739_v7, %v6263_v12  ;;  %v1187_v7 = vpop.f32.mrf.mxu0 }
 0x3ba   : > { %4141 = vmatmul.lmr.bf16.gmra.16.mxu2  ;;  %v3160_v29 = vsel %vm3082_vm10, %v3027_v24, %v3094_v35  ;;  %v3158_v24 = vsel %vm3082_vm10, %v3025_v23, %v3092_v59 }
 0x3bb   : > { %v3098_v37 = vand.u32 2147483647, %v3031_v0 }
 0x3bd   : > { %v4681_v6 = vpop.trf.xlu2  ;;  %v3164_v8 = vsel %vm3082_vm10, %v3031_v0, %v3098_v37  ;;  %v3093_v0 = vand.u32 2147483647, %v3026_v4 }
 0x3be   : > { %3229 = vmatpush.msra.mxu3 %v3164_v8  ;;  %v4682_v40 = vunpack.i.l.bf16 %v4681_v6  ;;  %v4685_v44 = vunpack.i.h.bf16 %v4681_v6  ;;  %v3091_v6 = vand.u32 2147483647, %v3024_v2  ;;  %v1396_v8 = vpop.f32.mrf.mxu1 }
 0x3bf   : > { %v3159_v12 = vsel %vm3082_vm10, %v3026_v4, %v3093_v0  ;;  %v6507_v0 = vpop.f32.mrf.mxu2 }
 0x3c0   : > { %v6478_v60 = vpop.permute.xlu1 %2723  ;;  %3230 = vmatpush.msra.mxu3 %v3163_v33  ;;  %v2734_v14 = vpop.permute.xlu0 %2733  ;;  %1207 = vmatmul.f32.gmra.mxu0 %v4682_v40 }
 0x3c1   : > { %1416 = vmatmul.f32.gmra.mxu1 %v4685_v44  ;;  %v3023_v21 = vmul.f32 %v2734_v14, %v6285_v27  ;;  %v3157_v44 = vsel %vm3082_vm10, %v3024_v2, %v3091_v6  ;;  %v1190_v23 = vpop.f32.mrf.mxu0 }
 0x3c2   : > { %3231 = vmatpush.msra.mxu3 %v3162_v22  ;;  %4142 = vmatmul.lmr.bf16.gmra.16.mxu2 }
 0x3c3   : > { %v3090_v27 = vand.u32 2147483647, %v3023_v21 }
 0x3c4   : > { %3232 = vmatpush.msra.mxu3 %v3161_v50 }
 0x3c5   : > { %v4686_v37 = vpop.trf.xlu2  ;;  %v3156_v53 = vsel %vm3082_vm10, %v3023_v21, %v3090_v27  ;;  %v6516_v27 = vadd.f32 %v1396_v8, %v1187_v7  ;;  %v7767_v7 = vld [vmem:[#allocation58_spill] sm:$0xff] }
 0x3c6   : > { %3233 = vmatpush.msra.mxu3 %v3160_v29  ;;  %v4687_v11 = vunpack.i.l.bf16 %v4686_v37  ;;  %v4690_v62 = vunpack.i.h.bf16 %v4686_v37  ;;  %v1399_v50 = vpop.f32.mrf.mxu1 }
 0x3c7   : > { %v6509_v59 = vadd.f32 %v1399_v50, %v1190_v23  ;;  %7764 = vst [vmem:[#allocation32_spill] sm:$0xff] %v6516_v27  ;;  %v7765_v50 = vld [vmem:[#allocation55_spill] sm:$0xff] }
 0x3c8   : > { %v6493_v20 = vpop.permute.xlu1 %2713  ;;  %3234 = vmatpush.msra.mxu3 %v3159_v12  ;;  %v6495_v40 = vpop.permute.xlu0 %2718  ;;  %1210 = vmatmul.f32.gmra.mxu0 %v4687_v11 }
 0x3c9   : > { %1419 = vmatmul.f32.gmra.mxu1 %v4690_v62  ;;  %7762 = vst [vmem:[#allocation52_spill] sm:$0xff] %v6509_v59  ;;  %v6514_v12 = vpop.f32.mrf.mxu2 }
 0x3ca   : > { %3235 = vmatpush.msra.mxu3 %v3158_v24  ;;  %4143 = vmatmul.lmr.bf16.gmra.16.mxu2 }
 0x3cc   : > { %3236 = vmatpush.msra.mxu3 %v3157_v44 }
 0x3cd   : > { %v4691_v4 = vpop.trf.xlu2 }
 0x3ce   : > { %3237 = vmatpush.msra.mxu3 %v3156_v53  ;;  %v4692_v33 = vunpack.i.l.bf16 %v4691_v4  ;;  %v4695_v14 = vunpack.i.h.bf16 %v4691_v4 }
 0x3d0   : > { %v6503_v35 = vpop.permute.xlu1 %2703  ;;  %v6505_v22 = vpop.permute.xlu0 %2708  ;;  %1213 = vmatmul.f32.gmra.mxu0 %v4692_v33 }
 0x3d1   : > { %1422 = vmatmul.f32.gmra.mxu1 %v4695_v14 }
 0x3d2   : > { %4144 = vmatmul.lmr.bf16.gmra.16.mxu2 }
 0x3d5   : > { %v4696_v2 = vpop.trf.xlu2 }
 0x3d6   : > { %v4697_v37 = vunpack.i.l.bf16 %v4696_v2  ;;  %v4700_v29 = vunpack.i.h.bf16 %v4696_v2  ;;  %v7766_v2 = vld [vmem:[#allocation54_spill] sm:$0xff] }
 0x3d8   : > { %v6511_v21 = vpop.permute.xlu0 %2698  ;;  %1216 = vmatmul.f32.gmra.mxu0 %v4697_v37  ;;  %v2307_v11 = vpop.permute.xlu1 %2306  ;;  %v6521_v37 = vadd.f32 %v7766_v2, %v7765_v50 }
 0x3d9   : > { %7763 = vst [vmem:[#allocation51_spill] sm:$0xff] %v6511_v21  ;;  %1425 = vmatmul.f32.gmra.mxu1 %v4700_v29  ;;  %v2469_v62 = vadd.f32 %v2307_v11, %v6509_v59 }
 0x3da   : > { %4145 = vmatmul.lmr.bf16.gmra.16.mxu2  ;;  %v2446_v8 = vadd.f32 %v7767_v7, %v6521_v37  ;;  %v6530_v7 = vadd.f32 %v6457_v47, %v6455_v54 }
 0x3db   : > { %vm2533_vm9 = vcmp.ge.f32.partialorder %v2469_v62, 0.0  ;;  %v2597_v6 = vmul.f32 0.01, %v2469_v62 }
 0x3dc   : > { %vm2510_vm5 = vcmp.ge.f32.partialorder %v2446_v8, 0.0  ;;  %7769 = vst [vmem:[#allocation53_spill] sm:$0xff] %v6530_v7 }
 0x3dd   : > { %v4701_v24 = vpop.trf.xlu2  ;;  %v2661_v44 = vsel %vm2533_vm9, %v2469_v62, %v2597_v6  ;;  %v6525_v6 = vpop.f32.mrf.mxu2 }
 0x3de   : > { %2843 = vperm.xlu1 %4747, %v2661_v44   ;;  %v4702_v4 = vunpack.i.l.bf16 %v4701_v24  ;;  %v4705_v53 = vunpack.i.h.bf16 %v4701_v24 }
 0x3e0   : > { %1219 = vmatmul.f32.gmra.mxu0 %v4702_v4  ;;  %v2305_v33 = vpop.permute.xlu0 %2304  ;;  %v2303_v14 = vpop.permute.xlu1 %2302  ;;  %v7768_v4 = vmov 64  }
 0x3e1   : > { %1428 = vmatmul.f32.gmra.mxu1 %v4705_v53  ;;  %v2468_v23 = vadd.f32 %v2305_v33, %v6516_v27  ;;  %v1193_v53 = vpop.f32.mrf.mxu0  ;;  %v1402_v33 = vpop.f32.mrf.mxu1  ;;  %v2574_v27 = vmul.f32 0.01, %v2446_v8 }
 0x3e2   : > { %4146 = vmatmul.lmr.bf16.gmra.16.mxu2 }
 0x3e3   : > { %vm2532_vm3 = vcmp.ge.f32.partialorder %v2468_v23, 0.0  ;;  %v2596_v29 = vmul.f32 0.01, %v2468_v23 }
 0x3e5   : > { %v4706_v11 = vpop.trf.xlu2  ;;  %v2660_v62 = vsel %vm2532_vm3, %v2468_v23, %v2596_v29  ;;  %v2638_v29 = vsel %vm2510_vm5, %v2446_v8, %v2574_v27 }
 0x3e6   : > { %2838 = vperm.xlu0 %4746, %v2660_v62   ;;  %v4707_v24 = vunpack.i.l.bf16 %v4706_v11  ;;  %v4710_v44 = vunpack.i.h.bf16 %v4706_v11  ;;  %4748 = vset.pattern.permute.xlu2 %v7768_v4 }
 0x3e8   : > { %1222 = vmatmul.f32.gmra.mxu0 %v4707_v24  ;;  %v2301_v50 = vpop.permute.xlu0 %2300  ;;  %v2299_v2 = vpop.permute.xlu1 %2298 }
 0x3e9   : > { %1431 = vmatmul.f32.gmra.mxu1 %v4710_v44  ;;  %v2466_v23 = vadd.f32 %v2301_v50, %v6530_v7  ;;  %v6533_v24 = vpop.f32.mrf.mxu2  ;;  %v6537_v44 = vadd.f32 %v6429_v25, %v6427_v34  ;;  %v1196_v54 = vpop.f32.mrf.mxu0 }
 0x3ea   : > { %v1405_v47 = vpop.f32.mrf.mxu1 }
 0x3eb   : > { %v2594_v4 = vmul.f32 0.01, %v2466_v23  ;;  %vm2530_vm0 = vcmp.ge.f32.partialorder %v2466_v23, 0.0 }
 0x3ed   : > { %2728 = vperm.xlu2 %4748, %v2638_v29   ;;  %v4711_v62 = vpop.trf.xlu2  ;;  %v2658_v8 = vsel %vm2530_vm0, %v2466_v23, %v2594_v4  ;;  %v6540_v29 = vadd.f32 %v1405_v47, %v1196_v54 }
 0x3ee   : > { %v4712_v11 = vunpack.i.l.bf16 %v4711_v62  ;;  %v4715_v59 = vunpack.i.h.bf16 %v4711_v62 }
 0x3f0   : > { %1225 = vmatmul.f32.gmra.mxu0 %v4712_v11  ;;  %v2297_v21 = vpop.permute.xlu0 %2296  ;;  %v2295_v57 = vpop.permute.xlu1 %2294 }
 0x3f1   : > { %1434 = vmatmul.f32.gmra.mxu1 %v4715_v59  ;;  %v2463_v27 = vadd.f32 %v2295_v57, %v6537_v44  ;;  %v6544_v59 = vadd.f32 %v6473_v15, %v6468_v52  ;;  %v6547_v57 = vpop.f32.mrf.mxu2 }
 0x3f3   : > { %v2591_v7 = vmul.f32 0.01, %v2463_v27  ;;  %vm2527_vm9 = vcmp.ge.f32.partialorder %v2463_v27, 0.0  ;;  %v2467_v4 = vadd.f32 %v2303_v14, %v6544_v59  ;;  %v6559_v14 = vadd.f32 %v6451_v58, %v6449_v39 }
 0x3f5   : > { %v4716_v50 = vpop.trf.xlu2  ;;  %2828 = vperm.xlu2 %4748, %v2658_v8   ;;  %v2655_v23 = vsel %vm2527_vm9, %v2463_v27, %v2591_v7  ;;  %vm2531_vm5 = vcmp.ge.f32.partialorder %v2467_v4, 0.0  ;;  %v6555_v7 = vadd.f32 %v6443_v36, %v6441_v28  ;;  %v6567_v36 = vadd.f32 %v6396_v1, %v6393_v18 }
 0x3f6   : > { %v4717_v62 = vunpack.i.l.bf16 %v4716_v50  ;;  %v4720_v11 = vunpack.i.h.bf16 %v4716_v50 }
 0x3f8   : > { %1228 = vmatmul.f32.gmra.mxu0 %v4717_v62  ;;  %v2293_v16 = vpop.permute.xlu0 %2292  ;;  %v2311_v10 = vpop.permute.xlu1 %2310  ;;  %v6550_v62 = vadd.f32 %v1402_v33, %v1193_v53  ;;  %v2465_v33 = vadd.f32 %v2299_v2, %v6559_v14 }
 0x3f9   : > { %1437 = vmatmul.f32.gmra.mxu1 %v4720_v11  ;;  %v2471_v34 = vadd.f32 %v2311_v10, %v6540_v29  ;;  %v2595_v11 = vmul.f32 0.01, %v2467_v4  ;;  %v6561_v53 = vpop.f32.mrf.mxu2 }
 0x3fa   : > { %vm2529_vm9 = vcmp.ge.f32.partialorder %v2465_v33, 0.0 }
 0x3fb   : > { %vm2535_vm3 = vcmp.ge.f32.partialorder %v2471_v34, 0.0  ;;  %v2599_v25 = vmul.f32 0.01, %v2471_v34 }
 0x3fd   : > { %v4721_v54 = vpop.trf.xlu2  ;;  %2813 = vperm.xlu2 %4748, %v2655_v23   ;;  %v2663_v47 = vsel %vm2535_vm3, %v2471_v34, %v2599_v25  ;;  %v2464_v34 = vadd.f32 %v2297_v21, %v6555_v7  ;;  %v6572_v21 = vadd.f32 %v6420_v26, %v6418_v43 }
 0x3fe   : > { %2853 = vperm.xlu1 %4747, %v2663_v47   ;;  %v4722_v8 = vunpack.i.l.bf16 %v4721_v54  ;;  %v4725_v50 = vunpack.i.h.bf16 %v4721_v54  ;;  %v2659_v54 = vsel %vm2531_vm5, %v2467_v4, %v2595_v11  ;;  %v6576_v4 = vadd.f32 %v6411_v49, %v6408_v41 }
 0x3ff   : > { %vm2528_vm3 = vcmp.ge.f32.partialorder %v2464_v34, 0.0  ;;  %v2462_v1 = vadd.f32 %v2293_v16, %v6572_v21 }
 0x400   : > { %1231 = vmatmul.f32.gmra.mxu0 %v4722_v8  ;;  %v2309_v52 = vpop.permute.xlu0 %2308  ;;  %v2291_v15 = vpop.permute.xlu1 %2290  ;;  %v2593_v8 = vmul.f32 0.01, %v2465_v33 }
 0x401   : > { %1440 = vmatmul.f32.gmra.mxu1 %v4725_v50  ;;  %v2470_v10 = vadd.f32 %v2309_v52, %v6550_v62  ;;  %v2592_v50 = vmul.f32 0.01, %v2464_v34  ;;  %v2461_v52 = vadd.f32 %v2291_v15, %v6576_v4  ;;  %v2127_v41 = vpop.f32.mrf.mxu2  ;;  %v2590_v49 = vmul.f32 0.01, %v2462_v1 }
 0x403   : > { %vm2534_vm0 = vcmp.ge.f32.partialorder %v2470_v10, 0.0  ;;  %v2598_v27 = vmul.f32 0.01, %v2470_v10  ;;  %v2589_v15 = vmul.f32 0.01, %v2461_v52 }
 0x405   : > { %v4726_v25 = vpop.trf.xlu2  ;;  %v2662_v23 = vsel %vm2534_vm0, %v2470_v10, %v2598_v27  ;;  %v2657_v10 = vsel %vm2529_vm9, %v2465_v33, %v2593_v8  ;;  %vm2526_vm0 = vcmp.ge.f32.partialorder %v2462_v1, 0.0  ;;  %vm2525_vm9 = vcmp.ge.f32.partialorder %v2461_v52, 0.0 }
 0x406   : > { %2848 = vperm.xlu0 %4746, %v2662_v23   ;;  %2833 = vperm.xlu1 %4747, %v2659_v54   ;;  %v4727_v47 = vunpack.i.l.bf16 %v4726_v25  ;;  %v4730_v28 = vunpack.i.h.bf16 %v4726_v25  ;;  %v2656_v25 = vsel %vm2528_vm3, %v2464_v34, %v2592_v50  ;;  %v6582_v23 = vadd.f32 %v6346_v13, %v6343_v56 }
 0x407   : > { %v6587_v34 = vadd.f32 %v6363_v31, %v6361_v46  ;;  %v6591_v56 = vadd.f32 %v6376_v45, %v6374_v42  ;;  %v2653_v50 = vsel %vm2525_vm9, %v2461_v52, %v2589_v15 }
 0x408   : > { %1234 = vmatmul.f32.gmra.mxu0 %v4727_v47  ;;  %v2289_v39 = vpop.permute.xlu0 %2288  ;;  %v2287_v58 = vpop.permute.xlu1 %2286  ;;  %v2654_v47 = vsel %vm2526_vm0, %v2462_v1, %v2590_v49 }
 0x409   : > { %1443 = vmatmul.f32.gmra.mxu1 %v4730_v28  ;;  %v2460_v2 = vadd.f32 %v2289_v39, %v6567_v36  ;;  %v2459_v28 = vadd.f32 %v2287_v58, %v6591_v56  ;;  %v2130_v42 = vpop.f32.mrf.mxu2  ;;  %v6597_v58 = vadd.f32 %v6319_v63, %v6316_v30 }
 0x40b   : > { %vm2524_vm5 = vcmp.ge.f32.partialorder %v2460_v2, 0.0  ;;  %v2588_v18 = vmul.f32 0.01, %v2460_v2  ;;  %v2587_v46 = vmul.f32 0.01, %v2459_v28 }
 0x40d   : > { %v4731_v11 = vpop.trf.xlu2  ;;  %v2652_v27 = vsel %vm2524_vm5, %v2460_v2, %v2588_v18  ;;  %vm2523_vm5 = vcmp.ge.f32.partialorder %v2459_v28, 0.0 }
 0x40e   : > { %2823 = vperm.xlu0 %4746, %v2657_v10   ;;  %2798 = vperm.xlu2 %4748, %v2652_v27   ;;  %v4732_v43 = vunpack.i.l.bf16 %v4731_v11  ;;  %v4735_v26 = vunpack.i.h.bf16 %v4731_v11  ;;  %v2651_v27 = vsel %vm2523_vm5, %v2459_v28, %v2587_v46 }
 0x40f   : > { %2818 = vperm.xlu1 %4747, %v2656_v25  }
 0x410   : > { %1237 = vmatmul.f32.gmra.mxu0 %v4732_v43  ;;  %v2285_v54 = vpop.permute.xlu0 %2284  ;;  %v2283_v16 = vpop.permute.xlu1 %2282 }
 0x411   : > { %1446 = vmatmul.f32.gmra.mxu1 %v4735_v26  ;;  %v2457_v33 = vadd.f32 %v2283_v16, %v6582_v23  ;;  %v2458_v39 = vadd.f32 %v2285_v54, %v6587_v34  ;;  %v2133_v49 = vpop.f32.mrf.mxu2 }
 0x413   : > { %vm2521_vm3 = vcmp.ge.f32.partialorder %v2457_v33, 0.0  ;;  %v2585_v13 = vmul.f32 0.01, %v2457_v33  ;;  %v2586_v31 = vmul.f32 0.01, %v2458_v39  ;;  %vm2522_vm7 = vcmp.ge.f32.partialorder %v2458_v39, 0.0 }
 0x415   : > { %v4736_v8 = vpop.trf.xlu2  ;;  %v2649_v2 = vsel %vm2521_vm3, %v2457_v33, %v2585_v13  ;;  %v2650_v10 = vsel %vm2522_vm7, %v2458_v39, %v2586_v31 }
 0x416   : > { %2808 = vperm.xlu0 %4746, %v2654_v47   ;;  %2783 = vperm.xlu2 %4748, %v2649_v2   ;;  %v4737_v18 = vunpack.i.l.bf16 %v4736_v8  ;;  %v4740_v11 = vunpack.i.h.bf16 %v4736_v8  ;;  %v7775_v2 = vld [vmem:[#allocation17_spill] sm:$0xff] }
 0x417   : > { %2803 = vperm.xlu1 %4747, %v2653_v50  }
 0x418   : > { %1240 = vmatmul.f32.gmra.mxu0 %v4737_v18  ;;  %v2281_v45 = vpop.permute.xlu0 %2280  ;;  %v7776_v18 = vld [vmem:[#allocation51_spill] sm:$0xff] }
 0x419   : > { %1449 = vmatmul.f32.gmra.mxu1 %v4740_v11  ;;  %v2456_v1 = vadd.f32 %v2281_v45, %v6597_v58  ;;  %v3016_v11 = vmul.f32 %v7776_v18, %v7775_v2 }
 0x41b   : > { %v2584_v26 = vmul.f32 0.01, %v2456_v1  ;;  %vm2520_vm0 = vcmp.ge.f32.partialorder %v2456_v1, 0.0  ;;  %v3083_v31 = vand.u32 2147483647, %v3016_v11 }
 0x41d   : > { %v4741_v52 = vpop.trf.xlu2  ;;  %v2648_v63 = vsel %vm2520_vm0, %v2456_v1, %v2584_v26  ;;  %v7779_v26 = vld [vmem:[#allocation25_spill] sm:$0xff] }
 0x41e   : > { %2793 = vperm.xlu0 %4746, %v2651_v27   ;;  %2334 = vrot.lane.b32.xlu2 %v6547_v57, %s4946_s5  ;;  %v4742_v25 = vunpack.i.l.bf16 %v4741_v52  ;;  %v4745_v43 = vunpack.i.h.bf16 %v4741_v52  ;;  %v6609_v57 = vpop.f32.mrf.mxu2  ;;  %v3149_v27 = vsel %vm3082_vm10, %v3016_v11, %v3083_v31 }
 0x41f   : > { %2788 = vperm.xlu1 %4747, %v2650_v10   ;;  %7770 = vst [vmem:[#allocation18_spill] sm:$0xff] %v6609_v57 }
 0x420   : > { %1243 = vmatmul.f32.gmra.mxu0 %v4742_v25 }
 0x421   : > { %1452 = vmatmul.f32.gmra.mxu1 %v4745_v43  ;;  %v7778_v43 = vmov 1.0  }
 0x425   : > { %v6602_v54 = vpop.f32.mrf.mxu0  ;;  %v6604_v30 = vpop.f32.mrf.mxu1 }
 0x426   : > { %2778 = vperm.xlu0 %4746, %v2648_v63   ;;  %2340 = vrot.lane.b32.xlu2 %v2130_v42, %s4946_s5 }
 0x427   : > { %2336 = vrot.lane.b32.xlu1 %v6561_v53, %s4946_s5 }
 0x428   : > { %3975 = vmatmul.lmr.bf16.gmra.16.mxu0 }
 0x429   : > { %4053 = vmatmul.lmr.bf16.gmra.16.mxu1 }
 0x42d   : > { %v6611_v16 = vpop.f32.mrf.mxu0  ;;  %v6613_v15 = vpop.f32.mrf.mxu1 }
 0x42e   : > { %2338 = vrot.lane.b32.xlu0 %v2127_v41, %s4946_s5  ;;  %2328 = vrot.lane.b32.xlu2 %v6514_v12, %s4946_s5  ;;  %v6629_v41 = vpop.f32.mrf.mxu2 }
 0x42f   : > { %2342 = vrot.lane.b32.xlu1 %v2133_v49, %s4946_s5  ;;  %7771 = vst [vmem:[#allocation50_spill] sm:$0xff] %v6629_v41  ;;  %v7780_v49 = vld [vmem:[#allocation28_spill] sm:$0xff] }
 0x430   : > { %3976 = vmatmul.lmr.bf16.gmra.16.mxu0 }
 0x431   : > { %4054 = vmatmul.lmr.bf16.gmra.16.mxu1 }
 0x435   : > { %v6619_v33 = vpop.f32.mrf.mxu0  ;;  %v6621_v53 = vpop.f32.mrf.mxu1 }
 0x436   : > { %2332 = vrot.lane.b32.xlu0 %v6533_v24, %s4946_s5  ;;  %2322 = vrot.lane.b32.xlu2 %v6465_v32, %s4946_s5  ;;  %v6641_v32 = vpop.f32.mrf.mxu2  ;;  %v3021_v24 = vmul.f32 %v6478_v60, %v6281_v5  ;;  %v3019_v5 = vmul.f32 %v6493_v20, %v6302_v51  ;;  %v7773_v51 = vld [vmem:[#allocation20_spill] sm:$0xff] }
 0x437   : > { %2330 = vrot.lane.b32.xlu1 %v6525_v6, %s4946_s5  ;;  %7772 = vst [vmem:[#allocation31_spill] sm:$0xff] %v6641_v32 }
 0x438   : > { %3977 = vmatmul.lmr.bf16.gmra.16.mxu0  ;;  %v3088_v28 = vand.u32 2147483647, %v3021_v24 }
 0x439   : > { %4055 = vmatmul.lmr.bf16.gmra.16.mxu1 }
 0x43a   : > { %v3154_v20 = vsel %vm3082_vm10, %v3021_v24, %v3088_v28 }
 0x43d   : > { %v6631_v12 = vpop.f32.mrf.mxu0 }
 0x43e   : > { %v6633_v13 = vpop.f32.mrf.mxu1  ;;  %2326 = vrot.lane.b32.xlu0 %v6507_v0, %s4946_s5  ;;  %2316 = vrot.lane.b32.xlu2 %v6435_v9, %s4946_s5  ;;  %v6658_v39 = vpop.f32.mrf.mxu2 }
 0x43f   : > { %2324 = vrot.lane.b32.xlu1 %v6489_v61, %s4946_s5  ;;  %v3020_v61 = vmul.f32 %v6495_v40, %v6306_v17  ;;  %v3086_v17 = vand.u32 2147483647, %v3019_v5  ;;  %v3017_v40 = vmul.f32 %v6503_v35, %v6327_v55 }
 0x440   : > { %3978 = vmatmul.lmr.bf16.gmra.16.mxu0 }
 0x441   : > { %4056 = vmatmul.lmr.bf16.gmra.16.mxu1  ;;  %v3087_v8 = vand.u32 2147483647, %v3020_v61  ;;  %v3084_v55 = vand.u32 2147483647, %v3017_v40  ;;  %v3152_v35 = vsel %vm3082_vm10, %v3019_v5, %v3086_v17 }
 0x443   : > { %v3153_v46 = vsel %vm3082_vm10, %v3020_v61, %v3087_v8  ;;  %v3150_v10 = vsel %vm3082_vm10, %v3017_v40, %v3084_v55  ;;  %v7782_v61 = vld [vmem:[#allocation35_spill] sm:$0xff] }
 0x445   : > { %v6643_v6 = vpop.f32.mrf.mxu0 }
 0x446   : > { %v6647_v47 = vpop.f32.mrf.mxu1  ;;  %2320 = vrot.lane.b32.xlu0 %v6453_v3, %s4946_s5  ;;  %v3018_v3 = vmul.f32 %v6505_v22, %v6331_v38  ;;  %v7774_v38 = vld [vmem:[#allocation21_spill] sm:$0xff]  ;;  %v6686_v1 = vpop.f32.mrf.mxu2 }
 0x447   : > { %2318 = vrot.lane.b32.xlu1 %v6447_v19, %s4946_s5  ;;  %v2729_v9 = vpop.permute.xlu2 %2728  ;;  %7777 = vst [vmem:[#allocation23_spill] sm:$0xff] %v6686_v1 }
 0x448   : > { %v3022_v0 = vmul.f32 %v2729_v9, %v6521_v37  ;;  %3979 = vmatmul.lmr.bf16.gmra.16.mxu0  ;;  %v3085_v22 = vand.u32 2147483647, %v3018_v3 }
 0x449   : > { %4057 = vmatmul.lmr.bf16.gmra.16.mxu1 }
 0x44a   : > { %v3089_v60 = vand.u32 2147483647, %v3022_v0  ;;  %v3151_v42 = vsel %vm3082_vm10, %v3018_v3, %v3085_v22 }
 0x44c   : > { %v3155_v19 = vsel %vm3082_vm10, %v3022_v0, %v3089_v60 }
 0x44d   : > { %v6664_v50 = vpop.f32.mrf.mxu0  ;;  %3238 = vmatpush.msra.mxu3 %v3155_v19 }
 0x44e   : > { %v6668_v37 = vpop.f32.mrf.mxu1  ;;  %2314 = vrot.lane.b32.xlu0 %v7773_v51, %s4946_s5  ;;  %v6702_v9 = vpop.f32.mrf.mxu2 }
 0x44f   : > { %2312 = vrot.lane.b32.xlu1 %v7774_v38, %s4946_s5  ;;  %3239 = vmatpush.msra.mxu3 %v3154_v20  ;;  %v2829_v25 = vpop.permute.xlu2 %2828  ;;  %7781 = vst [vmem:[#allocation42_spill] sm:$0xff] %v6702_v9  ;;  %v7788_v9 = vld [vmem:[#allocation53_spill] sm:$0xff] }
 0x450   : > { %3980 = vmatmul.lmr.bf16.gmra.16.mxu0  ;;  %v2844_v60 = vpop.permute.xlu1 %2843 }
 0x451   : > { %3240 = vmatpush.msra.mxu3 %v3153_v46  ;;  %4058 = vmatmul.lmr.bf16.gmra.16.mxu1 }
 0x453   : > { %3241 = vmatpush.msra.mxu3 %v3152_v35 }
 0x455   : > { %v6684_v45 = vpop.f32.mrf.mxu0  ;;  %3242 = vmatpush.msra.mxu3 %v3151_v42 }
 0x456   : > { %v6688_v52 = vpop.f32.mrf.mxu1  ;;  %v6712_v8 = vpop.f32.mrf.mxu2 }
 0x457   : > { %3243 = vmatpush.msra.mxu3 %v3150_v10  ;;  %v2814_v0 = vpop.permute.xlu2 %2813 }
 0x458   : > { %3981 = vmatmul.lmr.bf16.gmra.16.mxu0  ;;  %v2839_v51 = vpop.permute.xlu0 %2838 }
 0x459   : > { %3244 = vmatpush.msra.mxu3 %v3149_v27  ;;  %4059 = vmatmul.lmr.bf16.gmra.16.mxu1 }
 0x45a   : > { %3842 = vmatmul.msk.f32.vlgmr.msra.gmra.mxu3 %vm1574_vm1, %v7778_v43 }
 0x45d   : > { %v6698_v63 = vpop.f32.mrf.mxu0 }
 0x45e   : > { %v6700_v24 = vpop.f32.mrf.mxu1  ;;  %v6729_v18 = vpop.f32.mrf.mxu2 }
 0x460   : > { %3982 = vmatmul.lmr.bf16.gmra.16.mxu0 }
 0x461   : > { %4060 = vmatmul.lmr.bf16.gmra.16.mxu1 }
 0x462   : > { %3843 = vmatmul.msk.f32.gmra.mxu3 %vm1578_vm12, %v7778_v43 }
 0x465   : > { %v6708_v28 = vpop.f32.mrf.mxu0 }
 0x466   : > { %v6710_v5 = vpop.f32.mrf.mxu1 }
 0x468   : > { %3983 = vmatmul.lmr.bf16.gmra.16.mxu0  ;;  %v6718_v19 = vpop.permute.xlu2 %2798 }
 0x469   : > { %4061 = vmatmul.lmr.bf16.gmra.16.mxu1 }
 0x46a   : > { %3844 = vmatmul.msk.f32.gmra.mxu3 %vm1582_vm2, %v7778_v43 }
 0x46d   : > { %v6720_v17 = vpop.f32.mrf.mxu0 }
 0x46e   : > { %v6722_v40 = vpop.f32.mrf.mxu1 }
 0x470   : > { %v2854_v20 = vpop.permute.xlu1 %2853  ;;  %3984 = vmatmul.lmr.bf16.gmra.16.mxu0  ;;  %v6735_v55 = vpop.permute.xlu2 %2783 }
 0x471   : > { %v3047_v38 = vmul.f32 %v2854_v20, %v6540_v29  ;;  %4062 = vmatmul.lmr.bf16.gmra.16.mxu1  ;;  %v7785_v29 = vld [vmem:[#allocation52_spill] sm:$0xff] }
 0x472   : > { %3845 = vmatmul.msk.f32.gmra.mxu3 %vm1586_vm11, %v7778_v43  ;;  %v3045_v31 = vmul.f32 %v2844_v60, %v7785_v29  ;;  %v7786_v20 = vld [vmem:[#allocation32_spill] sm:$0xff]  ;;  %v6749_v29 = vpop.f32.mrf.mxu2 }
 0x473   : > { %v3114_v2 = vand.u32 2147483647, %v3047_v38  ;;  %v3044_v32 = vmul.f32 %v2839_v51, %v7786_v20 }
 0x475   : > { %v6731_v11 = vpop.f32.mrf.mxu0  ;;  %v3180_v46 = vsel %vm3082_vm10, %v3047_v38, %v3114_v2  ;;  %v3112_v38 = vand.u32 2147483647, %v3045_v31 }
 0x476   : > { %v6737_v35 = vpop.f32.mrf.mxu1  ;;  %3294 = vmatpush.msrb.mxu3 %v3180_v46 }
 0x477   : > { %v3178_v20 = vsel %vm3082_vm10, %v3045_v31, %v3112_v38 }
 0x478   : > { %v2849_v42 = vpop.permute.xlu0 %2848  ;;  %v2834_v10 = vpop.permute.xlu1 %2833  ;;  %3985 = vmatmul.lmr.bf16.gmra.16.mxu0 }
 0x479   : > { %v3046_v27 = vmul.f32 %v2849_v42, %v6550_v62  ;;  %4063 = vmatmul.lmr.bf16.gmra.16.mxu1  ;;  %v3043_v41 = vmul.f32 %v2834_v10, %v6544_v59  ;;  %v3042_v62 = vmul.f32 %v2829_v25, %v7788_v9  ;;  %v3111_v42 = vand.u32 2147483647, %v3044_v32  ;;  %v2335_v1 = vpop.permute.xlu2 %2334 }
 0x47a   : > { %3846 = vmatmul.msk.f32.gmra.mxu3 %vm1590_vm8, %v7778_v43 }
 0x47b   : > { %v3113_v2 = vand.u32 2147483647, %v3046_v27  ;;  %v3110_v22 = vand.u32 2147483647, %v3043_v41  ;;  %v3109_v25 = vand.u32 2147483647, %v3042_v62  ;;  %v3177_v31 = vsel %vm3082_vm10, %v3044_v32, %v3111_v42  ;;  %v6770_v32 = vpop.f32.mrf.mxu2 }
 0x47d   : > { %v1232_v46 = vpop.f32.mrf.mxu0  ;;  %v3179_v60 = vsel %vm3082_vm10, %v3046_v27, %v3113_v2 }
 0x47e   : > { %v1441_v3 = vpop.f32.mrf.mxu1  ;;  %3295 = vmatpush.msrb.mxu3 %v3179_v60 }
 0x47f   : > { %v6752_v51 = vadd.f32 %v1441_v3, %v1232_v46  ;;  %v7789_v3 = vld [vmem:[#allocation37_spill] sm:$0xff] }
 0x480   : > { %v2824_v57 = vpop.permute.xlu0 %2823  ;;  %3296 = vmatpush.msrb.mxu3 %v3178_v20  ;;  %3986 = vmatmul.lmr.bf16.gmra.16.mxu0  ;;  %v3175_v20 = vsel %vm3082_vm10, %v3042_v62, %v3109_v25  ;;  %v7790_v62 = vld [vmem:[#allocation29_spill] sm:$0xff] }
 0x481   : > { %v2483_v59 = vadd.f32 %v2335_v1, %v6752_v51  ;;  %v3041_v10 = vmul.f32 %v2824_v57, %v6559_v14  ;;  %v2819_v27 = vpop.permute.xlu1 %2818  ;;  %4064 = vmatmul.lmr.bf16.gmra.16.mxu1  ;;  %v3039_v1 = vmul.f32 %v2814_v0, %v6537_v44  ;;  %v3176_v14 = vsel %vm3082_vm10, %v3043_v41, %v3110_v22 }
 0x482   : > { %v3040_v9 = vmul.f32 %v2819_v27, %v6555_v7  ;;  %3847 = vmatmul.msk.f32.gmra.mxu3 %vm1594_vm6, %v7778_v43  ;;  %v3036_v22 = vmul.f32 %v6718_v19, %v6567_v36 }
 0x483   : > { %v2611_v38 = vmul.f32 0.01, %v2483_v59  ;;  %3297 = vmatpush.msrb.mxu3 %v3177_v31  ;;  %vm2547_vm1 = vcmp.ge.f32.partialorder %v2483_v59, 0.0  ;;  %v3108_v2 = vand.u32 2147483647, %v3041_v10  ;;  %v2341_v31 = vpop.permute.xlu2 %2340 }
 0x484   : > { %v3107_v46 = vand.u32 2147483647, %v3040_v9  ;;  %v3106_v42 = vand.u32 2147483647, %v3039_v1 }
 0x485   : > { %3298 = vmatpush.msrb.mxu3 %v3176_v14  ;;  %v1235_v57 = vpop.f32.mrf.mxu0  ;;  %v2675_v7 = vsel %vm2547_vm1, %v2483_v59, %v2611_v38  ;;  %v3174_v44 = vsel %vm3082_vm10, %v3041_v10, %v3108_v2 }
 0x486   : > { %v1444_v60 = vpop.f32.mrf.mxu1  ;;  %2913 = vperm.xlu0 %4746, %v2675_v7   ;;  %v3173_v25 = vsel %vm3082_vm10, %v3040_v9, %v3107_v46  ;;  %v3172_v38 = vsel %vm3082_vm10, %v3039_v1, %v3106_v42  ;;  %v6795_v1 = vpop.f32.mrf.mxu2 }
 0x487   : > { %3299 = vmatpush.msrb.mxu3 %v3175_v20  ;;  %v3033_v20 = vmul.f32 %v6735_v55, %v6582_v23 }
 0x488   : > { %v2809_v27 = vpop.permute.xlu0 %2808  ;;  %3987 = vmatmul.lmr.bf16.gmra.16.mxu0 }
 0x489   : > { %v3038_v41 = vmul.f32 %v2809_v27, %v6572_v21  ;;  %3300 = vmatpush.msrb.mxu3 %v3174_v44  ;;  %v2804_v0 = vpop.permute.xlu1 %2803  ;;  %4065 = vmatmul.lmr.bf16.gmra.16.mxu1  ;;  %v7791_v27 = vld [vmem:[#allocation40_spill] sm:$0xff] }
 0x48a   : > { %v3037_v59 = vmul.f32 %v2804_v0, %v6576_v4  ;;  %3848 = vmatmul.msk.f32.gmra.mxu3 %vm1598_vm4, %v7778_v43  ;;  %v3103_v4 = vand.u32 2147483647, %v3036_v22 }
 0x48b   : > { %v3105_v10 = vand.u32 2147483647, %v3038_v41  ;;  %3301 = vmatpush.msrb.mxu3 %v3173_v25  ;;  %v3100_v25 = vand.u32 2147483647, %v3033_v20 }
 0x48c   : > { %v3104_v21 = vand.u32 2147483647, %v3037_v59  ;;  %v3169_v44 = vsel %vm3082_vm10, %v3036_v22, %v3103_v4 }
 0x48d   : > { %3302 = vmatpush.msrb.mxu3 %v3172_v38  ;;  %v6786_v2 = vpop.f32.mrf.mxu0  ;;  %v3171_v36 = vsel %vm3082_vm10, %v3038_v41, %v3105_v10  ;;  %v2329_v10 = vpop.permute.xlu2 %2328 }
 0x48e   : > { %v6790_v19 = vpop.f32.mrf.mxu1  ;;  %v3170_v9 = vsel %vm3082_vm10, %v3037_v59, %v3104_v21  ;;  %v6812_v21 = vadd.f32 %v1444_v60, %v1235_v57  ;;  %v3166_v57 = vsel %vm3082_vm10, %v3033_v20, %v3100_v25  ;;  %v6825_v60 = vadd.f32 %v6710_v5, %v6708_v28 }
 0x48f   : > { %3303 = vmatpush.msrb.mxu3 %v3171_v36 }
 0x490   : > { %v2794_v14 = vpop.permute.xlu0 %2793  ;;  %3988 = vmatmul.lmr.bf16.gmra.16.mxu0 }
 0x491   : > { %v3035_v7 = vmul.f32 %v2794_v14, %v6591_v56  ;;  %3304 = vmatpush.msrb.mxu3 %v3170_v9  ;;  %v2789_v46 = vpop.permute.xlu1 %2788  ;;  %4066 = vmatmul.lmr.bf16.gmra.16.mxu1  ;;  %v7792_v9 = vld [vmem:[#allocation39_spill] sm:$0xff] }
 0x492   : > { %v3034_v42 = vmul.f32 %v2789_v46, %v6587_v34  ;;  %3849 = vmatmul.msk.f32.gmra.mxu3 %vm1602_vm15, %v7778_v43 }
 0x493   : > { %v3102_v41 = vand.u32 2147483647, %v3035_v7  ;;  %3305 = vmatpush.msrb.mxu3 %v3169_v44 }
 0x494   : > { %v3101_v56 = vand.u32 2147483647, %v3034_v42 }
 0x495   : > { %v1241_v0 = vpop.f32.mrf.mxu0  ;;  %v3168_v59 = vsel %vm3082_vm10, %v3035_v7, %v3102_v41 }
 0x496   : > { %v1450_v23 = vpop.f32.mrf.mxu1  ;;  %3306 = vmatpush.msrb.mxu3 %v3168_v59  ;;  %v3167_v55 = vsel %vm3082_vm10, %v3034_v42, %v3101_v56  ;;  %v2480_v42 = vadd.f32 %v2329_v10, %v6825_v60 }
 0x497   : > { %v6808_v34 = vadd.f32 %v1450_v23, %v1241_v0  ;;  %v2323_v0 = vpop.permute.xlu2 %2322 }
 0x498   : > { %v2779_v38 = vpop.permute.xlu0 %2778  ;;  %3307 = vmatpush.msrb.mxu3 %v3167_v55  ;;  %3989 = vmatmul.lmr.bf16.gmra.16.mxu0  ;;  %v2608_v25 = vmul.f32 0.01, %v2480_v42  ;;  %vm2544_vm11 = vcmp.ge.f32.partialorder %v2480_v42, 0.0  ;;  %v7793_v55 = vld [vmem:[#allocation30_spill] sm:$0xff] }
 0x499   : > { %v2486_v22 = vadd.f32 %v2341_v31, %v6808_v34  ;;  %v3032_v36 = vmul.f32 %v2779_v38, %v6597_v58  ;;  %v2337_v4 = vpop.permute.xlu1 %2336  ;;  %4067 = vmatmul.lmr.bf16.gmra.16.mxu1  ;;  %v6827_v58 = vpop.f32.mrf.mxu2  ;;  %vm7794_vm8 = vcmp.eq.s32.totalorder %v7793_v55, %v7780_v49  ;;  %v6841_v38 = vadd.f32 %v6668_v37, %v6664_v50 }
 0x49a   : > { %v2484_v14 = vadd.f32 %v2337_v4, %v6812_v21  ;;  %3850 = vmatmul.msk.f32.gmra.mxu3 %vm1606_vm14, %v7778_v43  ;;  %v2672_v4 = vsel %vm2544_vm11, %v2480_v42, %v2608_v25  ;;  %v6854_v50 = vadd.f32 %v6722_v40, %v6720_v17  ;;  %v6868_v17 = vadd.f32 %v6790_v19, %v6786_v2 }
 0x49b   : > { %v2614_v7 = vmul.f32 0.01, %v2486_v22  ;;  %v3099_v31 = vand.u32 2147483647, %v3032_v36  ;;  %3308 = vmatpush.msrb.mxu3 %v3166_v57  ;;  %vm2550_vm12 = vcmp.ge.f32.partialorder %v2486_v22, 0.0  ;;  %v6878_v19 = vadd.f32 %v6688_v52, %v6684_v45 }
 0x49c   : > { %vm2548_vm2 = vcmp.ge.f32.partialorder %v2484_v14, 0.0  ;;  %v2612_v46 = vmul.f32 0.01, %v2484_v14 }
 0x49d   : > { %v2678_v44 = vsel %vm2550_vm12, %v2486_v22, %v2614_v7  ;;  %v1244_v41 = vpop.f32.mrf.mxu0  ;;  %v3165_v56 = vsel %vm3082_vm10, %v3032_v36, %v3099_v31  ;;  %v2477_v36 = vadd.f32 %v2323_v0, %v6841_v38  ;;  %v7795_v0 = vld [vmem:[#allocation41_spill] sm:$0xff] }
 0x49e   : > { %2928 = vperm.xlu0 %4746, %v2678_v44   ;;  %v1453_v20 = vpop.f32.mrf.mxu1  ;;  %3309 = vmatpush.msrb.mxu3 %v3165_v56  ;;  %v2676_v28 = vsel %vm2548_vm2, %v2484_v14, %v2612_v46  ;;  %v6848_v46 = vadd.f32 %v6737_v35, %v6731_v11  ;;  %vm7796_vm15 = vcmp.eq.s32.totalorder %v7795_v0, %v7780_v49 }
 0x49f   : > { %v6832_v5 = vadd.f32 %v1453_v20, %v1244_v41  ;;  %2918 = vperm.xlu2 %4748, %v2676_v28   ;;  %v2605_v41 = vmul.f32 0.01, %v2477_v36  ;;  %vm2541_vm4 = vcmp.ge.f32.partialorder %v2477_v36, 0.0  ;;  %v2317_v20 = vpop.permute.xlu2 %2316  ;;  %v6864_v11 = vadd.f32 %v6621_v53, %v6619_v33 }
 0x4a0   : > { %v2339_v59 = vpop.permute.xlu0 %2338  ;;  %3990 = vmatmul.lmr.bf16.gmra.16.mxu0 }
 0x4a1   : > { %v2343_v23 = vpop.permute.xlu1 %2342  ;;  %4068 = vmatmul.lmr.bf16.gmra.16.mxu1  ;;  %v6844_v14 = vpop.f32.mrf.mxu2  ;;  %v2474_v25 = vadd.f32 %v2317_v20, %v6864_v11 }
 0x4a2   : > { %v2487_v10 = vadd.f32 %v2343_v23, %v6832_v5  ;;  %3851 = vmatmul.msk.f32.gmra.mxu3 %vm7794_vm8, %v7778_v43  ;;  %v2485_v23 = vadd.f32 %v2339_v59, %v6868_v17 }
 0x4a3   : > { %vm2538_vm9 = vcmp.ge.f32.partialorder %v2474_v25, 0.0 }
 0x4a4   : > { %vm2551_vm6 = vcmp.ge.f32.partialorder %v2487_v10, 0.0  ;;  %v2615_v22 = vmul.f32 0.01, %v2487_v10  ;;  %vm2549_vm3 = vcmp.ge.f32.partialorder %v2485_v23, 0.0 }
 0x4a5   : > { %v1247_v57 = vpop.f32.mrf.mxu0 }
 0x4a6   : > { %2898 = vperm.xlu0 %4746, %v2672_v4   ;;  %v2679_v7 = vsel %vm2551_vm6, %v2487_v10, %v2615_v22  ;;  %v1456_v31 = vpop.f32.mrf.mxu1  ;;  %v2669_v10 = vsel %vm2541_vm4, %v2477_v36, %v2605_v41  ;;  %v7797_v41 = vld [vmem:[#allocation33_spill] sm:$0xff] }
 0x4a7   : > { %2933 = vperm.xlu2 %4748, %v2679_v7   ;;  %v6850_v44 = vadd.f32 %v1456_v31, %v1247_v57  ;;  %v2602_v31 = vmul.f32 0.01, %v2474_v25  ;;  %vm7798_vm5 = vcmp.eq.s32.totalorder %v7797_v41, %v7780_v49 }
 0x4a8   : > { %v2333_v37 = vpop.permute.xlu0 %2332 }
 0x4a9   : > { %v2482_v42 = vadd.f32 %v2333_v37, %v6848_v46  ;;  %v2331_v56 = vpop.permute.xlu1 %2330  ;;  %v6872_v53 = vpop.f32.mrf.mxu2  ;;  %v2613_v37 = vmul.f32 0.01, %v2485_v23 }
 0x4aa   : > { %v2481_v28 = vadd.f32 %v2331_v56, %v6854_v50  ;;  %3852 = vmatmul.msk.f32.gmra.mxu3 %vm7796_vm15, %v7778_v43  ;;  %v2666_v56 = vsel %vm2538_vm9, %v2474_v25, %v2602_v31 }
 0x4ab   : > { %vm2546_vm14 = vcmp.ge.f32.partialorder %v2482_v42, 0.0  ;;  %v2610_v40 = vmul.f32 0.01, %v2482_v42  ;;  %v2677_v20 = vsel %vm2549_vm3, %v2485_v23, %v2613_v37  ;;  %v7800_v23 = vld [vmem:[#allocation43_spill] sm:$0xff] }
 0x4ac   : > { %vm2545_vm7 = vcmp.ge.f32.partialorder %v2481_v28, 0.0  ;;  %v2609_v35 = vmul.f32 0.01, %v2481_v28  ;;  %vm7801_vm12 = vcmp.eq.s32.totalorder %v7800_v23, %v7780_v49 }
 0x4ad   : > { %v2674_v22 = vsel %vm2546_vm14, %v2482_v42, %v2610_v40  ;;  %v1250_v4 = vpop.f32.mrf.mxu0  ;;  %v6887_v42 = vadd.f32 %v6700_v24, %v6698_v63 }
 0x4ae   : > { %2883 = vperm.xlu0 %4746, %v2669_v10   ;;  %2908 = vperm.xlu1 %4747, %v2674_v22   ;;  %v2673_v57 = vsel %vm2545_vm7, %v2481_v28, %v2609_v35  ;;  %v1459_v33 = vpop.f32.mrf.mxu1  ;;  %v6894_v22 = vadd.f32 %v6633_v13, %v6631_v12 }
 0x4af   : > { %2903 = vperm.xlu2 %4748, %v2673_v57   ;;  %v6874_v2 = vadd.f32 %v1459_v33, %v1250_v4  ;;  %v6903_v33 = vadd.f32 %v6647_v47, %v6643_v6 }
 0x4b0   : > { %v2327_v7 = vpop.permute.xlu0 %2326 }
 0x4b1   : > { %v2325_v59 = vpop.permute.xlu1 %2324  ;;  %v2479_v52 = vadd.f32 %v2327_v7, %v6887_v42  ;;  %v2178_v57 = vpop.f32.mrf.mxu2 }
 0x4b2   : > { %v2478_v36 = vadd.f32 %v2325_v59, %v6878_v19  ;;  %3853 = vmatmul.msk.f32.gmra.mxu3 %vm7798_vm5, %v7778_v43 }
 0x4b3   : > { %v2607_v24 = vmul.f32 0.01, %v2479_v52  ;;  %vm2543_vm1 = vcmp.ge.f32.partialorder %v2479_v52, 0.0 }
 0x4b4   : > { %vm2542_vm0 = vcmp.ge.f32.partialorder %v2478_v36, 0.0  ;;  %v2606_v45 = vmul.f32 0.01, %v2478_v36 }
 0x4b5   : > { %v1253_v28 = vpop.f32.mrf.mxu0  ;;  %v2671_v13 = vsel %vm2543_vm1, %v2479_v52, %v2607_v24 }
 0x4b6   : > { %2868 = vperm.xlu0 %4746, %v2666_v56   ;;  %2923 = vperm.xlu1 %4747, %v2677_v20   ;;  %v2670_v40 = vsel %vm2542_vm0, %v2478_v36, %v2606_v45  ;;  %v1462_v35 = vpop.f32.mrf.mxu1  ;;  %v6912_v45 = vadd.f32 %v6604_v30, %v6602_v54  ;;  %v7802_v20 = vld [vmem:[#allocation36_spill] sm:$0xff] }
 0x4b7   : > { %2888 = vperm.xlu2 %4748, %v2670_v40   ;;  %v6890_v10 = vadd.f32 %v1462_v35, %v1253_v28  ;;  %vm7803_vm8 = vcmp.eq.s32.totalorder %v7802_v20, %v7780_v49 }
 0x4b8   : > { %v2321_v63 = vpop.permute.xlu0 %2320 }
 0x4b9   : > { %7799 = vst [vmem:[#allocation22_spill] sm:$0xff] %v6890_v10  ;;  %v2319_v4 = vpop.permute.xlu1 %2318  ;;  %v2476_v12 = vadd.f32 %v2321_v63, %v6903_v33  ;;  %v2181_v28 = vpop.f32.mrf.mxu2 }
 0x4ba   : > { %v2475_v25 = vadd.f32 %v2319_v4, %v6894_v22  ;;  %3854 = vmatmul.msk.f32.gmra.mxu3 %vm7801_vm12, %v7778_v43 }
 0x4bb   : > { %v2604_v6 = vmul.f32 0.01, %v2476_v12  ;;  %vm2540_vm11 = vcmp.ge.f32.partialorder %v2476_v12, 0.0 }
 0x4bc   : > { %vm2539_vm2 = vcmp.ge.f32.partialorder %v2475_v25, 0.0  ;;  %v2603_v7 = vmul.f32 0.01, %v2475_v25 }
 0x4bd   : > { %v1256_v31 = vpop.f32.mrf.mxu0  ;;  %v2668_v30 = vsel %vm2540_vm11, %v2476_v12, %v2604_v6 }
 0x4be   : > { %2368 = vrot.lane.b32.xlu0 %v6844_v14, %s4946_s5  ;;  %2893 = vperm.xlu1 %4747, %v2671_v13   ;;  %v2667_v37 = vsel %vm2539_vm2, %v2475_v25, %v2603_v7  ;;  %v1465_v59 = vpop.f32.mrf.mxu1  ;;  %v6921_v14 = vadd.f32 %v6613_v15, %v6611_v16  ;;  %v7804_v16 = vld [vmem:[#allocation45_spill] sm:$0xff] }
 0x4bf   : > { %2873 = vperm.xlu2 %4748, %v2667_v37   ;;  %v6908_v36 = vadd.f32 %v1465_v59, %v1256_v31  ;;  %vm7805_vm15 = vcmp.eq.s32.totalorder %v7804_v16, %v7780_v49  ;;  %v7806_v31 = vld [vmem:[#allocation47_spill] sm:$0xff] }
 0x4c0   : > { %v2315_v56 = vpop.permute.xlu0 %2314 }
 0x4c1   : > { %v2313_v47 = vpop.permute.xlu1 %2312  ;;  %v2473_v54 = vadd.f32 %v2315_v56, %v6921_v14  ;;  %v7813_v56 = vld [vmem:[#allocation23_spill] sm:$0xff] }
 0x4c2   : > { %v2472_v52 = vadd.f32 %v2313_v47, %v6912_v45  ;;  %3855 = vmatmul.msk.f32.gmra.mxu3 %vm7803_vm8, %v7778_v43  ;;  %v7812_v47 = vld [vmem:[#allocation18_spill] sm:$0xff] }
 0x4c3   : > { %v2601_v25 = vmul.f32 0.01, %v2473_v54  ;;  %vm2537_vm4 = vcmp.ge.f32.partialorder %v2473_v54, 0.0 }
 0x4c4   : > { %vm2536_vm6 = vcmp.ge.f32.partialorder %v2472_v52, 0.0  ;;  %v2600_v40 = vmul.f32 0.01, %v2472_v52 }
 0x4c5   : > { %v1259_v35 = vpop.f32.mrf.mxu0  ;;  %v2665_v15 = vsel %vm2537_vm4, %v2473_v54, %v2601_v25  ;;  %v7818_v54 = vld [vmem:[#allocation50_spill] sm:$0xff] }
 0x4c6   : > { %2374 = vrot.lane.b32.xlu0 %v2181_v28, %s4946_s5  ;;  %2878 = vperm.xlu1 %4747, %v2668_v30   ;;  %v2664_v63 = vsel %vm2536_vm6, %v2472_v52, %v2600_v40  ;;  %v1468_v24 = vpop.f32.mrf.mxu1  ;;  %v7814_v52 = vld [vmem:[#allocation34_spill] sm:$0xff] }
 0x4c7   : > { %2858 = vperm.xlu2 %4748, %v2664_v63   ;;  %v6925_v4 = vadd.f32 %v1468_v24, %v1259_v35  ;;  %v7817_v40 = vld [vmem:[#allocation42_spill] sm:$0xff]  ;;  %v7822_v24 = vld [vmem:[#allocation31_spill] sm:$0xff] }
 0x4ca   : > { %3856 = vmatmul.msk.f32.gmra.mxu3 %vm7805_vm15, %v7778_v43 }
 0x4cd   : > { %v1262_v7 = vpop.f32.mrf.mxu0 }
 0x4ce   : > { %2362 = vrot.lane.b32.xlu0 %v6770_v32, %s4946_s5  ;;  %2863 = vperm.xlu1 %4747, %v2665_v15   ;;  %v1471_v12 = vpop.f32.mrf.mxu1  ;;  %v7823_v15 = vld [vmem:[#allocation38_spill] sm:$0xff] }
 0x4cf   : > { %2370 = vrot.lane.b32.xlu2 %v6872_v53, %s4946_s5  ;;  %v6935_v13 = vadd.f32 %v1471_v12, %v1262_v7  ;;  %v7807_v53 = vld [vmem:[#allocation46_spill] sm:$0xff] }
 0x4d0   : > { %vm7808_vm14 = vcmp.eq.s32.totalorder %v7779_v26, %v7807_v53  ;;  %vm7815_vm7 = vcmp.eq.s32.totalorder %v7814_v52, %v7807_v53  ;;  %vm7824_vm3 = vcmp.eq.s32.totalorder %v7823_v15, %v7807_v53  ;;  %vm7826_vm5 = vcmp.eq.s32.totalorder %v7789_v3, %v7807_v53 }
 0x4d1   : > { %vm7828_vm0 = vcmp.eq.s32.totalorder %v7790_v62, %v7807_v53  ;;  %vm7830_vm1 = vcmp.eq.s32.totalorder %v7791_v27, %v7807_v53  ;;  %vm7832_vm12 = vcmp.eq.s32.totalorder %v7792_v9, %v7807_v53  ;;  %vm7834_vm2 = vcmp.eq.s32.totalorder %v7793_v55, %v7807_v53 }
 0x4d2   : > { %3857 = vmatmul.msk.f32.gmra.mxu3 %vm1634_vm13, %v7778_v43  ;;  %vm7810_vm13 = vcmp.eq.s32.totalorder %v7782_v61, %v7807_v53  ;;  %vm7836_vm11 = vcmp.eq.s32.totalorder %v7795_v0, %v7807_v53  ;;  %vm7838_vm8 = vcmp.eq.s32.totalorder %v7797_v41, %v7807_v53  ;;  %vm7839_vm15 = vcmp.eq.s32.totalorder %v7800_v23, %v7807_v53 }
 0x4d5   : > { %v1265_v37 = vpop.f32.mrf.mxu0 }
 0x4d6   : > { %2356 = vrot.lane.b32.xlu0 %v6712_v8, %s4946_s5  ;;  %2366 = vrot.lane.b32.xlu1 %v6827_v58, %s4946_s5  ;;  %v1474_v32 = vpop.f32.mrf.mxu1 }
 0x4d7   : > { %2364 = vrot.lane.b32.xlu2 %v6795_v1, %s4946_s5  ;;  %v6947_v59 = vadd.f32 %v1474_v32, %v1265_v37 }
 0x4da   : > { %3858 = vmatmul.msk.f32.vlgmr.msrb.gmra.mxu3 %vm7808_vm14, %v7778_v43 }
 0x4dd   : > { %v6953_v49 = vpop.f32.mrf.mxu3  ;;  %v1268_v6 = vpop.f32.mrf.mxu0 }
 0x4de   : > { %7809 = vst [vmem:[#allocation48_spill] sm:$0xff] %v6953_v49  ;;  %2350 = vrot.lane.b32.xlu0 %v6658_v39, %s4946_s5  ;;  %2372 = vrot.lane.b32.xlu1 %v2178_v57, %s4946_s5  ;;  %v1477_v8 = vpop.f32.mrf.mxu1 }
 0x4df   : > { %2358 = vrot.lane.b32.xlu2 %v6729_v18, %s4946_s5  ;;  %v6960_v1 = vadd.f32 %v1477_v8, %v1268_v6 }
 0x4e2   : > { %3859 = vmatmul.msk.f32.gmra.mxu3 %vm7810_vm13, %v7778_v43 }
 0x4e5   : > { %v6966_v58 = vpop.f32.mrf.mxu3  ;;  %v1271_v39 = vpop.f32.mrf.mxu0 }
 0x4e6   : > { %7811 = vst [vmem:[#allocation19_spill] sm:$0xff] %v6966_v58  ;;  %2344 = vrot.lane.b32.xlu0 %v7812_v47, %s4946_s5  ;;  %2360 = vrot.lane.b32.xlu1 %v6749_v29, %s4946_s5  ;;  %v1480_v57 = vpop.f32.mrf.mxu1  ;;  %v7819_v29 = vld [vmem:[#allocation27_spill] sm:$0xff] }
 0x4e7   : > { %2352 = vrot.lane.b32.xlu2 %v7813_v56, %s4946_s5  ;;  %v6974_v18 = vadd.f32 %v1480_v57, %v1271_v39  ;;  %vm7820_vm9 = vcmp.eq.s32.totalorder %v7819_v29, %v7807_v53 }
 0x4ea   : > { %3860 = vmatmul.msk.f32.gmra.mxu3 %vm7815_vm7, %v7778_v43  ;;  %vm7840_vm7 = vcmp.eq.s32.totalorder %v7802_v20, %v7807_v53 }
 0x4ed   : > { %v6980_v28 = vpop.f32.mrf.mxu3  ;;  %v6990_v30 = vpop.f32.mrf.mxu0 }
 0x4ee   : > { %7816 = vst [vmem:[#allocation44_spill] sm:$0xff] %v6980_v28  ;;  %2354 = vrot.lane.b32.xlu1 %v7817_v40, %s4946_s5  ;;  %v6994_v63 = vpop.f32.mrf.mxu1 }
 0x4ef   : > { %2346 = vrot.lane.b32.xlu2 %v7818_v54, %s4946_s5 }
 0x4f2   : > { %3861 = vmatmul.msk.f32.gmra.mxu3 %vm7820_vm9, %v7778_v43 }
 0x4f5   : > { %v6992_v35 = vpop.f32.mrf.mxu3  ;;  %v1277_v12 = vpop.f32.mrf.mxu0 }
 0x4f6   : > { %7821 = vst [vmem:[#allocation24_spill] sm:$0xff] %v6992_v35  ;;  %2348 = vrot.lane.b32.xlu1 %v7822_v24, %s4946_s5  ;;  %v1486_v37 = vpop.f32.mrf.mxu1 }
 0x4f8   : > { %v2914_v57 = vpop.permute.xlu0 %2913 }
 0x4f9   : > { %v2919_v25 = vpop.permute.xlu2 %2918  ;;  %v3059_v29 = vmul.f32 %v2914_v57, %v6752_v51  ;;  %v7071_v57 = vadd.f32 %v1486_v37, %v1277_v12 }
 0x4fa   : > { %3862 = vmatmul.msk.f32.gmra.mxu3 %vm7824_vm3, %v7778_v43 }
 0x4fd   : > { %v7002_v7 = vpop.f32.mrf.mxu3  ;;  %v7013_v56 = vpop.f32.mrf.mxu0 }
 0x4fe   : > { %7825 = vst [vmem:[#allocation60_spill] sm:$0xff] %v7002_v7  ;;  %v7015_v54 = vpop.f32.mrf.mxu1 }
 0x501   : > { %v2934_v32 = vpop.permute.xlu2 %2933 }
 0x502   : > { %v3063_v6 = vmul.f32 %v2934_v32, %v6832_v5  ;;  %3863 = vmatmul.msk.f32.gmra.mxu3 %vm7826_vm5, %v7778_v43 }
 0x504   : > { %v3130_v8 = vand.u32 2147483647, %v3063_v6 }
 0x505   : > { %v7009_v47 = vpop.f32.mrf.mxu3 }
 0x506   : > { %7827 = vst [vmem:[#allocation59_spill] sm:$0xff] %v7009_v47  ;;  %v3196_v39 = vsel %vm3082_vm10, %v3063_v6, %v3130_v8  ;;  %v1283_v6 = vpop.f32.mrf.mxu0 }
 0x507   : > { %3359 = vmatpush.msra.mxu3 %v3196_v39  ;;  %v1492_v39 = vpop.f32.mrf.mxu1 }
 0x509   : > { %v2904_v40 = vpop.permute.xlu2 %2903 }
 0x50a   : > { %3864 = vmatmul.msk.f32.gmra.mxu3 %vm7828_vm0, %v7778_v43  ;;  %vm7842_vm0 = vcmp.eq.s32.totalorder %v7804_v16, %v7807_v53 }
 0x50d   : > { %v7021_v5 = vpop.f32.mrf.mxu3 }
 0x50e   : > { %7829 = vst [vmem:[#allocation57_spill] sm:$0xff] %v7021_v5 }
 0x50f   : > { %v1495_v58 = vpop.f32.mrf.mxu1 }
 0x510   : > { %v2929_v24 = vpop.permute.xlu0 %2928 }
 0x511   : > { %v3062_v32 = vmul.f32 %v2929_v24, %v6808_v34  ;;  %v2889_v47 = vpop.permute.xlu2 %2888  ;;  %v1286_v34 = vpop.f32.mrf.mxu0 }
 0x512   : > { %3865 = vmatmul.msk.f32.gmra.mxu3 %vm7830_vm1, %v7778_v43  ;;  %v3054_v37 = vmul.f32 %v2889_v47, %v6878_v19 }
 0x513   : > { %v3129_v8 = vand.u32 2147483647, %v3062_v32 }
 0x515   : > { %v7028_v7 = vpop.f32.mrf.mxu3  ;;  %v3195_v35 = vsel %vm3082_vm10, %v3062_v32, %v3129_v8  ;;  %v3060_v32 = vmul.f32 %v2919_v25, %v6812_v21  ;;  %v3057_v25 = vmul.f32 %v2904_v40, %v6854_v50 }
 0x516   : > { %7831 = vst [vmem:[#allocation56_spill] sm:$0xff] %v7028_v7  ;;  %3360 = vmatpush.msra.mxu3 %v3195_v35 }
 0x517   : > { %v7051_v7 = vpop.f32.mrf.mxu1  ;;  %v3124_v50 = vand.u32 2147483647, %v3057_v25 }
 0x518   : > { %v2899_v28 = vpop.permute.xlu0 %2898 }
 0x519   : > { %v7032_v5 = vpop.permute.xlu2 %2873  ;;  %v7049_v8 = vpop.f32.mrf.mxu0  ;;  %v3056_v0 = vmul.f32 %v2899_v28, %v6825_v60 }
 0x51a   : > { %3866 = vmatmul.msk.f32.gmra.mxu3 %vm7832_vm12, %v7778_v43 }
 0x51d   : > { %v7038_v24 = vpop.f32.mrf.mxu3 }
 0x51e   : > { %7833 = vst [vmem:[#allocation55_spill] sm:$0xff] %v7038_v24 }
 0x51f   : > { %v1501_v12 = vpop.f32.mrf.mxu1 }
 0x520   : > { %v2884_v49 = vpop.permute.xlu0 %2883  ;;  %v2909_v27 = vpop.permute.xlu1 %2908 }
 0x521   : > { %v7040_v62 = vpop.permute.xlu2 %2858  ;;  %v3058_v21 = vmul.f32 %v2909_v27, %v6848_v46  ;;  %v1292_v28 = vpop.f32.mrf.mxu0  ;;  %v3053_v19 = vmul.f32 %v2884_v49, %v6841_v38  ;;  %v3051_v38 = vmul.f32 %v7032_v5, %v6894_v22 }
 0x522   : > { %3867 = vmatmul.msk.f32.gmra.mxu3 %vm7834_vm2, %v7778_v43 }
 0x523   : > { %v3125_v61 = vand.u32 2147483647, %v3058_v21  ;;  %v3120_v49 = vand.u32 2147483647, %v3053_v19 }
 0x525   : > { %v7046_v35 = vpop.f32.mrf.mxu3 }
 0x526   : > { %7835 = vst [vmem:[#allocation54_spill] sm:$0xff] %v7046_v35  ;;  %v3127_v35 = vand.u32 2147483647, %v3060_v32 }
 0x528   : > { %v7053_v9 = vpop.permute.xlu0 %2868  ;;  %v2924_v24 = vpop.permute.xlu1 %2923  ;;  %v3193_v51 = vsel %vm3082_vm10, %v3060_v32, %v3127_v35 }
 0x529   : > { %v3061_v3 = vmul.f32 %v2924_v24, %v6868_v17  ;;  %v2371_v15 = vpop.permute.xlu2 %2370  ;;  %v3126_v17 = vand.u32 2147483647, %v3059_v29  ;;  %v7067_v24 = vadd.f32 %v1492_v39, %v1283_v6  ;;  %v7088_v39 = vadd.f32 %v1501_v12, %v1292_v28 }
 0x52a   : > { %3868 = vmatmul.msk.f32.gmra.mxu3 %vm7836_vm11, %v7778_v43  ;;  %v3118_v28 = vand.u32 2147483647, %v3051_v38  ;;  %vm7844_vm11 = vcmp.eq.s32.totalorder %v7806_v31, %v7807_v53  ;;  %v7846_v53 = vld [vmem:[#allocation26_spill] sm:$0xff] }
 0x52b   : > { %v3128_v55 = vand.u32 2147483647, %v3061_v3  ;;  %v3192_v60 = vsel %vm3082_vm10, %v3059_v29, %v3126_v17  ;;  %v3190_v29 = vsel %vm3082_vm10, %v3057_v25, %v3124_v50 }
 0x52d   : > { %v7063_v52 = vpop.f32.mrf.mxu3  ;;  %v3194_v10 = vsel %vm3082_vm10, %v3061_v3, %v3128_v55  ;;  %v7075_v3 = vadd.f32 %v1495_v58, %v1286_v34  ;;  %v3123_v58 = vand.u32 2147483647, %v3056_v0 }
 0x52e   : > { %7837 = vst [vmem:[#allocation58_spill] sm:$0xff] %v7063_v52  ;;  %3361 = vmatpush.msra.mxu3 %v3194_v10 }
 0x52f   : > { %v2501_v47 = vadd.f32 %v2371_v15, %v7075_v3 }
 0x530   : > { %v2369_v27 = vpop.permute.xlu0 %2368  ;;  %3362 = vmatpush.msra.mxu3 %v3193_v51  ;;  %v2894_v46 = vpop.permute.xlu1 %2893  ;;  %v3121_v51 = vand.u32 2147483647, %v3054_v37 }
 0x531   : > { %v2500_v40 = vadd.f32 %v2369_v27, %v7067_v24  ;;  %v2365_v52 = vpop.permute.xlu2 %2364  ;;  %v3055_v55 = vmul.f32 %v2894_v46, %v6887_v42  ;;  %v2629_v15 = vmul.f32 0.01, %v2501_v47  ;;  %vm2565_vm14 = vcmp.ge.f32.partialorder %v2501_v47, 0.0 }
 0x532   : > { %v2498_v10 = vadd.f32 %v2365_v52, %v7071_v57  ;;  %3869 = vmatmul.msk.f32.gmra.mxu3 %vm7838_vm8, %v7778_v43  ;;  %v3191_v52 = vsel %vm3082_vm10, %v3058_v21, %v3125_v61  ;;  %v3189_v21 = vsel %vm3082_vm10, %v3056_v0, %v3123_v58  ;;  %v3187_v22 = vsel %vm3082_vm10, %v3054_v37, %v3121_v51 }
 0x533   : > { %vm2564_vm6 = vcmp.ge.f32.partialorder %v2500_v40, 0.0  ;;  %v2628_v6 = vmul.f32 0.01, %v2500_v40  ;;  %3363 = vmatpush.msra.mxu3 %v3192_v60  ;;  %v3122_v32 = vand.u32 2147483647, %v3055_v55  ;;  %v7119_v58 = vadd.f32 %v6994_v63, %v6990_v30 }
 0x534   : > { %vm2562_vm4 = vcmp.ge.f32.partialorder %v2498_v10, 0.0  ;;  %v2626_v42 = vmul.f32 0.01, %v2498_v10 }
 0x535   : > { %3364 = vmatpush.msra.mxu3 %v3191_v52  ;;  %v7090_v34 = vpop.f32.mrf.mxu3  ;;  %v2692_v35 = vsel %vm2564_vm6, %v2500_v40, %v2628_v6  ;;  %v3188_v0 = vsel %vm3082_vm10, %v3055_v55, %v3122_v32  ;;  %v3186_v55 = vsel %vm3082_vm10, %v3053_v19, %v3120_v49  ;;  %v2693_v6 = vsel %vm2565_vm14, %v2501_v47, %v2629_v15 }
 0x536   : > { %2998 = vperm.xlu1 %4747, %v2692_v35   ;;  %v2690_v17 = vsel %vm2562_vm4, %v2498_v10, %v2626_v42  ;;  %vm7847_vm4 = vcmp.eq.s32.totalorder %v7779_v26, %v7846_v53 }
 0x537   : > { %3365 = vmatpush.msra.mxu3 %v3190_v29  ;;  %2988 = vperm.xlu0 %4746, %v2690_v17  }
 0x538   : > { %v2375_v61 = vpop.permute.xlu0 %2374  ;;  %v2879_v27 = vpop.permute.xlu1 %2878 }
 0x539   : > { %v2503_v46 = vadd.f32 %v2375_v61, %v7088_v39  ;;  %3366 = vmatpush.msra.mxu3 %v3189_v21  ;;  %v3052_v25 = vmul.f32 %v2879_v27, %v6903_v33  ;;  %v2359_v50 = vpop.permute.xlu2 %2358  ;;  %v3050_v33 = vmul.f32 %v7053_v9, %v6864_v11  ;;  %v3048_v9 = vmul.f32 %v7040_v62, %v6912_v45 }
 0x53a   : > { %3870 = vmatmul.msk.f32.gmra.mxu3 %vm7839_vm15, %v7778_v43  ;;  %v2495_v12 = vadd.f32 %v2359_v50, %v6960_v1  ;;  %v3184_v62 = vsel %vm3082_vm10, %v3051_v38, %v3118_v28  ;;  %v7142_v27 = vadd.f32 %v7015_v54, %v7013_v56  ;;  %v7157_v28 = vadd.f32 %v7051_v7, %v7049_v8 }
 0x53b   : > { %vm2567_vm13 = vcmp.ge.f32.partialorder %v2503_v46, 0.0  ;;  %v2631_v40 = vmul.f32 0.01, %v2503_v46  ;;  %3367 = vmatpush.msra.mxu3 %v3188_v0  ;;  %v3119_v10 = vand.u32 2147483647, %v3052_v25 }
 0x53c   : > { %v3117_v11 = vand.u32 2147483647, %v3050_v33  ;;  %v2623_v47 = vmul.f32 0.01, %v2495_v12  ;;  %vm2559_vm9 = vcmp.ge.f32.partialorder %v2495_v12, 0.0 }
 0x53d   : > { %3368 = vmatpush.msra.mxu3 %v3187_v22  ;;  %v7112_v5 = vpop.f32.mrf.mxu3  ;;  %v2695_v60 = vsel %vm2567_vm13, %v2503_v46, %v2631_v40  ;;  %v3185_v42 = vsel %vm3082_vm10, %v3052_v25, %v3119_v10  ;;  %v3115_v63 = vand.u32 2147483647, %v3048_v9 }
 0x53e   : > { %3013 = vperm.xlu1 %4747, %v2695_v60   ;;  %v3183_v32 = vsel %vm3082_vm10, %v3050_v33, %v3117_v11  ;;  %v2687_v21 = vsel %vm2559_vm9, %v2495_v12, %v2623_v47 }
 0x53f   : > { %3369 = vmatpush.msra.mxu3 %v3186_v55  ;;  %3003 = vperm.xlu0 %4746, %v2693_v6   ;;  %v3181_v25 = vsel %vm3082_vm10, %v3048_v9, %v3115_v63 }
 0x540   : > { %v2363_v37 = vpop.permute.xlu0 %2362  ;;  %v2864_v52 = vpop.permute.xlu1 %2863 }
 0x541   : > { %v2497_v35 = vadd.f32 %v2363_v37, %v7119_v58  ;;  %3370 = vmatpush.msra.mxu3 %v3185_v42  ;;  %v3049_v29 = vmul.f32 %v2864_v52, %v6921_v14  ;;  %v2353_v19 = vpop.permute.xlu2 %2352 }
 0x542   : > { %3871 = vmatmul.msk.f32.gmra.mxu3 %vm7840_vm7, %v7778_v43  ;;  %v2492_v61 = vadd.f32 %v2353_v19, %v6925_v4 }
 0x543   : > { %vm2561_vm3 = vcmp.ge.f32.partialorder %v2497_v35, 0.0  ;;  %v2625_v45 = vmul.f32 0.01, %v2497_v35  ;;  %v3116_v30 = vand.u32 2147483647, %v3049_v29  ;;  %3371 = vmatpush.msra.mxu3 %v3184_v62 }
 0x544   : > { %vm2556_vm5 = vcmp.ge.f32.partialorder %v2492_v61, 0.0  ;;  %v2620_v15 = vmul.f32 0.01, %v2492_v61 }
 0x545   : > { %3372 = vmatpush.msra.mxu3 %v3183_v32  ;;  %v7135_v14 = vpop.f32.mrf.mxu3  ;;  %v2689_v17 = vsel %vm2561_vm3, %v2497_v35, %v2625_v45  ;;  %v3182_v51 = vsel %vm3082_vm10, %v3049_v29, %v3116_v30 }
 0x546   : > { %7841 = vst [vmem:[#allocation20_spill] sm:$0xff] %v7135_v14  ;;  %2983 = vperm.xlu1 %4747, %v2689_v17   ;;  %v2684_v60 = vsel %vm2556_vm5, %v2492_v61, %v2620_v15 }
 0x547   : > { %3373 = vmatpush.msra.mxu3 %v3182_v51  ;;  %2973 = vperm.xlu0 %4746, %v2687_v21   ;;  %v7848_v21 = vld [vmem:[#allocation35_spill] sm:$0xff] }
 0x548   : > { %v2357_v46 = vpop.permute.xlu0 %2356  ;;  %v2367_v50 = vpop.permute.xlu1 %2366  ;;  %vm7849_vm13 = vcmp.eq.s32.totalorder %v7848_v21, %v7846_v53 }
 0x549   : > { %v2494_v38 = vadd.f32 %v2357_v46, %v6947_v59  ;;  %3374 = vmatpush.msra.mxu3 %v3181_v25  ;;  %v2499_v49 = vadd.f32 %v2367_v50, %v7142_v27  ;;  %v2347_v0 = vpop.permute.xlu2 %2346 }
 0x54a   : > { %3872 = vmatmul.msk.f32.gmra.mxu3 %vm7842_vm0, %v7778_v43  ;;  %v2489_v22 = vadd.f32 %v2347_v0, %v6874_v2 }
 0x54b   : > { %vm2558_vm1 = vcmp.ge.f32.partialorder %v2494_v38, 0.0  ;;  %v2622_v56 = vmul.f32 0.01, %v2494_v38  ;;  %vm2563_vm12 = vcmp.ge.f32.partialorder %v2499_v49, 0.0  ;;  %v2627_v54 = vmul.f32 0.01, %v2499_v49 }
 0x54c   : > { %vm2553_vm2 = vcmp.ge.f32.partialorder %v2489_v22, 0.0  ;;  %v2617_v11 = vmul.f32 0.01, %v2489_v22 }
 0x54d   : > { %v7152_v40 = vpop.f32.mrf.mxu3  ;;  %v2686_v33 = vsel %vm2558_vm1, %v2494_v38, %v2622_v56  ;;  %v2691_v10 = vsel %vm2563_vm12, %v2499_v49, %v2627_v54  ;;  %v7850_v49 = vld [vmem:[#allocation22_spill] sm:$0xff] }
 0x54e   : > { %7843 = vst [vmem:[#allocation21_spill] sm:$0xff] %v7152_v40  ;;  %2968 = vperm.xlu1 %4747, %v2686_v33   ;;  %2993 = vperm.xlu2 %4748, %v2691_v10   ;;  %v2681_v35 = vsel %vm2553_vm2, %v2489_v22, %v2617_v11  ;;  %v7851_v56 = vld [vmem:[#allocation34_spill] sm:$0xff]  ;;  %v7853_v10 = vld [vmem:[#allocation27_spill] sm:$0xff] }
 0x54f   : > { %2958 = vperm.xlu0 %4746, %v2684_v60   ;;  %vm7852_vm9 = vcmp.eq.s32.totalorder %v7851_v56, %v7846_v53  ;;  %vm7854_vm5 = vcmp.eq.s32.totalorder %v7853_v10, %v7846_v53  ;;  %v7855_v60 = vld [vmem:[#allocation38_spill] sm:$0xff] }
 0x550   : > { %v2351_v12 = vpop.permute.xlu0 %2350  ;;  %v2373_v55 = vpop.permute.xlu1 %2372  ;;  %vm7856_vm0 = vcmp.eq.s32.totalorder %v7855_v60, %v7846_v53 }
 0x551   : > { %v2491_v6 = vadd.f32 %v2351_v12, %v6908_v36  ;;  %v2502_v9 = vadd.f32 %v2373_v55, %v7157_v28  ;;  %v7857_v55 = vld [vmem:[#allocation37_spill] sm:$0xff] }
 0x552   : > { %3873 = vmatmul.msk.f32.gmra.mxu3 %vm7844_vm11, %v7778_v43  ;;  %vm7858_vm1 = vcmp.eq.s32.totalorder %v7857_v55, %v7846_v53 }
 0x553   : > { %vm2555_vm8 = vcmp.ge.f32.partialorder %v2491_v6, 0.0  ;;  %v2619_v37 = vmul.f32 0.01, %v2491_v6  ;;  %vm2566_vm6 = vcmp.ge.f32.partialorder %v2502_v9, 0.0  ;;  %v2630_v42 = vmul.f32 0.01, %v2502_v9 }
 0x555   : > { %v7165_v7 = vpop.f32.mrf.mxu3  ;;  %v2683_v8 = vsel %vm2555_vm8, %v2491_v6, %v2619_v37  ;;  %v2694_v52 = vsel %vm2566_vm6, %v2502_v9, %v2630_v42  ;;  %v7859_v9 = vld [vmem:[#allocation29_spill] sm:$0xff]  ;;  %v7861_v37 = vld [vmem:[#allocation40_spill] sm:$0xff] }
 0x556   : > { %7845 = vst [vmem:[#allocation17_spill] sm:$0xff] %v7165_v7  ;;  %2953 = vperm.xlu1 %4747, %v2683_v8   ;;  %3008 = vperm.xlu2 %4748, %v2694_v52   ;;  %vm7860_vm12 = vcmp.eq.s32.totalorder %v7859_v9, %v7846_v53  ;;  %vm7862_vm2 = vcmp.eq.s32.totalorder %v7861_v37, %v7846_v53  ;;  %v7863_v8 = vld [vmem:[#allocation39_spill] sm:$0xff] }
 0x557   : > { %2943 = vperm.xlu0 %4746, %v2681_v35   ;;  %vm7864_vm11 = vcmp.eq.s32.totalorder %v7863_v8, %v7846_v53  ;;  %v7865_v35 = vld [vmem:[#allocation30_spill] sm:$0xff] }
 0x558   : > { %v2345_v29 = vpop.permute.xlu0 %2344  ;;  %v2361_v19 = vpop.permute.xlu1 %2360  ;;  %vm7866_vm8 = vcmp.eq.s32.totalorder %v7865_v35, %v7846_v53 }
 0x559   : > { %v2488_v47 = vadd.f32 %v2345_v29, %v6850_v44  ;;  %v2496_v62 = vadd.f32 %v2361_v19, %v6974_v18 }
 0x55a   : > { %3874 = vmatmul.msk.f32.vlgmr.msra.gmra.mxu3 %vm7847_vm4, %v7778_v43  ;;  %vm7869_vm4 = vcmp.eq.s32.totalorder %v7797_v41, %v7846_v53 }
 0x55b   : > { %vm2552_vm15 = vcmp.ge.f32.partialorder %v2488_v47, 0.0  ;;  %v2616_v45 = vmul.f32 0.01, %v2488_v47  ;;  %vm2560_vm14 = vcmp.ge.f32.partialorder %v2496_v62, 0.0  ;;  %v2624_v30 = vmul.f32 0.01, %v2496_v62 }
 0x55d   : > { %v7173_v63 = vpop.f32.mrf.mxu3  ;;  %v2680_v32 = vsel %vm2552_vm15, %v2488_v47, %v2616_v45  ;;  %v2688_v17 = vsel %vm2560_vm14, %v2496_v62, %v2624_v30  ;;  %v7867_v45 = vld [vmem:[#allocation41_spill] sm:$0xff]  ;;  %vm7870_vm15 = vcmp.eq.s32.totalorder %v7800_v23, %v7846_v53  ;;  %vm7871_vm14 = vcmp.eq.s32.totalorder %v7802_v20, %v7846_v53 }
 0x55e   : > { %2938 = vperm.xlu1 %4747, %v2680_v32   ;;  %2978 = vperm.xlu2 %4748, %v2688_v17   ;;  %vm7868_vm6 = vcmp.eq.s32.totalorder %v7867_v45, %v7846_v53 }
 0x560   : > { %v2355_v51 = vpop.permute.xlu1 %2354 }
 0x561   : > { %v2493_v61 = vadd.f32 %v2355_v51, %v6935_v13 }
 0x562   : > { %3875 = vmatmul.msk.f32.gmra.mxu3 %vm7849_vm13, %v7778_v43  ;;  %vm7872_vm13 = vcmp.eq.s32.totalorder %v7804_v16, %v7846_v53 }
 0x563   : > { %vm2557_vm7 = vcmp.ge.f32.partialorder %v2493_v61, 0.0  ;;  %v2621_v46 = vmul.f32 0.01, %v2493_v61 }
 0x565   : > { %v7180_v25 = vpop.f32.mrf.mxu3  ;;  %v2685_v50 = vsel %vm2557_vm7, %v2493_v61, %v2621_v46  ;;  %vm7873_vm7 = vcmp.eq.s32.totalorder %v7806_v31, %v7846_v53  ;;  %v7878_v53 = vld [vmem:[#allocation19_spill] sm:$0xff] }
 0x566   : > { %2963 = vperm.xlu2 %4748, %v2685_v50   ;;  %v3315_v48 = vadd.f32 %v7180_v25, %v7878_v53  ;;  %v3213_v53 = vld [vmem:[%s5118_s25] sm:$0xff] }
 0x568   : > { %v2349_v38 = vpop.permute.xlu1 %2348 }
 0x569   : > { %v2490_v15 = vadd.f32 %v2349_v38, %v7850_v49 }
 0x56a   : > { %3876 = vmatmul.msk.f32.gmra.mxu3 %vm7852_vm9, %v7778_v43 }
 0x56b   : > { %vm2554_vm3 = vcmp.ge.f32.partialorder %v2490_v15, 0.0  ;;  %v2618_v54 = vmul.f32 0.01, %v2490_v15 }
 0x56d   : > { %v7187_v0 = vpop.f32.mrf.mxu3  ;;  %v2682_v33 = vsel %vm2554_vm3, %v2490_v15, %v2618_v54 }
 0x56e   : > { %2948 = vperm.xlu2 %4748, %v2682_v33  }
 0x572   : > { %3877 = vmatmul.msk.f32.gmra.mxu3 %vm7854_vm5, %v7778_v43 }
 0x575   : > { %v7193_v22 = vpop.f32.mrf.mxu3 }
 0x57a   : > { %3878 = vmatmul.msk.f32.gmra.mxu3 %vm7856_vm0, %v7778_v43 }
 0x57d   : > { %v7199_v12 = vpop.f32.mrf.mxu3 }
 0x582   : > { %3879 = vmatmul.msk.f32.gmra.mxu3 %vm7858_vm1, %v7778_v43 }
 0x585   : > { %v7205_v6 = vpop.f32.mrf.mxu3 }
 0x58a   : > { %3880 = vmatmul.msk.f32.gmra.mxu3 %vm7860_vm12, %v7778_v43 }
 0x58d   : > { %v7211_v11 = vpop.f32.mrf.mxu3 }
 0x592   : > { %3881 = vmatmul.msk.f32.gmra.mxu3 %vm7862_vm2, %v7778_v43 }
 0x595   : > { %v7217_v42 = vpop.f32.mrf.mxu3 }
 0x59a   : > { %3882 = vmatmul.msk.f32.gmra.mxu3 %vm7864_vm11, %v7778_v43 }
 0x59d   : > { %v7223_v52 = vpop.f32.mrf.mxu3 }
 0x5a2   : > { %3883 = vmatmul.msk.f32.gmra.mxu3 %vm7866_vm8, %v7778_v43 }
 0x5a5   : > { %v7229_v29 = vpop.f32.mrf.mxu3 }
 0x5a8   : > { %v2999_v19 = vpop.permute.xlu1 %2998  ;;  %v2994_v47 = vpop.permute.xlu2 %2993 }
 0x5a9   : > { %v2989_v62 = vpop.permute.xlu0 %2988  ;;  %v3076_v38 = vmul.f32 %v2999_v19, %v7067_v24  ;;  %v3075_v33 = vmul.f32 %v2994_v47, %v7142_v27 }
 0x5aa   : > { %3884 = vmatmul.msk.f32.gmra.mxu3 %vm7868_vm6, %v7778_v43 }
 0x5ab   : > { %v3142_v19 = vand.u32 2147483647, %v3075_v33 }
 0x5ad   : > { %v7235_v30 = vpop.f32.mrf.mxu3 }
 0x5b0   : > { %v3014_v32 = vpop.permute.xlu1 %3013  ;;  %v3009_v17 = vpop.permute.xlu2 %3008 }
 0x5b1   : > { %v3079_v51 = vmul.f32 %v3014_v32, %v7088_v39  ;;  %v3078_v61 = vmul.f32 %v3009_v17, %v7157_v28  ;;  %v3004_v46 = vpop.permute.xlu0 %3003  ;;  %v3143_v28 = vand.u32 2147483647, %v3076_v38  ;;  %v3074_v32 = vmul.f32 %v2989_v62, %v7071_v57 }
 0x5b2   : > { %v3077_v50 = vmul.f32 %v3004_v46, %v7075_v3  ;;  %3885 = vmatmul.msk.f32.gmra.mxu3 %vm7869_vm4, %v7778_v43 }
 0x5b3   : > { %v3146_v15 = vand.u32 2147483647, %v3079_v51  ;;  %v3145_v54 = vand.u32 2147483647, %v3078_v61  ;;  %v3141_v14 = vand.u32 2147483647, %v3074_v32  ;;  %v3209_v57 = vsel %vm3082_vm10, %v3076_v38, %v3143_v28 }
 0x5b4   : > { %v3144_v7 = vand.u32 2147483647, %v3077_v50 }
 0x5b5   : > { %v7246_v40 = vpop.f32.mrf.mxu3  ;;  %v3212_v39 = vsel %vm3082_vm10, %v3079_v51, %v3146_v15  ;;  %v3211_v3 = vsel %vm3082_vm10, %v3078_v61, %v3145_v54 }
 0x5b6   : > { %3424 = vmatpush.msrb.mxu3 %v3212_v39  ;;  %v3210_v47 = vsel %vm3082_vm10, %v3077_v50, %v3144_v7  ;;  %v3208_v7 = vsel %vm3082_vm10, %v3075_v33, %v3142_v19 }
 0x5b8   : > { %3425 = vmatpush.msrb.mxu3 %v3211_v3  ;;  %v2984_v17 = vpop.permute.xlu1 %2983  ;;  %v2979_v24 = vpop.permute.xlu2 %2978 }
 0x5b9   : > { %v3073_v46 = vmul.f32 %v2984_v17, %v7119_v58  ;;  %v2974_v27 = vpop.permute.xlu0 %2973  ;;  %v3072_v51 = vmul.f32 %v2979_v24, %v6974_v18  ;;  %v3207_v18 = vsel %vm3082_vm10, %v3074_v32, %v3141_v14 }
 0x5ba   : > { %3426 = vmatpush.msrb.mxu3 %v3210_v47  ;;  %v3071_v58 = vmul.f32 %v2974_v27, %v6960_v1 }
 0x5bb   : > { %3886 = vmatmul.msk.f32.gmra.mxu3 %vm7870_vm15, %v7778_v43  ;;  %v3140_v62 = vand.u32 2147483647, %v3073_v46  ;;  %v3139_v50 = vand.u32 2147483647, %v3072_v51 }
 0x5bc   : > { %3427 = vmatpush.msrb.mxu3 %v3209_v57  ;;  %v3138_v39 = vand.u32 2147483647, %v3071_v58 }
 0x5bd   : > { %v7264_v61 = vpop.f32.mrf.mxu3  ;;  %v3206_v1 = vsel %vm3082_vm10, %v3073_v46, %v3140_v62  ;;  %v3205_v14 = vsel %vm3082_vm10, %v3072_v51, %v3139_v50 }
 0x5be   : > { %3428 = vmatpush.msrb.mxu3 %v3208_v7 }
 0x5c0   : > { %v2969_v15 = vpop.permute.xlu1 %2968  ;;  %3429 = vmatpush.msrb.mxu3 %v3207_v18  ;;  %v2964_v54 = vpop.permute.xlu2 %2963 }
 0x5c1   : > { %v3070_v38 = vmul.f32 %v2969_v15, %v6947_v59  ;;  %v3069_v3 = vmul.f32 %v2964_v54, %v6935_v13  ;;  %v2959_v28 = vpop.permute.xlu0 %2958  ;;  %v3204_v13 = vsel %vm3082_vm10, %v3071_v58, %v3138_v39 }
 0x5c2   : > { %3430 = vmatpush.msrb.mxu3 %v3206_v1  ;;  %v3068_v33 = vmul.f32 %v2959_v28, %v6925_v4  ;;  %v7874_v1 = vld [vmem:[#allocation49_spill] sm:$0xff] }
 0x5c3   : > { %v3137_v17 = vand.u32 2147483647, %v3070_v38  ;;  %3887 = vmatmul.msk.f32.gmra.mxu3 %vm7871_vm14, %v7778_v43  ;;  %v3136_v59 = vand.u32 2147483647, %v3069_v3  ;;  %vm7875_vm9 = vcmp.eq.s32.totalorder %v7779_v26, %v7874_v1  ;;  %vm7877_vm3 = vcmp.eq.s32.totalorder %v7848_v21, %v7874_v1  ;;  %v7880_v26 = vld [vmem:[#allocation44_spill] sm:$0xff] }
 0x5c4   : > { %3431 = vmatpush.msrb.mxu3 %v3205_v14  ;;  %v3135_v24 = vand.u32 2147483647, %v3068_v33  ;;  %vm7881_vm5 = vcmp.eq.s32.totalorder %v7853_v10, %v7874_v1  ;;  %v7882_v21 = vld [vmem:[#allocation24_spill] sm:$0xff]  ;;  %vm7883_vm0 = vcmp.eq.s32.totalorder %v7855_v60, %v7874_v1  ;;  %vm7885_vm1 = vcmp.eq.s32.totalorder %v7857_v55, %v7874_v1  ;;  %v7886_v10 = vld [vmem:[#allocation59_spill] sm:$0xff]  ;;  %v7888_v60 = vld [vmem:[#allocation57_spill] sm:$0xff] }
 0x5c5   : > { %v7281_v32 = vpop.f32.mrf.mxu3  ;;  %v3203_v4 = vsel %vm3082_vm10, %v3070_v38, %v3137_v17  ;;  %v3202_v57 = vsel %vm3082_vm10, %v3069_v3, %v3136_v59  ;;  %v3321_v25 = vadd.f32 %v7193_v22, %v7882_v21  ;;  %v3327_v22 = vadd.f32 %v7205_v6, %v7886_v10  ;;  %v7890_v55 = vld [vmem:[#allocation56_spill] sm:$0xff] }
 0x5c6   : > { %3432 = vmatpush.msrb.mxu3 %v3204_v13  ;;  %v3201_v50 = vsel %vm3082_vm10, %v3068_v33, %v3135_v24  ;;  %vm7887_vm12 = vcmp.eq.s32.totalorder %v7859_v9, %v7874_v1  ;;  %vm7889_vm2 = vcmp.eq.s32.totalorder %v7861_v37, %v7874_v1  ;;  %v3333_v6 = vadd.f32 %v7217_v42, %v7890_v55  ;;  %v7892_v9 = vld [vmem:[#allocation55_spill] sm:$0xff]  ;;  %v7894_v37 = vld [vmem:[#allocation54_spill] sm:$0xff] }
 0x5c7   : > { %vm7891_vm11 = vcmp.eq.s32.totalorder %v7863_v8, %v7874_v1  ;;  %vm7893_vm8 = vcmp.eq.s32.totalorder %v7865_v35, %v7874_v1  ;;  %v3339_v42 = vadd.f32 %v7229_v29, %v7894_v37  ;;  %vm7895_vm6 = vcmp.eq.s32.totalorder %v7867_v45, %v7874_v1  ;;  %v7896_v8 = vld [vmem:[#allocation58_spill] sm:$0xff] }
 0x5c8   : > { %v2954_v19 = vpop.permute.xlu1 %2953  ;;  %3433 = vmatpush.msrb.mxu3 %v3203_v4  ;;  %v2949_v46 = vpop.permute.xlu2 %2948  ;;  %vm7897_vm4 = vcmp.eq.s32.totalorder %v7797_v41, %v7874_v1  ;;  %v3345_v35 = vadd.f32 %v7246_v40, %v7090_v34  ;;  %vm7898_vm15 = vcmp.eq.s32.totalorder %v7800_v23, %v7874_v1  ;;  %v3348_v45 = vadd.f32 %v7264_v61, %v7112_v5  ;;  %v7900_v41 = vld [vmem:[#allocation20_spill] sm:$0xff]  ;;  %v7902_v5 = vld [vmem:[#allocation21_spill] sm:$0xff] }
 0x5c9   : > { %v3067_v27 = vmul.f32 %v2954_v19, %v6908_v36  ;;  %v3066_v47 = vmul.f32 %v2949_v46, %v7850_v49  ;;  %v2944_v51 = vpop.permute.xlu0 %2943  ;;  %vm7899_vm14 = vcmp.eq.s32.totalorder %v7802_v20, %v7874_v1  ;;  %v3351_v34 = vadd.f32 %v7281_v32, %v7900_v41  ;;  %v7904_v32 = vld [vmem:[#allocation17_spill] sm:$0xff] }
 0x5ca   : > { %v3065_v62 = vmul.f32 %v2944_v51, %v6874_v2  ;;  %3434 = vmatpush.msrb.mxu3 %v3202_v57 }
 0x5cb   : > { %v3134_v58 = vand.u32 2147483647, %v3067_v27  ;;  %v3133_v7 = vand.u32 2147483647, %v3066_v47  ;;  %3888 = vmatmul.msk.f32.gmra.mxu3 %vm7872_vm13, %v7778_v43  ;;  %vm7901_vm13 = vcmp.eq.s32.totalorder %v7804_v16, %v7874_v1 }
 0x5cc   : > { %3435 = vmatpush.msrb.mxu3 %v3201_v50  ;;  %v3132_v36 = vand.u32 2147483647, %v3065_v62 }
 0x5cd   : > { %v7298_v49 = vpop.f32.mrf.mxu3  ;;  %v3200_v18 = vsel %vm3082_vm10, %v3067_v27, %v3134_v58  ;;  %v3199_v2 = vsel %vm3082_vm10, %v3066_v47, %v3133_v7 }
 0x5ce   : > { %3436 = vmatpush.msrb.mxu3 %v3200_v18  ;;  %v3198_v39 = vsel %vm3082_vm10, %v3065_v62, %v3132_v36  ;;  %v3354_v61 = vadd.f32 %v7298_v49, %v7902_v5 }
 0x5d0   : > { %v2939_v15 = vpop.permute.xlu1 %2938  ;;  %3437 = vmatpush.msrb.mxu3 %v3199_v2 }
 0x5d1   : > { %v3064_v54 = vmul.f32 %v2939_v15, %v6850_v44  ;;  %v7876_v44 = vld [vmem:[#allocation48_spill] sm:$0xff] }
 0x5d2   : > { %3438 = vmatpush.msrb.mxu3 %v3198_v39  ;;  %v3312_v17 = vadd.f32 %v7173_v63, %v7876_v44  ;;  %v3318_v63 = vadd.f32 %v7187_v0, %v7880_v26  ;;  %v3214_v26 = vld [vmem:[%s5118_s25 + $0x8] sm:$0xff] }
 0x5d3   : > { %v3131_v38 = vand.u32 2147483647, %v3064_v54  ;;  %3889 = vmatmul.msk.f32.gmra.mxu3 %vm7873_vm7, %v7778_v43  ;;  %vm7903_vm7 = vcmp.eq.s32.totalorder %v7806_v31, %v7874_v1 }
 0x5d5   : > { %v7311_v3 = vpop.f32.mrf.mxu3  ;;  %v3197_v28 = vsel %vm3082_vm10, %v3064_v54, %v3131_v38  ;;  %vm7879_vm10 = vcmp.eq.s32.totalorder %v7851_v56, %v7874_v1  ;;  %v7884_v56 = vld [vmem:[#allocation60_spill] sm:$0xff] }
 0x5d6   : > { %3439 = vmatpush.msrb.mxu3 %v3197_v28  ;;  %v3324_v0 = vadd.f32 %v7199_v12, %v7884_v56  ;;  %v3330_v12 = vadd.f32 %v7211_v11, %v7888_v60  ;;  %v3336_v11 = vadd.f32 %v7223_v52, %v7892_v9  ;;  %v3342_v52 = vadd.f32 %v7235_v30, %v7896_v8 }
 0x5db   : > { %3890 = vmatmul.msk.f32.vlgmr.msrb.gmra.mxu3 %vm7875_vm9, %v7778_v43 }
 0x5dd   : > { %v3376_v33 = vpop.f32.mrf.mxu3 }
 0x5de   : > { %v7321_v14 = vadd.f32 %v3376_v33, %v3312_v17  ;;  %v3357_v17 = vadd.f32 %v7311_v3, %v7904_v32  ;;  %v3215_v3 = vld [vmem:[%s5118_s25 + $0x10] sm:$0xff] }
 0x5e3   : > { %3891 = vmatmul.msk.f32.gmra.mxu3 %vm7877_vm3, %v7778_v43 }
 0x5e5   : > { %v3379_v59 = vpop.f32.mrf.mxu3 }
 0x5e6   : > { %v7329_v13 = vadd.f32 %v3379_v59, %v3315_v48 }
 0x5eb   : > { %3892 = vmatmul.msk.f32.gmra.mxu3 %vm7879_vm10, %v7778_v43 }
 0x5ed   : > { %v3382_v24 = vpop.f32.mrf.mxu3 }
 0x5ee   : > { %v7337_v4 = vadd.f32 %v3382_v24, %v3318_v63 }
 0x5f3   : > { %3893 = vmatmul.msk.f32.gmra.mxu3 %vm7881_vm5, %v7778_v43 }
 0x5f5   : > { %v3385_v19 = vpop.f32.mrf.mxu3 }
 0x5f6   : > { %v7345_v46 = vadd.f32 %v3385_v19, %v3321_v25 }
 0x5fb   : > { %3894 = vmatmul.msk.f32.gmra.mxu3 %vm7883_vm0, %v7778_v43 }
 0x5fd   : > { %v3388_v27 = vpop.f32.mrf.mxu3 }
 0x5fe   : > { %v7353_v47 = vadd.f32 %v3388_v27, %v3324_v0 }
 0x603   : > { %3895 = vmatmul.msk.f32.gmra.mxu3 %vm7885_vm1, %v7778_v43 }
 0x605   : > { %v3391_v51 = vpop.f32.mrf.mxu3 }
 0x606   : > { %v7361_v57 = vadd.f32 %v3391_v51, %v3327_v22 }
 0x60b   : > { %3896 = vmatmul.msk.f32.gmra.mxu3 %vm7887_vm12, %v7778_v43 }
 0x60d   : > { %v3394_v62 = vpop.f32.mrf.mxu3 }
 0x60e   : > { %v7369_v58 = vadd.f32 %v3394_v62, %v3330_v12 }
 0x613   : > { %3897 = vmatmul.msk.f32.gmra.mxu3 %vm7889_vm2, %v7778_v43 }
 0x615   : > { %v3397_v7 = vpop.f32.mrf.mxu3 }
 0x616   : > { %v7377_v50 = vadd.f32 %v3397_v7, %v3333_v6 }
 0x61b   : > { %3898 = vmatmul.msk.f32.gmra.mxu3 %vm7891_vm11, %v7778_v43 }
 0x61d   : > { %v3400_v36 = vpop.f32.mrf.mxu3 }
 0x61e   : > { %v7385_v18 = vadd.f32 %v3400_v36, %v3336_v11 }
 0x623   : > { %3899 = vmatmul.msk.f32.gmra.mxu3 %vm7893_vm8, %v7778_v43 }
 0x625   : > { %v3403_v2 = vpop.f32.mrf.mxu3 }
 0x626   : > { %v7393_v15 = vadd.f32 %v3403_v2, %v3339_v42 }
 0x62b   : > { %3900 = vmatmul.msk.f32.gmra.mxu3 %vm7895_vm6, %v7778_v43 }
 0x62d   : > { %v3406_v54 = vpop.f32.mrf.mxu3 }
 0x62e   : > { %v7401_v39 = vadd.f32 %v3406_v54, %v3342_v52 }
 0x633   : > { %3901 = vmatmul.msk.f32.gmra.mxu3 %vm7897_vm4, %v7778_v43 }
 0x635   : > { %v3409_v29 = vpop.f32.mrf.mxu3 }
 0x636   : > { %v7409_v38 = vadd.f32 %v3409_v29, %v3345_v35 }
 0x63b   : > { %3902 = vmatmul.msk.f32.gmra.mxu3 %vm7898_vm15, %v7778_v43 }
 0x63e   : > { %v3412_v30 = vpop.f32.mrf.mxu3 }
 0x63f   : > { %v7417_v28 = vadd.f32 %v3412_v30, %v3348_v45 }
 0x643   : > { %3903 = vmatmul.msk.f32.gmra.mxu3 %vm7899_vm14, %v7778_v43 }
 0x646   : > { %v3415_v40 = vpop.f32.mrf.mxu3 }
 0x647   : > { %v7425_v23 = vadd.f32 %v3415_v40, %v3351_v34 }
 0x64b   : > { %3904 = vmatmul.msk.f32.gmra.mxu3 %vm7901_vm13, %v7778_v43 }
 0x64e   : > { %v3418_v44 = vpop.f32.mrf.mxu3 }
 0x64f   : > { %v7433_v20 = vadd.f32 %v3418_v44, %v3354_v61 }
 0x653   : > { %3905 = vmatmul.msk.f32.gmra.mxu3 %vm7903_vm7, %v7778_v43 }
 0x656   : > { %v3421_v33 = vpop.f32.mrf.mxu3 }
 0x657   : > { %v7441_v16 = vadd.f32 %v3421_v33, %v3357_v17 }
 0x65e   : > { %v3441_v49 = vpop.f32.mrf.mxu3 }
 0x65f   : > { %v3442_v48 = vadd.f32 %v3441_v49, %v7321_v14  ;;  %v3216_v14 = vld [vmem:[%s5118_s25 + $0x18] sm:$0xff] }
 0x661   : > { %v3489_v59 = vadd.f32 %v3442_v48, %v3213_v53 }
 0x663   : > { %3505 = vst [vmem:[%s5118_s25] sm:$0xff] %v3489_v59 }
 0x666   : > { %v3444_v63 = vpop.f32.mrf.mxu3 }
 0x667   : > { %v3445_v43 = vadd.f32 %v3444_v63, %v7329_v13  ;;  %v3217_v13 = vld [vmem:[%s5118_s25 + $0x20] sm:$0xff] }
 0x669   : > { %v3490_v31 = vadd.f32 %v3445_v43, %v3214_v26 }
 0x66b   : > { %3506 = vst [vmem:[%s5118_s25 + $0x8] sm:$0xff] %v3490_v31 }
 0x66e   : > { %v3447_v1 = vpop.f32.mrf.mxu3 }
 0x66f   : > { %v3448_v24 = vadd.f32 %v3447_v1, %v7337_v4  ;;  %v3218_v4 = vld [vmem:[%s5118_s25 + $0x28] sm:$0xff] }
 0x671   : > { %v3491_v21 = vadd.f32 %v3448_v24, %v3215_v3 }
 0x673   : > { %3507 = vst [vmem:[%s5118_s25 + $0x10] sm:$0xff] %v3491_v21 }
 0x676   : > { %v3450_v25 = vpop.f32.mrf.mxu3 }
 0x677   : > { %v3451_v19 = vadd.f32 %v3450_v25, %v7345_v46  ;;  %v3219_v46 = vld [vmem:[%s5118_s25 + $0x30] sm:$0xff] }
 0x679   : > { %v3492_v56 = vadd.f32 %v3451_v19, %v3216_v14 }
 0x67b   : > { %3508 = vst [vmem:[%s5118_s25 + $0x18] sm:$0xff] %v3492_v56 }
 0x67e   : > { %v3453_v0 = vpop.f32.mrf.mxu3 }
 0x67f   : > { %v3454_v27 = vadd.f32 %v3453_v0, %v7353_v47  ;;  %v3220_v47 = vld [vmem:[%s5118_s25 + $0x38] sm:$0xff] }
 0x681   : > { %v3493_v10 = vadd.f32 %v3454_v27, %v3217_v13 }
 0x683   : > { %3509 = vst [vmem:[%s5118_s25 + $0x20] sm:$0xff] %v3493_v10 }
 0x686   : > { %v3456_v22 = vpop.f32.mrf.mxu3 }
 0x687   : > { %v3457_v51 = vadd.f32 %v3456_v22, %v7361_v57  ;;  %v3221_v57 = vld [vmem:[%s5118_s25 + $0x40] sm:$0xff] }
 0x689   : > { %v3494_v60 = vadd.f32 %v3457_v51, %v3218_v4 }
 0x68b   : > { %3510 = vst [vmem:[%s5118_s25 + $0x28] sm:$0xff] %v3494_v60 }
 0x68e   : > { %v3459_v12 = vpop.f32.mrf.mxu3 }
 0x68f   : > { %v3460_v62 = vadd.f32 %v3459_v12, %v7369_v58  ;;  %v3222_v58 = vld [vmem:[%s5118_s25 + $0x48] sm:$0xff] }
 0x691   : > { %v3495_v55 = vadd.f32 %v3460_v62, %v3219_v46 }
 0x693   : > { %3511 = vst [vmem:[%s5118_s25 + $0x30] sm:$0xff] %v3495_v55 }
 0x696   : > { %v3462_v6 = vpop.f32.mrf.mxu3 }
 0x697   : > { %v3463_v7 = vadd.f32 %v3462_v6, %v7377_v50  ;;  %v3223_v50 = vld [vmem:[%s5118_s25 + $0x50] sm:$0xff] }
 0x699   : > { %v3496_v9 = vadd.f32 %v3463_v7, %v3220_v47 }
 0x69b   : > { %3512 = vst [vmem:[%s5118_s25 + $0x38] sm:$0xff] %v3496_v9 }
 0x69e   : > { %v3465_v11 = vpop.f32.mrf.mxu3 }
 0x69f   : > { %v3466_v36 = vadd.f32 %v3465_v11, %v7385_v18  ;;  %v3224_v18 = vld [vmem:[%s5118_s25 + $0x58] sm:$0xff] }
 0x6a1   : > { %v3497_v37 = vadd.f32 %v3466_v36, %v3221_v57 }
 0x6a3   : > { %3513 = vst [vmem:[%s5118_s25 + $0x40] sm:$0xff] %v3497_v37 }
 0x6a6   : > { %v3468_v42 = vpop.f32.mrf.mxu3 }
 0x6a7   : > { %v3469_v2 = vadd.f32 %v3468_v42, %v7393_v15  ;;  %v3225_v15 = vld [vmem:[%s5118_s25 + $0x60] sm:$0xff] }
 0x6a9   : > { %v3498_v8 = vadd.f32 %v3469_v2, %v3222_v58 }
 0x6ab   : > { %3514 = vst [vmem:[%s5118_s25 + $0x48] sm:$0xff] %v3498_v8 }
 0x6ae   : > { %v3471_v52 = vpop.f32.mrf.mxu3 }
 0x6af   : > { %v3472_v54 = vadd.f32 %v3471_v52, %v7401_v39  ;;  %v3226_v39 = vld [vmem:[%s5118_s25 + $0x68] sm:$0xff] }
 0x6b1   : > { %v3499_v35 = vadd.f32 %v3472_v54, %v3223_v50 }
 0x6b3   : > { %3515 = vst [vmem:[%s5118_s25 + $0x50] sm:$0xff] %v3499_v35 }
 0x6b6   : > { %v3474_v29 = vpop.f32.mrf.mxu3 }
 0x6b7   : > { %v3475_v45 = vadd.f32 %v3474_v29, %v7409_v38  ;;  %v3227_v38 = vld [vmem:[%s5118_s25 + $0x70] sm:$0xff] }
 0x6b9   : > { %v3500_v30 = vadd.f32 %v3475_v45, %v3224_v18 }
 0x6bb   : > { %3516 = vst [vmem:[%s5118_s25 + $0x58] sm:$0xff] %v3500_v30 }
 0x6be   : > { %v3477_v41 = vpop.f32.mrf.mxu3 }
 0x6bf   : > { %v3478_v34 = vadd.f32 %v3477_v41, %v7417_v28 }
 0x6c1   : > { %v3501_v40 = vadd.f32 %v3478_v34, %v3225_v15 }
 0x6c3   : > { %3517 = vst [vmem:[%s5118_s25 + $0x60] sm:$0xff] %v3501_v40 }
 0x6c6   : > { %v3480_v5 = vpop.f32.mrf.mxu3 }
 0x6c7   : > { %v3481_v61 = vadd.f32 %v3480_v5, %v7425_v23  ;;  %v3228_v23 = vld [vmem:[%s5118_s25 + $0x78] sm:$0xff] }
 0x6c9   : > { %v3502_v44 = vadd.f32 %v3481_v61, %v3226_v39 }
 0x6cb   : > { %3518 = vst [vmem:[%s5118_s25 + $0x68] sm:$0xff] %v3502_v44 }
 0x6ce   : > { %v3483_v32 = vpop.f32.mrf.mxu3 }
 0x6cf   : > { %v3484_v17 = vadd.f32 %v3483_v32, %v7433_v20 }
 0x6d1   : > { %v3503_v28 = vadd.f32 %v3484_v17, %v3227_v38 }
 0x6d3   : > { %3519 = vst [vmem:[%s5118_s25 + $0x70] sm:$0xff] %v3503_v28 }
 0x6d6   : > { %v3486_v33 = vpop.f32.mrf.mxu3 }
 0x6d7   : > { %v3487_v53 = vadd.f32 %v3486_v33, %v7441_v16 }
 0x6d9   : > { %v3504_v49 = vadd.f32 %v3487_v53, %v3228_v23 }
 0x6db   : > { %3520 = vst [vmem:[%s5118_s25 + $0x78] sm:$0xff] %v3504_v49 }
 0x6dc   : > { %4837 = shalt.err (!%p4834_p5)
}
 0x6dd   : > { %s4948_s1 = smov 128   ;;  %s4949_s25 = smov 8  }
 0x6de   : > { %4249 = dma.vmem_to_hbm [thread:$0]  (%p5037_p6), %s3535_s12, 2048, %s3537_s28, %s3522_s29, %s4948_s1, %s4948_s1, %s4949_s25  }
 0x6df PF: > { %p4266_p7 = scmp.ge.s32.totalorder %s4936_s19, 2  ;;  %s3551_s15 = sand.u32 1, %s4896_s9  }
 0x6e0   : > { %s3552_s17 = scalar_lea.sflag [#allocation5], %s3551_s15 }
 0x6e1   : > { %p4260_p10 = pnand %p4266_p7, %p5042_p8 }
 0x6e3   : > { %p4261_p11 = pneg %p4260_p10 }
 0x6e5   : > { %4891 = dma.done.wait (%p4261_p11), %s3552_s17, 2048  }
 0x6e6   : > { %4893 = vsyncadd (%p4261_p11), %s3552_s17, 4294965248  ;;  %s19_s19 = sadd.s32 1, %s4936_s19   ;;  %s7905_s23 = sld [smem:[#allocation16_spill]] }
 0x6e7   : > { %p16_p12 = scmp.ge.s32.totalorder %s19_s19, 10   ;;  %s7906_s15 = sld [smem:[#allocation12_spill]] }
 0x6e8   : > { %s7907_s16 = sld [smem:[#allocation13_spill]]  ;;  %s7910_s9 = smov %s4900_s10 }
 0x6e9   : > { %s7908_s17 = sld [smem:[#allocation14_spill]]  ;;  %s7911_s10 = smov %s4904_s11 }
 0x6ea   : > { %s7909_s18 = sld [smem:[#allocation15_spill]]  ;;  %s7912_s11 = smov %s5094_s30 }
 0x6eb   : > { %s7913_s12 = smov %s4912_s13  ;;  %s7914_s13 = smov %s4916_s14 }
 0x6ec   : > { %s7915_s14 = smov %s7905_s23  ;;  %18 = sbr.rel (!%p16_p12) target bundleno = 12 (0xc), region = 84 }
 0x6f1   :  { %3558 = vsyncpa [#allocation4], 1 }
 0x6f2   :  { %3560 = vsyncpa [#allocation4 + $0x1], 1 }
 0x6f3   :  { %3561 = vsyncpa [#allocation7], 1 }
 0x6f4   :  { %3562 = vsyncpa [#allocation5], 1 }
 0x6f5   :  { %3564 = vsyncpa [#allocation5 + $0x1], 1 }

</bundles_post_ra>
